<compile_context>
chip_gen: v5e
topology: v5e:2x2
jax: 0.10.0
libtpu: 0.0.40
codegen_flags: <defaults>
</compile_context>

<pallas_src>
import jax
import jax.numpy as jnp
from jax.experimental import pallas as pl
from jax.experimental.pallas import tpu as pltpu


def _se_gate_mul_kernel(scale_ref, x_ref, o_ref):
    # scale_ref: (TC, 1)   per-channel pre-sigmoid gate
    # x_ref:     (TC, HW)  feature-map tile
    s = scale_ref[...].astype(jnp.float32)
    gate = jax.nn.sigmoid(s)  # exact; lowers to EUP, hidden under DMA
    o_ref[...] = (x_ref[...].astype(jnp.float32) * gate).astype(o_ref.dtype)


def _pick_tile_c(nc, sublane):
    """Largest divisor of nc that is a sublane multiple and gives >= 2 blocks."""
    max_blocks = nc // sublane if sublane > 0 else 1
    for nblocks in range(2, max_blocks + 1):
        if nc % nblocks == 0 and (nc // nblocks) % sublane == 0:
            return nc // nblocks
    return nc  # single full-extent block (last resort)


def sigmoid_mul(x315, x311, *, tile_c=None):
    """sigmoid(x315) * x311 with NCHW inputs, x315 shape (N, C, 1, 1)."""
    N, C, H, W = x311.shape
    assert x315.shape == (N, C, 1, 1)
    NC, HW = N * C, H * W

    x2d = x311.reshape(NC, HW)
    s2d = x315.reshape(NC, 1)

    if tile_c is None:
        sublane = 16 if x311.dtype == jnp.bfloat16 else 8
        tile_c = _pick_tile_c(NC, sublane)

    grid = (NC // tile_c,)

    itemsize = jnp.dtype(x311.dtype).itemsize
    cost = pl.CostEstimate(
        flops=2 * NC * HW,
        transcendentals=NC,
        bytes_accessed=2 * NC * HW * itemsize + NC * itemsize,
    )

    out = pl.pallas_call(
        _se_gate_mul_kernel,
        out_shape=jax.ShapeDtypeStruct((NC, HW), x311.dtype),
        grid_spec=pltpu.PrefetchScalarGridSpec(
            num_scalar_prefetch=0,
            grid=grid,
            in_specs=[
                pl.BlockSpec((tile_c, 1), lambda i: (i, 0)),
                pl.BlockSpec((tile_c, HW), lambda i: (i, 0)),
            ],
            out_specs=pl.BlockSpec((tile_c, HW), lambda i: (i, 0)),
        ),
        compiler_params=pltpu.CompilerParams(
            dimension_semantics=("parallel",)
        ),
        cost_estimate=cost,
    )(s2d, x2d)

    return out.reshape(N, C, H, W)


if __name__ == "__main__":
    key = jax.random.PRNGKey(0)
    k1, k2 = jax.random.split(key)

    # Shapes implied by the module's forward.
    x311 = jax.random.normal(k1, (1, 1344, 14, 14), dtype=jnp.float32)
    x315 = jax.random.normal(k2, (1, 1344, 1, 1), dtype=jnp.float32)

    out = sigmoid_mul(x315, x311)
    out = jax.block_until_ready(out)

    ref = jax.nn.sigmoid(x315) * x311
    assert out.shape == ref.shape
    assert jnp.allclose(out, ref, atol=1e-5, rtol=1e-5)

    print("KERNEL_OK")
</pallas_src>

<mosaic_0001>
module attributes {stable_mosaic.version = 11 : i64} {
  func.func @_se_gate_mul_kernel(%arg0: i32, %arg1: memref<672x1xf32, #tpu.memory_space<vmem>>, %arg2: memref<672x196xf32, #tpu.memory_space<vmem>>, %arg3: memref<672x196xf32, #tpu.memory_space<vmem>>) attributes {dimension_semantics = [#tpu.dimension_semantics<parallel>], iteration_bounds = array<i64: 2>, scalar_prefetch = 0 : i64, scratch_operands = 0 : i64, tpu.core_type = #tpu.core_type<tc>, window_params = [{transform_indices = @transform_0, window_bounds = array<i64: 672, 1>}, {transform_indices = @transform_1, window_bounds = array<i64: 672, 196>}, {transform_indices = @transform_2, window_bounds = array<i64: 672, 196>}]} {
    %c0 = arith.constant 0 : index
    %c0_0 = arith.constant 0 : index
    %0 = vector.load %arg1[%c0, %c0_0] : memref<672x1xf32, #tpu.memory_space<vmem>>, vector<672x1xf32>
    %1 = arith.negf %0 : vector<672x1xf32>
    %2 = math.exp %1 : vector<672x1xf32>
    %cst = arith.constant 1.000000e+00 : f32
    %3 = vector.broadcast %cst : f32 to vector<672x1xf32>
    %4 = arith.addf %3, %2 : vector<672x1xf32>
    %5 = arith.divf %3, %4 : vector<672x1xf32>
    %c0_1 = arith.constant 0 : index
    %c0_2 = arith.constant 0 : index
    %6 = vector.load %arg2[%c0_1, %c0_2] : memref<672x196xf32, #tpu.memory_space<vmem>>, vector<672x196xf32>
    %7 = vector.broadcast %5 : vector<672x1xf32> to vector<672x196xf32>
    %8 = arith.mulf %6, %7 : vector<672x196xf32>
    %c0_3 = arith.constant 0 : index
    %c0_4 = arith.constant 0 : index
    %9 = vector.load %arg3[%c0_3, %c0_4] : memref<672x196xf32, #tpu.memory_space<vmem>>, vector<672x196xf32>
    tpu.vector_store %arg3[%c0_3, %c0_4], %8 {strides = array<i32>} : memref<672x196xf32, #tpu.memory_space<vmem>>, vector<672x196xf32>,
    return
  }
  func.func @transform_0(%arg0: i32) -> (i32, i32) {
    %c0_i32 = arith.constant 0 : i32
    %c0_i32_0 = arith.constant 0 : i32
    return %arg0, %c0_i32 : i32, i32
  }
  func.func @transform_1(%arg0: i32) -> (i32, i32) {
    %c0_i32 = arith.constant 0 : i32
    %c0_i32_0 = arith.constant 0 : i32
    return %arg0, %c0_i32 : i32, i32
  }
  func.func @transform_2(%arg0: i32) -> (i32, i32) {
    %c0_i32 = arith.constant 0 : i32
    %c0_i32_0 = arith.constant 0 : i32
    return %arg0, %c0_i32 : i32, i32
  }
}

</mosaic_0001>

<bundles_post_ra>
// kernel: tpu_custom_call.1
= control target key start
LH: loop header
LB: loop body
LE: loop exit
PB: predicated region body
PF: predicated region fallthrough
CT: control target
= control target key end

     0   :  { %s3319_s9 = smov 0   ;;  %s6041_s0 = inlined_call_operand.vmem [shape: f32[1344,1], index: 0, kind: input, shape index: {}]   ;;  %s6042_s1 = inlined_call_operand.vmem [shape: f32[1344,196], index: 1, kind: input, shape index: {}]   ;;  %s6043_s2 = inlined_call_operand.vmem [shape: f32[1344,196], index: 2, kind: output, shape index: {}]  }
   0x1 LB: > { %s2849_s10 = sadd.s32 4294967295, %s3301_s9   ;;  %p2853_p0 = scmp.ge.s32.totalorder %s3301_s9, 1  ;;  %s3301_s9 = sphi %s3319_s9, %s12_s9  }
   0x2   : > { %p125_p1 = scmp.lt.s32.totalorder %s3301_s9, 3 }
   0x4   : > { %p126_p2 = pnand %p2853_p0, %p125_p1 }
   0x5   : > { %s154_s11 = smul.u32 (!%p126_p2), 84, %s2849_s10 }
   0x6   : > { %129 = sbr.rel (%p126_p2) target bundleno = 506 (0x1fa), region = 28 }
   0x7   : > { %p155_p3 = scmp.lt.s32.totalorder (!%p126_p2), %s154_s11, 167 }
   0xb   : > { %v3303_v0 = vmov 0   ;;  %s6377_s11 = smov (!%p155_p3, %s154_s11), 167 }
   0xc   : > { %2958 = vset.pattern.permute.xlu2 %v3303_v0  ;;  %2957 = vset.pattern.permute.xlu1 %v3303_v0  ;;  %s2854_s12 = sshll.u32 %s6377_s11, 3  ;;  %s2945_s16 = sshll.u32 %s6377_s11, 4 }
   0xd   : > { %2956 = vset.pattern.permute.xlu0 %v3303_v0  ;;  %s3333_s15 = scalar_lea.vmem %s6041_s0, %s2854_s12  ;;  %s4063_s19 = scalar_lea.vmem %s6042_s1, %s2945_s16 }
   0xe   : > { %v178_v1 = vld [vmem:[%s3333_s15 + $0x20] sm:$0xff]  ;;  %v176_v2 = vld [vmem:[%s3333_s15 + $0x10] sm:$0xff]  ;;  %v179_v7 = vld [vmem:[%s3333_s15 + $0x28] sm:$0xff]  ;;  %s4118_s22 = scalar_lea.vmem %s6043_s2, %s2945_s16 }
   0xf   : > { %v174_v3 = vld [vmem:[%s3333_s15] sm:$0xff]  ;;  %v2863_v4 = vmul.f32 -1.442695, %v178_v1  ;;  %v2861_v5 = vmul.f32 -1.442695, %v176_v2  ;;  %v177_v8 = vld [vmem:[%s3333_s15 + $0x18] sm:$0xff] }
  0x10   : > { %v2859_v6 = vmul.f32 -1.442695, %v174_v3  ;;  %v175_v9 = vld [vmem:[%s3333_s15 + $0x8] sm:$0xff]  ;;  %v2864_v10 = vmul.f32 -1.442695, %v179_v7  ;;  %v182_v13 = vld [vmem:[%s3333_s15 + $0x40] sm:$0xff] }
  0x11   : > { %2959 = vpow2.f32 %v2863_v4  ;;  %v2862_v11 = vmul.f32 -1.442695, %v177_v8  ;;  %v2860_v12 = vmul.f32 -1.442695, %v175_v9  ;;  %v181_v14 = vld [vmem:[%s3333_s15 + $0x38] sm:$0xff]  ;;  %v180_v17 = vld [vmem:[%s3333_s15 + $0x30] sm:$0xff] }
  0x12   : > { %2961 = vpow2.f32 %v2861_v5  ;;  %v2867_v15 = vmul.f32 -1.442695, %v182_v13  ;;  %v2866_v16 = vmul.f32 -1.442695, %v181_v14  ;;  %v2865_v23 = vmul.f32 -1.442695, %v180_v17 }
  0x13   : > { %2963 = vpow2.f32 %v2859_v6  ;;  %v185_v25 = vld [vmem:[%s3333_s15 + $0x58] sm:$0xff] }
  0x14   : > { %2965 = vpow2.f32 %v2864_v10  ;;  %v3361_v35 = vmul.f32 -1.442695, %v185_v25 }
  0x15   : > { %2967 = vpow2.f32 %v2862_v11 }
  0x16   : > { %2969 = vpow2.f32 %v2860_v12 }
  0x17   : > { %v2960_v18 = vpop.eup %2959  ;;  %2971 = vpow2.f32 %v2867_v15 }
  0x18   : > { %v2962_v19 = vpop.eup %2961  ;;  %v3344_v20 = vadd.f32 1.0, %v2960_v18  ;;  %2973 = vpow2.f32 %v2866_v16 }
  0x19   : > { %v2964_v21 = vpop.eup %2963  ;;  %v3346_v22 = vadd.f32 1.0, %v2962_v19 }
  0x1a   : > { %v2966_v24 = vpop.eup %2965  ;;  %2975 = vrcp.f32 %v3344_v20  ;;  %v663_v27 = vand.u32 2147483647, %v3344_v20  ;;  %v665_v28 = vand.u32 2147483648, %v3344_v20  ;;  %v3355_v32 = vadd.f32 1.0, %v2964_v21 }
  0x1b   : > { %v2968_v26 = vpop.eup %2967  ;;  %2977 = vrcp.f32 %v3346_v22  ;;  %v633_v30 = vand.u32 2147483647, %v3346_v22  ;;  %v635_v31 = vand.u32 2147483648, %v3346_v22  ;;  %v3357_v33 = vadd.f32 1.0, %v2966_v24 }
  0x1c   : > { %v2970_v29 = vpop.eup %2969  ;;  %v3359_v34 = vadd.f32 1.0, %v2968_v26  ;;  %2979 = vpow2.f32 %v2865_v23  ;;  %vm659_vm0 = vweird.f32 %v3344_v20  ;;  %vm629_vm1 = vweird.f32 %v3346_v22 }
  0x1d   : > { %v2972_v36 = vpop.eup %2971  ;;  %2981 = vrcp.f32 %v3355_v32  ;;  %v605_v37 = vand.u32 2147483648, %v3355_v32  ;;  %vm3367_vm2 = vcmp.eq.f32.partialorder %v663_v27, 8.507059e+37  ;;  %v666_v40 = vor.u32 1.1754944e-38, %v665_v28 }
  0x1e   : > { %v2974_v38 = vpop.eup %2973  ;;  %v603_v41 = vand.u32 2147483647, %v3355_v32  ;;  %2983 = vrcp.f32 %v3357_v33  ;;  %v3373_v42 = vadd.f32 1.0, %v2970_v29  ;;  %vm3375_vm3 = vcmp.eq.f32.partialorder %v633_v30, 8.507059e+37 }
  0x1f   : > { %v636_v45 = vor.u32 1.1754944e-38, %v635_v31  ;;  %v680_v46 = vand.u32 2147483648, %v3357_v33  ;;  %2985 = vrcp.f32 %v3359_v34  ;;  %vm599_vm4 = vweird.f32 %v3355_v32 }
  0x20   : > { %v2976_v43 = vpop.eup %2975  ;;  %vm674_vm5 = vweird.f32 %v3357_v33  ;;  %v678_v49 = vand.u32 2147483647, %v3357_v33  ;;  %v3386_v51 = vor.u32 1.1754944e-38, %v605_v37  ;;  %v648_v52 = vand.u32 2147483647, %v3359_v34 }
  0x21   : > { %v2978_v47 = vpop.eup %2977  ;;  %v655_v48 = vmul.f32 %v2976_v43, %v3344_v20  ;;  %v650_v53 = vand.u32 2147483648, %v3359_v34  ;;  %vm660_vm6 = vweird.f32 %v2976_v43  ;;  %vm3390_vm7 = vcmp.eq.f32.partialorder %v603_v41, 8.507059e+37 }
  0x22   : > { %v625_v50 = vmul.f32 %v2978_v47, %v3346_v22  ;;  %v2980_v54 = vpop.eup %2979  ;;  %vm644_vm8 = vweird.f32 %v3359_v34  ;;  %2987 = vrcp.f32 %v3373_v42  ;;  %vm630_vm9 = vweird.f32 %v2978_v47  ;;  %vm3406_vm12 = vmor %vm659_vm0, %vm660_vm6  ;;  %v189_v22 = vld [vmem:[%s3333_s15 + $0x78] sm:$0xff] }
  0x23   : > { %v656_v55 = vsub.f32 1.0, %v655_v48  ;;  %v2982_v57 = vpop.eup %2981  ;;  %v681_v59 = vor.u32 1.1754944e-38, %v680_v46  ;;  %vm614_vm10 = vweird.f32 %v3373_v42  ;;  %vm3398_vm11 = vcmp.eq.f32.partialorder %v678_v49, 8.507059e+37  ;;  %vm3419_vm15 = vmor %vm629_vm1, %vm630_vm9 }
  0x24   : > { %v626_v58 = vsub.f32 1.0, %v625_v50  ;;  %v2984_v60 = vpop.eup %2983  ;;  %v595_v62 = vmul.f32 %v2982_v57, %v3355_v32  ;;  %v651_v0 = vor.u32 1.1754944e-38, %v650_v53  ;;  %v618_v1 = vand.u32 2147483647, %v3373_v42 }
  0x25   : > { %v657_v61 = vmul.f32 %v2976_v43, %v656_v55  ;;  %v2986_v2 = vpop.eup %2985  ;;  %vm600_vm13 = vweird.f32 %v2982_v57  ;;  %v670_v5 = vmul.f32 %v2984_v60, %v3357_v33  ;;  %vm3411_vm14 = vcmp.eq.f32.partialorder %v648_v52, 8.507059e+37  ;;  %v184_v33 = vld [vmem:[%s3333_s15 + $0x50] sm:$0xff] }
  0x26   : > { %v627_v4 = vmul.f32 %v2978_v47, %v626_v58  ;;  %v620_v7 = vand.u32 2147483648, %v3373_v42  ;;  %v596_v10 = vsub.f32 1.0, %v595_v62  ;;  %vm675_vm0 = vweird.f32 %v2984_v60  ;;  %vm3437_vm1 = vmor %vm599_vm4, %vm600_vm13 }
  0x27   : > { %v658_v8 = vadd.f32 %v2976_v43, %v657_v61  ;;  %v640_v11 = vmul.f32 %v2986_v2, %v3359_v34  ;;  %v671_v13 = vsub.f32 1.0, %v670_v5  ;;  %vm645_vm6 = vweird.f32 %v2986_v2  ;;  %v186_v61 = vld [vmem:[%s3333_s15 + $0x60] sm:$0xff] }
  0x28   : > { %v628_v12 = vadd.f32 %v2978_v47, %v627_v4  ;;  %v3424_v14 = vadd.f32 1.0, %v2972_v36  ;;  %v2988_v15 = vpop.eup %2987  ;;  %v597_v17 = vmul.f32 %v2982_v57, %v596_v10  ;;  %v3428_v19 = vadd.f32 1.0, %v2974_v38  ;;  %vm3456_vm4 = vmor %vm644_vm8, %vm645_vm6 }
  0x29   : > { %v662_v16 = vsel %vm3406_vm12, %v2976_v43, %v658_v8  ;;  %v641_v18 = vsub.f32 1.0, %v640_v11  ;;  %v672_v23 = vmul.f32 %v2984_v60, %v671_v13  ;;  %v610_v24 = vmul.f32 %v2988_v15, %v3373_v42  ;;  %v188_v42 = vld [vmem:[%s3333_s15 + $0x70] sm:$0xff] }
  0x2a   : > { %v667_v20 = vsel %vm3367_vm2, %v666_v40, %v662_v16  ;;  %v632_v21 = vsel %vm3419_vm15, %v2978_v47, %v628_v12  ;;  %v598_v26 = vadd.f32 %v2982_v57, %v597_v17  ;;  %vm3447_vm2 = vmor %vm674_vm5, %vm675_vm0  ;;  %v3451_v29 = vadd.f32 1.0, %v2980_v54  ;;  %v183_v40 = vld [vmem:[%s3333_s15 + $0x48] sm:$0xff] }
  0x2b   : > { %2044 = vperm.xlu2 %2958, %v667_v20   ;;  %v637_v25 = vsel %vm3375_vm3, %v636_v45, %v632_v21  ;;  %v642_v28 = vmul.f32 %v2986_v2, %v641_v18  ;;  %v673_v30 = vadd.f32 %v2984_v60, %v672_v23  ;;  %v611_v32 = vsub.f32 1.0, %v610_v24  ;;  %v190_v21 = vld [vmem:[%s3333_s15 + $0x80] sm:$0xff] }
  0x2c   : > { %2034 = vperm.xlu1 %2957, %v637_v25   ;;  %vm615_vm3 = vweird.f32 %v2988_v15  ;;  %2989 = vrcp.f32 %v3424_v14  ;;  %v602_v36 = vsel %vm3437_vm1, %v2982_v57, %v598_v26  ;;  %v723_v38 = vand.u32 2147483647, %v3424_v14 }
  0x2d   : > { %v643_v37 = vadd.f32 %v2986_v2, %v642_v28  ;;  %v725_v39 = vand.u32 2147483648, %v3424_v14  ;;  %v607_v34 = vsel %vm3390_vm7, %v3386_v51, %v602_v36  ;;  %v677_v41 = vsel %vm3447_vm2, %v2984_v60, %v673_v30  ;;  %vm3477_vm5 = vmor %vm614_vm10, %vm615_vm3  ;;  %v187_v60 = vld [vmem:[%s3333_s15 + $0x68] sm:$0xff] }
  0x2e   : > { %v612_v43 = vmul.f32 %v2988_v15, %v611_v32  ;;  %2991 = vrcp.f32 %v3428_v19  ;;  %2024 = vperm.xlu0 %2956, %v607_v34   ;;  %v2869_v46 = vmul.f32 -1.442695, %v184_v33  ;;  %v682_v47 = vsel %vm3398_vm11, %v681_v59, %v677_v41 }
  0x2f   : > { %v647_v44 = vsel %vm3456_vm4, %v2986_v2, %v643_v37  ;;  %v621_v49 = vor.u32 1.1754944e-38, %v620_v7  ;;  %v2868_v50 = vmul.f32 -1.442695, %v183_v40  ;;  %vm3485_vm7 = vcmp.eq.f32.partialorder %v618_v1, 8.507059e+37  ;;  %v191_v2 = vld [vmem:[%s3333_s15 + $0x88] sm:$0xff]  ;;  %v194_v37 = vld [vmem:[%s3333_s15 + $0xa0] sm:$0xff] }
  0x30   : > { %v613_v48 = vadd.f32 %v2988_v15, %v612_v43  ;;  %v652_v51 = vsel %vm3411_vm14, %v651_v0, %v647_v44  ;;  %vm719_vm8 = vweird.f32 %v3424_v14  ;;  %2993 = vrcp.f32 %v3451_v29  ;;  %v192_v43 = vld [vmem:[%s3333_s15 + $0x90] sm:$0xff] }
  0x31   : > { %vm3494_vm9 = vcmp.eq.f32.partialorder %v723_v38, 8.507059e+37  ;;  %v726_v56 = vor.u32 1.1754944e-38, %v725_v39  ;;  %2995 = vpow2.f32 %v3361_v35  ;;  %vm704_vm10 = vweird.f32 %v3428_v19  ;;  %v193_v38 = vld [vmem:[%s3333_s15 + $0x98] sm:$0xff] }
  0x32   : > { %v2990_v53 = vpop.eup %2989  ;;  %v617_v54 = vsel %vm3477_vm5, %v2988_v15, %v613_v48  ;;  %v708_v58 = vand.u32 2147483647, %v3428_v19  ;;  %v710_v59 = vand.u32 2147483648, %v3428_v19  ;;  %vm689_vm11 = vweird.f32 %v3451_v29 }
  0x33   : > { %2049 = vperm.xlu2 %2958, %v682_v47   ;;  %v715_v57 = vmul.f32 %v2990_v53, %v3424_v14  ;;  %v622_v63 = vsel %vm3485_vm7, %v621_v49, %v617_v54  ;;  %2997 = vpow2.f32 %v2869_v46  ;;  %v2873_v35 = vmul.f32 -1.442695, %v188_v42 }
  0x34   : > { %v2992_v62 = vpop.eup %2991  ;;  %2039 = vperm.xlu1 %2957, %v652_v51   ;;  %vm720_vm12 = vweird.f32 %v2990_v53  ;;  %2999 = vpow2.f32 %v2868_v50  ;;  %v693_v3 = vand.u32 2147483647, %v3451_v29  ;;  %v2872_v4 = vmul.f32 -1.442695, %v187_v60 }
  0x35   : > { %v716_v0 = vsub.f32 1.0, %v715_v57  ;;  %v700_v1 = vmul.f32 %v2992_v62, %v3428_v19  ;;  %3001 = vpow2.f32 %v2873_v35  ;;  %v2871_v5 = vmul.f32 -1.442695, %v186_v61  ;;  %vm3515_vm14 = vmor %vm719_vm8, %vm720_vm12 }
  0x36   : > { %v2994_v6 = vpop.eup %2993  ;;  %2029 = vperm.xlu0 %2956, %v622_v63   ;;  %vm705_vm13 = vweird.f32 %v2992_v62  ;;  %v695_v9 = vand.u32 2147483648, %v3451_v29  ;;  %vm3519_vm15 = vcmp.eq.f32.partialorder %v708_v58, 8.507059e+37  ;;  %v711_v13 = vor.u32 1.1754944e-38, %v710_v59 }
  0x37   : > { %v717_v7 = vmul.f32 %v2990_v53, %v716_v0  ;;  %v701_v8 = vsub.f32 1.0, %v700_v1  ;;  %v2996_v10 = vpop.eup %2995  ;;  %v685_v15 = vmul.f32 %v2994_v6, %v3451_v29  ;;  %v2876_v16 = vmul.f32 -1.442695, %v191_v2  ;;  %vm3531_vm0 = vmor %vm704_vm10, %vm705_vm13 }
  0x38   : > { %v3524_v20 = vadd.f32 1.0, %v2996_v10  ;;  %3003 = vpow2.f32 %v2872_v4  ;;  %vm690_vm6 = vweird.f32 %v2994_v6  ;;  %vm3535_vm1 = vcmp.eq.f32.partialorder %v693_v3, 8.507059e+37 }
  0x39   : > { %v718_v17 = vadd.f32 %v2990_v53, %v717_v7  ;;  %v702_v18 = vmul.f32 %v2992_v62, %v701_v8  ;;  %v2998_v14 = vpop.eup %2997  ;;  %v686_v24 = vsub.f32 1.0, %v685_v15  ;;  %3005 = vpow2.f32 %v2871_v5  ;;  %vm3553_vm2 = vmor %vm689_vm11, %vm690_vm6 }
  0x3a   : > { %v3000_v26 = vpop.eup %2999  ;;  %v696_v19 = vor.u32 1.1754944e-38, %v695_v9  ;;  %3007 = vrcp.f32 %v3524_v20  ;;  %v2875_v33 = vmul.f32 -1.442695, %v190_v21  ;;  %v3544_v36 = vmul.f32 -1.442695, %v189_v22 }
  0x3b   : > { %v722_v27 = vsel %vm3515_vm14, %v2990_v53, %v718_v17  ;;  %v703_v28 = vadd.f32 %v2992_v62, %v702_v18  ;;  %v3002_v30 = vpop.eup %3001  ;;  %v687_v32 = vmul.f32 %v2994_v6, %v686_v24  ;;  %v3557_v34 = vadd.f32 1.0, %v2998_v14  ;;  %v197_v14 = vld [vmem:[%s3333_s15 + $0xb8] sm:$0xff] }
  0x3c   : > { %v727_v31 = vsel %vm3494_vm9, %v726_v56, %v722_v27  ;;  %v3559_v41 = vadd.f32 1.0, %v3000_v26  ;;  %3009 = vpow2.f32 %v2876_v16  ;;  %v768_v46 = vand.u32 2147483647, %v3524_v20 }
  0x3d   : > { %2064 = vperm.xlu2 %2958, %v727_v31   ;;  %v707_v39 = vsel %vm3531_vm0, %v2992_v62, %v703_v28  ;;  %v688_v45 = vadd.f32 %v2994_v6, %v687_v32  ;;  %v3565_v47 = vadd.f32 1.0, %v3002_v30  ;;  %v770_v29 = vand.u32 2147483648, %v3524_v20  ;;  %v199_v28 = vld [vmem:[%s3333_s15 + $0xc8] sm:$0xff] }
  0x3e   : > { %v712_v44 = vsel %vm3519_vm15, %v711_v13, %v707_v39  ;;  %v3004_v48 = vpop.eup %3003  ;;  %3011 = vrcp.f32 %v3557_v34  ;;  %v3569_v49 = vmul.f32 -1.442695, %v194_v37  ;;  %v3571_v50 = vmul.f32 -1.442695, %v193_v38 }
  0x3f   : > { %2059 = vperm.xlu1 %2957, %v712_v44   ;;  %v3006_v51 = vpop.eup %3005  ;;  %v692_v52 = vsel %vm3553_vm2, %v2994_v6, %v688_v45  ;;  %v753_v42 = vand.u32 2147483647, %v3557_v34  ;;  %3013 = vrcp.f32 %v3559_v41  ;;  %v3577_v53 = vmul.f32 -1.442695, %v192_v43 }
  0x40   : > { %v3008_v54 = vpop.eup %3007  ;;  %v697_v55 = vsel %vm3535_vm1, %v696_v19, %v692_v52  ;;  %v755_v56 = vand.u32 2147483648, %v3557_v34  ;;  %v738_v57 = vand.u32 2147483647, %v3559_v41  ;;  %v740_v58 = vand.u32 2147483648, %v3559_v41 }
  0x41   : > { %2054 = vperm.xlu0 %2956, %v697_v55   ;;  %v760_v59 = vmul.f32 %v3008_v54, %v3524_v20  ;;  %vm764_vm4 = vweird.f32 %v3524_v20  ;;  %vm3586_vm3 = vcmp.eq.f32.partialorder %v768_v46, 8.507059e+37  ;;  %3015 = vrcp.f32 %v3565_v47 }
  0x42   : > { %v3010_v61 = vpop.eup %3009  ;;  %v771_v62 = vor.u32 1.1754944e-38, %v770_v29  ;;  %vm749_vm5 = vweird.f32 %v3557_v34  ;;  %vm734_vm7 = vweird.f32 %v3559_v41  ;;  %v813_v63 = vand.u32 2147483647, %v3565_v47 }
  0x43   : > { %v761_v35 = vsub.f32 1.0, %v760_v59  ;;  %vm765_vm8 = vweird.f32 %v3008_v54  ;;  %vm3594_vm9 = vcmp.eq.f32.partialorder %v753_v42, 8.507059e+37  ;;  %v3598_v1 = vadd.f32 1.0, %v3004_v48 }
  0x44   : > { %v3600_v2 = vadd.f32 1.0, %v3006_v51  ;;  %v3012_v3 = vpop.eup %3011  ;;  %v756_v4 = vor.u32 1.1754944e-38, %v755_v56  ;;  %vm3602_vm10 = vcmp.eq.f32.partialorder %v738_v57, 8.507059e+37  ;;  %v741_v6 = vor.u32 1.1754944e-38, %v740_v58  ;;  %vm3612_vm12 = vmor %vm764_vm4, %vm765_vm8 }
  0x45   : > { %vm809_vm11 = vweird.f32 %v3565_v47  ;;  %v3014_v7 = vpop.eup %3013  ;;  %v762_v8 = vmul.f32 %v3008_v54, %v761_v35  ;;  %v745_v9 = vmul.f32 %v3012_v3, %v3557_v34  ;;  %v815_v10 = vand.u32 2147483648, %v3565_v47 }
  0x46   : > { %3017 = vrcp.f32 %v3598_v1  ;;  %v730_v12 = vmul.f32 %v3014_v7, %v3559_v41  ;;  %vm3617_vm13 = vcmp.eq.f32.partialorder %v813_v63, 8.507059e+37  ;;  %v3621_v15 = vadd.f32 1.0, %v3010_v61 }
  0x47   : > { %3019 = vpow2.f32 %v2875_v33  ;;  %v3016_v16 = vpop.eup %3015  ;;  %v763_v17 = vadd.f32 %v3008_v54, %v762_v8  ;;  %v746_v18 = vsub.f32 1.0, %v745_v9  ;;  %vm750_vm14 = vweird.f32 %v3012_v3  ;;  %v195_v9 = vld [vmem:[%s3333_s15 + $0xa8] sm:$0xff]  ;;  %v198_v33 = vld [vmem:[%s3333_s15 + $0xc0] sm:$0xff] }
  0x48   : > { %3021 = vrcp.f32 %v3600_v2  ;;  %v731_v20 = vsub.f32 1.0, %v730_v12  ;;  %vm735_vm15 = vweird.f32 %v3014_v7  ;;  %v805_v21 = vmul.f32 %v3016_v16, %v3565_v47  ;;  %vm3634_vm0 = vmor %vm749_vm5, %vm750_vm14 }
  0x49   : > { %v798_v22 = vand.u32 2147483647, %v3598_v1  ;;  %v767_v23 = vsel %vm3612_vm12, %v3008_v54, %v763_v17  ;;  %v747_v24 = vmul.f32 %v3012_v3, %v746_v18  ;;  %v816_v25 = vor.u32 1.1754944e-38, %v815_v10  ;;  %vm3641_vm1 = vmor %vm734_vm7, %vm735_vm15 }
  0x4a   : > { %v800_v26 = vand.u32 2147483648, %v3598_v1  ;;  %v772_v27 = vsel %vm3586_vm3, %v771_v62, %v767_v23  ;;  %v732_v19 = vmul.f32 %v3014_v7, %v731_v20  ;;  %v806_v30 = vsub.f32 1.0, %v805_v21 }
  0x4b   : > { %vm810_vm6 = vweird.f32 %v3016_v16  ;;  %2079 = vperm.xlu2 %2958, %v772_v27   ;;  %v748_v32 = vadd.f32 %v3012_v3, %v747_v24  ;;  %vm794_vm2 = vweird.f32 %v3598_v1  ;;  %3023 = vrcp.f32 %v3621_v15 }
  0x4c   : > { %v3018_v31 = vpop.eup %3017  ;;  %v3647_v37 = vmul.f32 -1.442695, %v197_v14  ;;  %v733_v39 = vadd.f32 %v3014_v7, %v732_v19  ;;  %v807_v40 = vmul.f32 %v3016_v16, %v806_v30  ;;  %vm3650_vm4 = vcmp.eq.f32.partialorder %v798_v22, 8.507059e+37  ;;  %vm3659_vm3 = vmor %vm809_vm11, %vm810_vm6 }
  0x4d   : > { %v3020_v38 = vpop.eup %3019  ;;  %v790_v34 = vmul.f32 %v3018_v31, %v3598_v1  ;;  %v752_v44 = vsel %vm3634_vm0, %v3012_v3, %v748_v32  ;;  %vm795_vm5 = vweird.f32 %v3018_v31  ;;  %v801_v46 = vor.u32 1.1754944e-38, %v800_v26 }
  0x4e   : > { %v3022_v41 = vpop.eup %3021  ;;  %v783_v48 = vand.u32 2147483647, %v3600_v2  ;;  %v757_v29 = vsel %vm3594_vm9, %v756_v4, %v752_v44  ;;  %v737_v51 = vsel %vm3641_vm1, %v3014_v7, %v733_v39  ;;  %v808_v52 = vadd.f32 %v3016_v16, %v807_v40  ;;  %vm3683_vm9 = vmor %vm794_vm2, %vm795_vm5  ;;  %v196_v4 = vld [vmem:[%s3333_s15 + $0xb0] sm:$0xff] }
  0x4f   : > { %v791_v42 = vsub.f32 1.0, %v790_v34  ;;  %2074 = vperm.xlu1 %2957, %v757_v29   ;;  %v742_v47 = vsel %vm3602_vm10, %v741_v6, %v737_v51  ;;  %v775_v54 = vmul.f32 %v3022_v41, %v3600_v2  ;;  %vm779_vm7 = vweird.f32 %v3600_v2 }
  0x50   : > { %v785_v55 = vand.u32 2147483648, %v3600_v2  ;;  %2069 = vperm.xlu0 %2956, %v742_v47   ;;  %v812_v56 = vsel %vm3659_vm3, %v3016_v16, %v808_v52  ;;  %vm854_vm8 = vweird.f32 %v3621_v15  ;;  %v3676_v58 = vadd.f32 1.0, %v3020_v38  ;;  %v200_v2 = vld [vmem:[%s3333_s15 + $0xd0] sm:$0xff]  ;;  %v206_v16 = vld [vmem:[%s3333_s15 + $0x100] sm:$0xff] }
  0x51   : > { %v792_v57 = vmul.f32 %v3018_v31, %v791_v42  ;;  %v3024_v59 = vpop.eup %3023  ;;  %v817_v60 = vsel %vm3617_vm13, %v816_v25, %v812_v56  ;;  %v776_v62 = vsub.f32 1.0, %v775_v54  ;;  %vm780_vm10 = vweird.f32 %v3022_v41 }
  0x52   : > { %3025 = vpow2.f32 %v3544_v36  ;;  %vm3688_vm11 = vcmp.eq.f32.partialorder %v783_v48, 8.507059e+37  ;;  %v850_v0 = vmul.f32 %v3024_v59, %v3621_v15  ;;  %v858_v3 = vand.u32 2147483647, %v3621_v15  ;;  %vm3701_vm12 = vmor %vm779_vm7, %vm780_vm10 }
  0x53   : > { %v793_v63 = vadd.f32 %v3018_v31, %v792_v57  ;;  %2094 = vperm.xlu2 %2958, %v817_v60   ;;  %v777_v1 = vmul.f32 %v3022_v41, %v776_v62  ;;  %v786_v5 = vor.u32 1.1754944e-38, %v785_v55  ;;  %v860_v6 = vand.u32 2147483648, %v3621_v15 }
  0x54   : > { %3027 = vrcp.f32 %v3676_v58  ;;  %v851_v8 = vsub.f32 1.0, %v850_v0  ;;  %vm855_vm13 = vweird.f32 %v3024_v59  ;;  %v2881_v12 = vmul.f32 -1.442695, %v196_v4 }
  0x55   : > { %v797_v36 = vsel %vm3683_vm9, %v3018_v31, %v793_v63  ;;  %3029 = vpow2.f32 %v3569_v49  ;;  %v778_v11 = vadd.f32 %v3022_v41, %v777_v1  ;;  %vm3710_vm14 = vcmp.eq.f32.partialorder %v858_v3, 8.507059e+37  ;;  %vm3720_vm15 = vmor %vm854_vm8, %vm855_vm13 }
  0x56   : > { %v802_v10 = vsel %vm3650_vm4, %v801_v46, %v797_v36  ;;  %3031 = vpow2.f32 %v3571_v50  ;;  %v852_v13 = vmul.f32 %v3024_v59, %v851_v8  ;;  %v861_v50 = vor.u32 1.1754944e-38, %v860_v6 }
  0x57   : > { %3033 = vpow2.f32 %v3577_v53  ;;  %2089 = vperm.xlu1 %2957, %v802_v10   ;;  %v782_v49 = vsel %vm3701_vm12, %v3022_v41, %v778_v11  ;;  %v843_v20 = vand.u32 2147483647, %v3676_v58  ;;  %v2880_v21 = vmul.f32 -1.442695, %v195_v9 }
  0x58   : > { %v3026_v17 = vpop.eup %3025  ;;  %v787_v53 = vsel %vm3688_vm11, %v786_v5, %v782_v49  ;;  %v853_v22 = vadd.f32 %v3024_v59, %v852_v13  ;;  %3035 = vpow2.f32 %v3647_v37  ;;  %vm839_vm0 = vweird.f32 %v3676_v58 }
  0x59   : > { %v3727_v14 = vadd.f32 1.0, %v3026_v17  ;;  %2084 = vperm.xlu0 %2956, %v787_v53   ;;  %3037 = vpow2.f32 %v2881_v12  ;;  %v2885_v15 = vmul.f32 -1.442695, %v200_v2  ;;  %v845_v27 = vand.u32 2147483648, %v3676_v58 }
  0x5a   : > { %v3028_v23 = vpop.eup %3027  ;;  %v857_v25 = vsel %vm3720_vm15, %v3024_v59, %v853_v22  ;;  %vm3739_vm6 = vcmp.eq.f32.partialorder %v843_v20, 8.507059e+37  ;;  %v2884_v41 = vmul.f32 -1.442695, %v199_v28  ;;  %v3753_v48 = vmul.f32 -1.442695, %v198_v33 }
  0x5b   : > { %v3030_v24 = vpop.eup %3029  ;;  %v835_v26 = vmul.f32 %v3028_v23, %v3676_v58  ;;  %3039 = vrcp.f32 %v3727_v14  ;;  %v862_v30 = vsel %vm3710_vm14, %v861_v50, %v857_v25  ;;  %v828_v32 = vand.u32 2147483647, %v3727_v14 }
  0x5c   : > { %v3032_v19 = vpop.eup %3031  ;;  %3041 = vpow2.f32 %v2880_v21  ;;  %2109 = vperm.xlu2 %2958, %v862_v30   ;;  %vm840_vm1 = vweird.f32 %v3028_v23  ;;  %v3745_v39 = vadd.f32 1.0, %v3030_v24  ;;  %v830_v34 = vand.u32 2147483648, %v3727_v14 }
  0x5d   : > { %v3034_v37 = vpop.eup %3033  ;;  %v836_v38 = vsub.f32 1.0, %v835_v26  ;;  %v3747_v40 = vadd.f32 1.0, %v3032_v19  ;;  %3043 = vpow2.f32 %v2885_v15  ;;  %v846_v46 = vor.u32 1.1754944e-38, %v845_v27  ;;  %vm3757_vm2 = vmor %vm839_vm0, %vm840_vm1 }
  0x5e   : > { %v3750_v43 = vadd.f32 1.0, %v3034_v37  ;;  %v3036_v44 = vpop.eup %3035  ;;  %3045 = vrcp.f32 %v3745_v39  ;;  %vm824_vm4 = vweird.f32 %v3727_v14  ;;  %vm3762_vm3 = vcmp.eq.f32.partialorder %v828_v32, 8.507059e+37 }
  0x5f   : > { %v837_v45 = vmul.f32 %v3028_v23, %v836_v38  ;;  %v3038_v29 = vpop.eup %3037  ;;  %v903_v42 = vand.u32 2147483647, %v3745_v39  ;;  %3047 = vrcp.f32 %v3747_v40  ;;  %v905_v55 = vand.u32 2147483648, %v3745_v39 }
  0x60   : > { %v888_v56 = vand.u32 2147483647, %v3747_v40  ;;  %3049 = vrcp.f32 %v3750_v43  ;;  %v831_v59 = vor.u32 1.1754944e-38, %v830_v34  ;;  %v890_v60 = vand.u32 2147483648, %v3747_v40 }
  0x61   : > { %v3040_v47 = vpop.eup %3039  ;;  %v838_v54 = vadd.f32 %v3028_v23, %v837_v45  ;;  %3051 = vpow2.f32 %v2884_v41  ;;  %vm899_vm5 = vweird.f32 %v3745_v39  ;;  %vm884_vm7 = vweird.f32 %v3747_v40 }
  0x62   : > { %v3042_v57 = vpop.eup %3041  ;;  %v820_v58 = vmul.f32 %v3040_v47, %v3727_v14  ;;  %v873_v62 = vand.u32 2147483647, %v3750_v43  ;;  %vm825_vm8 = vweird.f32 %v3040_v47  ;;  %v3780_v3 = vadd.f32 1.0, %v3036_v44 }
  0x63   : > { %v842_v61 = vsel %vm3757_vm2, %v3028_v23, %v838_v54  ;;  %v3044_v63 = vpop.eup %3043  ;;  %vm3782_vm9 = vcmp.eq.f32.partialorder %v903_v42, 8.507059e+37  ;;  %v906_v5 = vor.u32 1.1754944e-38, %v905_v55  ;;  %vm3786_vm10 = vcmp.eq.f32.partialorder %v888_v56, 8.507059e+37  ;;  %vm3796_vm12 = vmor %vm824_vm4, %vm825_vm8 }
  0x64   : > { %v847_v35 = vsel %vm3739_vm6, %v846_v46, %v842_v61  ;;  %v821_v0 = vsub.f32 1.0, %v820_v58  ;;  %v3046_v4 = vpop.eup %3045  ;;  %v3790_v36 = vadd.f32 1.0, %v3038_v29  ;;  %v891_v10 = vor.u32 1.1754944e-38, %v890_v60 }
  0x65   : > { %2104 = vperm.xlu1 %2957, %v847_v35   ;;  %v3048_v7 = vpop.eup %3047  ;;  %v895_v9 = vmul.f32 %v3046_v4, %v3745_v39  ;;  %vm869_vm11 = vweird.f32 %v3750_v43  ;;  %vm3801_vm13 = vcmp.eq.f32.partialorder %v873_v62, 8.507059e+37  ;;  %v875_v2 = vand.u32 2147483648, %v3750_v43 }
  0x66   : > { %v822_v8 = vmul.f32 %v3040_v47, %v821_v0  ;;  %v3050_v11 = vpop.eup %3049  ;;  %v880_v13 = vmul.f32 %v3048_v7, %v3747_v40  ;;  %3053 = vrcp.f32 %v3780_v3  ;;  %vm900_vm14 = vweird.f32 %v3046_v4 }
  0x67   : > { %v3052_v17 = vpop.eup %3051  ;;  %v896_v18 = vsub.f32 1.0, %v895_v9  ;;  %v865_v50 = vmul.f32 %v3050_v11, %v3750_v43  ;;  %vm885_vm15 = vweird.f32 %v3048_v7  ;;  %3055 = vrcp.f32 %v3790_v36  ;;  %vm3817_vm6 = vmor %vm899_vm5, %vm900_vm14 }
  0x68   : > { %v823_v49 = vadd.f32 %v3040_v47, %v822_v8  ;;  %v881_v20 = vsub.f32 1.0, %v880_v13  ;;  %v3809_v21 = vadd.f32 1.0, %v3042_v57  ;;  %vm870_vm0 = vweird.f32 %v3050_v11  ;;  %vm3825_vm1 = vmor %vm884_vm7, %vm885_vm15  ;;  %v201_v13 = vld [vmem:[%s3333_s15 + $0xd8] sm:$0xff] }
  0x69   : > { %v897_v22 = vmul.f32 %v3046_v4, %v896_v18  ;;  %v866_v14 = vsub.f32 1.0, %v865_v50  ;;  %v876_v25 = vor.u32 1.1754944e-38, %v875_v2  ;;  %v3821_v26 = vadd.f32 1.0, %v3044_v63  ;;  %vm3833_vm4 = vmor %vm869_vm11, %vm870_vm0 }
  0x6a   : > { %v827_v53 = vsel %vm3796_vm12, %v3040_v47, %v823_v49  ;;  %v882_v24 = vmul.f32 %v3048_v7, %v881_v20  ;;  %vm944_vm2 = vweird.f32 %v3780_v3  ;;  %v948_v30 = vand.u32 2147483647, %v3780_v3  ;;  %v205_v20 = vld [vmem:[%s3333_s15 + $0xf8] sm:$0xff] }
  0x6b   : > { %v832_v23 = vsel %vm3762_vm3, %v831_v59, %v827_v53  ;;  %v898_v27 = vadd.f32 %v3046_v4, %v897_v22  ;;  %v867_v19 = vmul.f32 %v3050_v11, %v866_v14  ;;  %v950_v37 = vand.u32 2147483648, %v3780_v3 }
  0x6c   : > { %2099 = vperm.xlu0 %2956, %v832_v23   ;;  %v3054_v31 = vpop.eup %3053  ;;  %v883_v32 = vadd.f32 %v3048_v7, %v882_v24  ;;  %vm929_vm3 = vweird.f32 %v3790_v36  ;;  %3057 = vrcp.f32 %v3809_v21  ;;  %v933_v34 = vand.u32 2147483647, %v3790_v36 }
  0x6d   : > { %v902_v38 = vsel %vm3817_vm6, %v3046_v4, %v898_v27  ;;  %v868_v39 = vadd.f32 %v3050_v11, %v867_v19  ;;  %v940_v40 = vmul.f32 %v3054_v31, %v3780_v3  ;;  %v3056_v41 = vpop.eup %3055  ;;  %vm945_vm5 = vweird.f32 %v3054_v31  ;;  %v203_v4 = vld [vmem:[%s3333_s15 + $0xe8] sm:$0xff] }
  0x6e   : > { %v907_v43 = vsel %vm3782_vm9, %v906_v5, %v902_v38  ;;  %v887_v44 = vsel %vm3825_vm1, %v3048_v7, %v883_v32  ;;  %v935_v45 = vand.u32 2147483648, %v3790_v36  ;;  %v925_v52 = vmul.f32 %v3056_v41, %v3790_v36  ;;  %vm3865_vm9 = vmor %vm944_vm2, %vm945_vm5  ;;  %v202_v7 = vld [vmem:[%s3333_s15 + $0xe0] sm:$0xff] }
  0x6f   : > { %2124 = vperm.xlu2 %2958, %v907_v43   ;;  %v892_v46 = vsel %vm3786_vm10, %v891_v10, %v887_v44  ;;  %v872_v29 = vsel %vm3833_vm4, %v3050_v11, %v868_v39  ;;  %v941_v51 = vsub.f32 1.0, %v940_v40  ;;  %vm3856_vm7 = vcmp.eq.f32.partialorder %v948_v30, 8.507059e+37  ;;  %v209_v43 = vld [vmem:[%s3333_s15 + $0x118] sm:$0xff] }
  0x70   : > { %2119 = vperm.xlu1 %2957, %v892_v46   ;;  %v877_v42 = vsel %vm3801_vm13, %v876_v25, %v872_v29  ;;  %v951_v54 = vor.u32 1.1754944e-38, %v950_v37  ;;  %v918_v55 = vand.u32 2147483647, %v3809_v21  ;;  %v926_v57 = vsub.f32 1.0, %v925_v52  ;;  %v208_v52 = vld [vmem:[%s3333_s15 + $0x110] sm:$0xff] }
  0x71   : > { %v942_v56 = vmul.f32 %v3054_v31, %v941_v51  ;;  %vm930_vm8 = vweird.f32 %v3056_v41  ;;  %3059 = vrcp.f32 %v3821_v26  ;;  %vm3869_vm10 = vcmp.eq.f32.partialorder %v933_v34, 8.507059e+37 }
  0x72   : > { %v3058_v58 = vpop.eup %3057  ;;  %vm914_vm11 = vweird.f32 %v3809_v21  ;;  %v920_v61 = vand.u32 2147483648, %v3809_v21  ;;  %v3875_v62 = vadd.f32 1.0, %v3052_v17  ;;  %v927_v35 = vmul.f32 %v3056_v41, %v926_v57  ;;  %vm3881_vm12 = vmor %vm929_vm3, %vm930_vm8 }
  0x73   : > { %v943_v63 = vadd.f32 %v3054_v31, %v942_v56  ;;  %v936_v0 = vor.u32 1.1754944e-38, %v935_v45  ;;  %v910_v3 = vmul.f32 %v3058_v58, %v3809_v21  ;;  %vm3885_vm13 = vcmp.eq.f32.partialorder %v918_v55, 8.507059e+37  ;;  %v204_v21 = vld [vmem:[%s3333_s15 + $0xf0] sm:$0xff] }
  0x74   : > { %2114 = vperm.xlu0 %2956, %v877_v42   ;;  %vm989_vm14 = vweird.f32 %v3821_v26  ;;  %v995_v6 = vand.u32 2147483648, %v3821_v26  ;;  %3061 = vrcp.f32 %v3875_v62  ;;  %v928_v36 = vadd.f32 %v3056_v41, %v927_v35  ;;  %v207_v42 = vld [vmem:[%s3333_s15 + $0x108] sm:$0xff] }
  0x75   : > { %v947_v8 = vsel %vm3865_vm9, %v3054_v31, %v943_v63  ;;  %v911_v9 = vsub.f32 1.0, %v910_v3  ;;  %vm915_vm15 = vweird.f32 %v3058_v58  ;;  %v921_v11 = vor.u32 1.1754944e-38, %v920_v61 }
  0x76   : > { %v952_v10 = vsel %vm3856_vm7, %v951_v54, %v947_v8  ;;  %3063 = vpow2.f32 %v3753_v48  ;;  %v2888_v12 = vmul.f32 -1.442695, %v203_v4  ;;  %v932_v17 = vsel %vm3881_vm12, %v3056_v41, %v928_v36  ;;  %vm3909_vm0 = vmor %vm914_vm11, %vm915_vm15 }
  0x77   : > { %v3060_v2 = vpop.eup %3059  ;;  %2139 = vperm.xlu2 %2958, %v952_v10   ;;  %v912_v49 = vmul.f32 %v3058_v58, %v911_v9  ;;  %v993_v18 = vand.u32 2147483647, %v3821_v26  ;;  %v2887_v50 = vmul.f32 -1.442695, %v202_v7  ;;  %v937_v53 = vsel %vm3869_vm10, %v936_v0, %v932_v17 }
  0x78   : > { %v985_v22 = vmul.f32 %v3060_v2, %v3821_v26  ;;  %v996_v14 = vor.u32 1.1754944e-38, %v995_v6  ;;  %v978_v23 = vand.u32 2147483647, %v3875_v62  ;;  %2134 = vperm.xlu1 %2957, %v937_v53   ;;  %3065 = vpow2.f32 %v2888_v12 }
  0x79   : > { %v913_v15 = vadd.f32 %v3058_v58, %v912_v49  ;;  %v2886_v24 = vmul.f32 -1.442695, %v201_v13  ;;  %v2891_v25 = vmul.f32 -1.442695, %v206_v16  ;;  %vm990_vm6 = vweird.f32 %v3060_v2 }
  0x7a   : > { %v3062_v27 = vpop.eup %3061  ;;  %v986_v28 = vsub.f32 1.0, %v985_v22  ;;  %3067 = vpow2.f32 %v2887_v50  ;;  %v2890_v19 = vmul.f32 -1.442695, %v205_v20  ;;  %v980_v32 = vand.u32 2147483648, %v3875_v62  ;;  %vm3925_vm2 = vmor %vm989_vm14, %vm990_vm6 }
  0x7b   : > { %v917_v30 = vsel %vm3909_vm0, %v3058_v58, %v913_v15  ;;  %v970_v31 = vmul.f32 %v3062_v27, %v3875_v62  ;;  %3069 = vpow2.f32 %v2886_v24  ;;  %vm974_vm1 = vweird.f32 %v3875_v62 }
  0x7c   : > { %v3064_v33 = vpop.eup %3063  ;;  %v922_v37 = vsel %vm3885_vm13, %v921_v11, %v917_v30  ;;  %v987_v38 = vmul.f32 %v3060_v2, %v986_v28  ;;  %3071 = vpow2.f32 %v2891_v25  ;;  %vm975_vm4 = vweird.f32 %v3062_v27 }
  0x7d   : > { %2129 = vperm.xlu0 %2956, %v922_v37   ;;  %v971_v40 = vsub.f32 1.0, %v970_v31  ;;  %v3929_v34 = vadd.f32 1.0, %v3064_v33  ;;  %v2889_v41 = vmul.f32 -1.442695, %v204_v21  ;;  %vm3932_vm3 = vcmp.eq.f32.partialorder %v993_v18, 8.507059e+37  ;;  %vm3948_vm7 = vmor %vm974_vm1, %vm975_vm4 }
  0x7e   : > { %v988_v44 = vadd.f32 %v3060_v2, %v987_v38  ;;  %3073 = vpow2.f32 %v2890_v19  ;;  %v3066_v46 = vpop.eup %3065  ;;  %vm3936_vm5 = vcmp.eq.f32.partialorder %v978_v23, 8.507059e+37  ;;  %v981_v51 = vor.u32 1.1754944e-38, %v980_v32  ;;  %v212_v23 = vld [vmem:[%s3333_s15 + $0x130] sm:$0xff] }
  0x7f   : > { %v972_v29 = vmul.f32 %v3062_v27, %v971_v40  ;;  %3075 = vrcp.f32 %v3929_v34  ;;  %v963_v56 = vand.u32 2147483647, %v3929_v34  ;;  %v3953_v57 = vadd.f32 1.0, %v3066_v46 }
  0x80   : > { %v3068_v47 = vpop.eup %3067  ;;  %v992_v54 = vsel %vm3925_vm2, %v3060_v2, %v988_v44  ;;  %v2894_v58 = vmul.f32 -1.442695, %v209_v43  ;;  %3077 = vpow2.f32 %v2889_v41  ;;  %v965_v62 = vand.u32 2147483648, %v3929_v34 }
  0x81   : > { %v3070_v59 = vpop.eup %3069  ;;  %v997_v60 = vsel %vm3932_vm3, %v996_v14, %v992_v54  ;;  %v973_v61 = vadd.f32 %v3062_v27, %v972_v29  ;;  %v3957_v63 = vadd.f32 1.0, %v3068_v47  ;;  %3079 = vrcp.f32 %v3953_v57 }
  0x82   : > { %v3072_v35 = vpop.eup %3071  ;;  %2154 = vperm.xlu2 %2958, %v997_v60   ;;  %v3961_v0 = vmul.f32 -1.442695, %v208_v52  ;;  %v3963_v3 = vmul.f32 -1.442695, %v207_v42  ;;  %v1038_v1 = vand.u32 2147483647, %v3953_v57  ;;  %vm959_vm8 = vweird.f32 %v3929_v34 }
  0x83   : > { %v977_v4 = vsel %vm3948_vm7, %v3062_v27, %v973_v61  ;;  %v1040_v5 = vand.u32 2147483648, %v3953_v57  ;;  %3081 = vrcp.f32 %v3957_v63  ;;  %vm3973_vm9 = vcmp.eq.f32.partialorder %v963_v56, 8.507059e+37  ;;  %v214_v42 = vld [vmem:[%s3333_s15 + $0x140] sm:$0xff] }
  0x84   : > { %v3074_v6 = vpop.eup %3073  ;;  %v982_v7 = vsel %vm3936_vm5, %v981_v51, %v977_v4  ;;  %3083 = vpow2.f32 %v2894_v58  ;;  %v1023_v9 = vand.u32 2147483647, %v3957_v63  ;;  %v1025_v10 = vand.u32 2147483648, %v3957_v63 }
  0x85   : > { %v3076_v36 = vpop.eup %3075  ;;  %2149 = vperm.xlu1 %2957, %v982_v7   ;;  %v3979_v11 = vadd.f32 1.0, %v3070_v59  ;;  %v3981_v12 = vadd.f32 1.0, %v3072_v35  ;;  %v966_v16 = vor.u32 1.1754944e-38, %v965_v62  ;;  %vm1034_vm10 = vweird.f32 %v3953_v57 }
  0x86   : > { %v955_v13 = vmul.f32 %v3076_v36, %v3929_v34  ;;  %vm1019_vm11 = vweird.f32 %v3957_v63  ;;  %v3078_v2 = vpop.eup %3077  ;;  %vm960_vm12 = vweird.f32 %v3076_v36  ;;  %vm3986_vm13 = vcmp.eq.f32.partialorder %v1038_v1, 8.507059e+37 }
  0x87   : > { %v1041_v49 = vor.u32 1.1754944e-38, %v1040_v5  ;;  %3085 = vrcp.f32 %v3979_v11  ;;  %v3991_v18 = vadd.f32 1.0, %v3074_v6  ;;  %v3080_v50 = vpop.eup %3079  ;;  %v1008_v53 = vand.u32 2147483647, %v3979_v11  ;;  %vm4008_vm6 = vmor %vm959_vm8, %vm960_vm12 }
  0x88   : > { %v956_v20 = vsub.f32 1.0, %v955_v13  ;;  %v1010_v48 = vand.u32 2147483648, %v3979_v11  ;;  %3087 = vrcp.f32 %v3981_v12  ;;  %v1030_v14 = vmul.f32 %v3080_v50, %v3953_v57 }
  0x89   : > { %v3082_v22 = vpop.eup %3081  ;;  %vm3997_vm14 = vcmp.eq.f32.partialorder %v1023_v9, 8.507059e+37  ;;  %v1026_v15 = vor.u32 1.1754944e-38, %v1025_v10  ;;  %v1083_v24 = vand.u32 2147483647, %v3981_v12  ;;  %vm1004_vm15 = vweird.f32 %v3979_v11  ;;  %v2045_v10 = vpop.permute.xlu2 %2044 }
  0x8a   : > { %v3084_v25 = vpop.eup %3083  ;;  %v957_v27 = vmul.f32 %v3076_v36, %v956_v20  ;;  %v1015_v28 = vmul.f32 %v3082_v22, %v3957_v63  ;;  %vm1079_vm0 = vweird.f32 %v3981_v12  ;;  %v1031_v21 = vsub.f32 1.0, %v1030_v14  ;;  %v1863_v14 = vld [vmem:[%s4063_s19 + $0x48] sm:$0xff] }
  0x8b   : > { %vm1035_vm1 = vweird.f32 %v3080_v50  ;;  %v1085_v30 = vand.u32 2147483648, %v3981_v12  ;;  %3089 = vrcp.f32 %v3991_v18  ;;  %vm1020_vm2 = vweird.f32 %v3082_v22 }
  0x8c   : > { %v958_v31 = vadd.f32 %v3076_v36, %v957_v27  ;;  %v1016_v32 = vsub.f32 1.0, %v1015_v28  ;;  %vm4014_vm4 = vcmp.eq.f32.partialorder %v1008_v53, 8.507059e+37  ;;  %v1011_v37 = vor.u32 1.1754944e-38, %v1010_v48  ;;  %vm4031_vm7 = vmor %vm1034_vm10, %vm1035_vm1  ;;  %v211_v27 = vld [vmem:[%s3333_s15 + $0x128] sm:$0xff]  ;;  %v210_v28 = vld [vmem:[%s3333_s15 + $0x120] sm:$0xff] }
  0x8d   : > { %v3086_v38 = vpop.eup %3085  ;;  %v1032_v39 = vmul.f32 %v3080_v50, %v1031_v21  ;;  %vm4018_vm3 = vcmp.eq.f32.partialorder %v1083_v24, 8.507059e+37  ;;  %vm1064_vm5 = vweird.f32 %v3991_v18  ;;  %v1068_v34 = vand.u32 2147483647, %v3991_v18  ;;  %vm4042_vm8 = vmor %vm1019_vm11, %vm1020_vm2 }
  0x8e   : > { %v4024_v41 = vadd.f32 1.0, %v3078_v2  ;;  %v3088_v43 = vpop.eup %3087  ;;  %v962_v44 = vsel %vm4008_vm6, %v3076_v36, %v958_v31  ;;  %v1017_v46 = vmul.f32 %v3082_v22, %v1016_v32  ;;  %v1000_v29 = vmul.f32 %v3086_v38, %v3979_v11 }
  0x8f   : > { %v1070_v26 = vand.u32 2147483648, %v3991_v18  ;;  %v967_v51 = vsel %vm3973_vm9, %v966_v16, %v962_v44  ;;  %v1033_v52 = vadd.f32 %v3080_v50, %v1032_v39  ;;  %v1075_v47 = vmul.f32 %v3088_v43, %v3981_v12  ;;  %v215_v39 = vld [vmem:[%s3333_s15 + $0x148] sm:$0xff]  ;;  %v1865_v44 = vld [vmem:[%s4063_s19 + $0x58] sm:$0xff] }
  0x90   : > { %v1086_v54 = vor.u32 1.1754944e-38, %v1085_v30  ;;  %2144 = vperm.xlu0 %2956, %v967_v51   ;;  %v1018_v55 = vadd.f32 %v3082_v22, %v1017_v46  ;;  %v1001_v56 = vsub.f32 1.0, %v1000_v29  ;;  %vm1005_vm10 = vweird.f32 %v3086_v38 }
  0x91   : > { %v4048_v57 = vadd.f32 1.0, %v3084_v25  ;;  %v3090_v58 = vpop.eup %3089  ;;  %v1037_v59 = vsel %vm4031_vm7, %v3080_v50, %v1033_v52  ;;  %v1076_v60 = vsub.f32 1.0, %v1075_v47  ;;  %vm1080_vm9 = vweird.f32 %v3088_v43  ;;  %vm4069_vm11 = vmor %vm1004_vm15, %vm1005_vm10  ;;  %v2050_v45 = vpop.permute.xlu2 %2049 }
  0x92   : > { %3091 = vrcp.f32 %v4024_v41  ;;  %v1042_v61 = vsel %vm3986_vm13, %v1041_v49, %v1037_v59  ;;  %v1022_v63 = vsel %vm4042_vm8, %v3082_v22, %v1018_v55  ;;  %v1002_v35 = vmul.f32 %v3086_v38, %v1001_v56  ;;  %vm4077_vm13 = vmor %vm1079_vm0, %vm1080_vm9  ;;  %v1862_v49 = vld [vmem:[%s4063_s19 + $0x40] sm:$0xff] }
  0x93   : > { %v1060_v62 = vmul.f32 %v3090_v58, %v3991_v18  ;;  %2169 = vperm.xlu2 %2958, %v1042_v61   ;;  %v1027_v4 = vsel %vm3997_vm14, %v1026_v15, %v1022_v63  ;;  %v1077_v5 = vmul.f32 %v3088_v43, %v1076_v60  ;;  %vm1065_vm12 = vweird.f32 %v3090_v58 }
  0x94   : > { %v1053_v6 = vand.u32 2147483647, %v4024_v41  ;;  %2164 = vperm.xlu1 %2957, %v1027_v4   ;;  %v1003_v7 = vadd.f32 %v3086_v38, %v1002_v35  ;;  %v1055_v9 = vand.u32 2147483648, %v4024_v41  ;;  %3093 = vrcp.f32 %v4048_v57  ;;  %vm4105_vm1 = vmor %vm1064_vm5, %vm1065_vm12 }
  0x95   : > { %v1061_v36 = vsub.f32 1.0, %v1060_v62  ;;  %v1078_v11 = vadd.f32 %v3088_v43, %v1077_v5  ;;  %vm4083_vm14 = vcmp.eq.f32.partialorder %v1068_v34, 8.507059e+37  ;;  %v1071_v16 = vor.u32 1.1754944e-38, %v1070_v26 }
  0x96   : > { %vm1049_vm15 = vweird.f32 %v4024_v41  ;;  %v1007_v12 = vsel %vm4069_vm11, %v3086_v38, %v1003_v7  ;;  %vm4090_vm0 = vcmp.eq.f32.partialorder %v1053_v6, 8.507059e+37  ;;  %vm1124_vm6 = vweird.f32 %v4048_v57  ;;  %v218_v6 = vld [vmem:[%s3333_s15 + $0x160] sm:$0xff] }
  0x97   : > { %v1062_v2 = vmul.f32 %v3090_v58, %v1061_v36  ;;  %v1012_v20 = vsel %vm4014_vm4, %v1011_v37, %v1007_v12  ;;  %v1082_v53 = vsel %vm4077_vm13, %v3088_v43, %v1078_v11  ;;  %v1128_v22 = vand.u32 2147483647, %v4048_v57  ;;  %v1864_v43 = vld [vmem:[%s4063_s19 + $0x50] sm:$0xff]  ;;  %v1870_v12 = vld [vmem:[%s4063_s19 + $0x80] sm:$0xff] }
  0x98   : > { %v4096_v50 = vpop.eup %3091  ;;  %3095 = vpow2.f32 %v3961_v0  ;;  %2159 = vperm.xlu0 %2956, %v1012_v20   ;;  %v1087_v18 = vsel %vm4018_vm3, %v1086_v54, %v1082_v53  ;;  %v1056_v25 = vor.u32 1.1754944e-38, %v1055_v9  ;;  %vm2611_vm4 = vcmask 556032   ;;  %v217_v9 = vld [vmem:[%s3333_s15 + $0x158] sm:$0xff] }
  0x99   : > { %v1063_v15 = vadd.f32 %v3090_v58, %v1062_v2  ;;  %v1045_v24 = vmul.f32 %v4096_v50, %v4024_v41  ;;  %vm1050_vm2 = vweird.f32 %v4096_v50  ;;  %3097 = vpow2.f32 %v3963_v3 }
  0x9a   : > { %v2450_v0 = vmul.f32 %v2045_v10, %v1862_v49  ;;  %v3094_v19 = vpop.eup %3093  ;;  %v2451_v31 = vmul.f32 %v2045_v10, %v1863_v14  ;;  %v2897_v32 = vmul.f32 -1.442695, %v212_v23  ;;  %v1130_v3 = vand.u32 2147483648, %v4048_v57  ;;  %vm4145_vm5 = vmor %vm1049_vm15, %vm1050_vm2 }
  0x9b   : > { %v1067_v21 = vsel %vm4105_vm1, %v3090_v58, %v1063_v15  ;;  %v1046_v30 = vsub.f32 1.0, %v1045_v24  ;;  %2184 = vperm.xlu2 %2958, %v1087_v18   ;;  %v1120_v37 = vmul.f32 %v3094_v19, %v4048_v57  ;;  %v2896_v38 = vmul.f32 -1.442695, %v211_v27  ;;  %v213_v57 = vld [vmem:[%s3333_s15 + $0x138] sm:$0xff] }
  0x9c   : > { %v1072_v33 = vsel %vm4083_vm14, %v1071_v16, %v1067_v21  ;;  %2619 = vst [vmem:[%s4118_s22 + $0x40] sm:$0xff] %v2450_v0  ;;  %vm1125_vm3 = vweird.f32 %v3094_v19  ;;  %3099 = vpow2.f32 %v2897_v32  ;;  %v2895_v34 = vmul.f32 -1.442695, %v210_v28 }
  0x9d   : > { %2179 = vperm.xlu1 %2957, %v1072_v33   ;;  %v1047_v40 = vmul.f32 %v4096_v50, %v1046_v30  ;;  %2620 = vst.msk [vmem:[%s4118_s22 + $0x48] sm:$0xff] %vm2611_vm4, %v2451_v31  ;;  %v1121_v26 = vsub.f32 1.0, %v1120_v37  ;;  %3101 = vpow2.f32 %v2896_v38  ;;  %v2452_v51 = vmul.f32 %v2050_v45, %v1864_v43  ;;  %vm4164_vm8 = vmor %vm1124_vm6, %vm1125_vm3 }
  0x9e   : > { %v3096_v46 = vpop.eup %3095  ;;  %v2453_v52 = vmul.f32 %v2050_v45, %v1865_v44  ;;  %3103 = vpow2.f32 %v2895_v34  ;;  %v2900_v55 = vmul.f32 -1.442695, %v215_v39  ;;  %vm4153_vm7 = vcmp.eq.f32.partialorder %v1128_v22, 8.507059e+37 }
  0x9f   : > { %v1048_v47 = vadd.f32 %v4096_v50, %v1047_v40  ;;  %v4151_v54 = vadd.f32 1.0, %v3096_v46  ;;  %v3098_v56 = vpop.eup %3097  ;;  %v1122_v58 = vmul.f32 %v3094_v19, %v1121_v26  ;;  %2621 = vst [vmem:[%s4118_s22 + $0x50] sm:$0xff] %v2452_v51  ;;  %v1131_v61 = vor.u32 1.1754944e-38, %v1130_v3  ;;  %v2065_v26 = vpop.permute.xlu2 %2064 }
  0xa0   : > { %2622 = vst.msk [vmem:[%s4118_s22 + $0x58] sm:$0xff] %vm2611_vm4, %v2453_v52  ;;  %v2899_v63 = vmul.f32 -1.442695, %v214_v42  ;;  %v4174_v1 = vadd.f32 1.0, %v3098_v56  ;;  %v2898_v16 = vmul.f32 -1.442695, %v213_v57 }
  0xa1   : > { %v1052_v59 = vsel %vm4145_vm5, %v4096_v50, %v1048_v47  ;;  %3105 = vrcp.f32 %v4151_v54  ;;  %v1123_v62 = vadd.f32 %v3094_v19, %v1122_v58  ;;  %v1113_v4 = vand.u32 2147483647, %v4151_v54  ;;  %v216_v50 = vld [vmem:[%s3333_s15 + $0x150] sm:$0xff] }
  0xa2   : > { %v1057_v35 = vsel %vm4090_vm0, %v1056_v25, %v1052_v59  ;;  %v3100_v5 = vpop.eup %3099  ;;  %3107 = vpow2.f32 %v2900_v55  ;;  %v1115_v36 = vand.u32 2147483648, %v4151_v54  ;;  %vm1109_vm10 = vweird.f32 %v4151_v54  ;;  %v220_v56 = vld [vmem:[%s3333_s15 + $0x170] sm:$0xff] }
  0xa3   : > { %2174 = vperm.xlu0 %2956, %v1057_v35   ;;  %v3102_v7 = vpop.eup %3101  ;;  %v1127_v8 = vsel %vm4164_vm8, %v3094_v19, %v1123_v62  ;;  %3109 = vrcp.f32 %v4174_v1  ;;  %v4186_v13 = vadd.f32 1.0, %v3100_v5  ;;  %vm4188_vm9 = vcmp.eq.f32.partialorder %v1113_v4, 8.507059e+37 }
  0xa4   : > { %v3104_v10 = vpop.eup %3103  ;;  %v1132_v11 = vsel %vm4153_vm7, %v1131_v61, %v1127_v8  ;;  %v4192_v2 = vadd.f32 1.0, %v3102_v7  ;;  %3111 = vpow2.f32 %v2899_v63  ;;  %v4196_v49 = vmul.f32 -1.442695, %v218_v6 }
  0xa5   : > { %2199 = vperm.xlu2 %2958, %v1132_v11   ;;  %v4194_v17 = vadd.f32 1.0, %v3104_v10  ;;  %v1098_v53 = vand.u32 2147483647, %v4174_v1  ;;  %v1100_v48 = vand.u32 2147483648, %v4174_v1  ;;  %3113 = vrcp.f32 %v4186_v13 }
  0xa6   : > { %v4202_v22 = vmul.f32 -1.442695, %v217_v9  ;;  %v1116_v23 = vor.u32 1.1754944e-38, %v1115_v36  ;;  %v1173_v18 = vand.u32 2147483647, %v4186_v13  ;;  %v1175_v15 = vand.u32 2147483648, %v4186_v13 }
  0xa7   : > { %v3106_v20 = vpop.eup %3105  ;;  %vm1094_vm11 = vweird.f32 %v4174_v1  ;;  %3115 = vrcp.f32 %v4192_v2  ;;  %v1160_v25 = vand.u32 2147483648, %v4192_v2  ;;  %v4210_v27 = vmul.f32 -1.442695, %v216_v50 }
  0xa8   : > { %v1105_v14 = vmul.f32 %v3106_v20, %v4151_v54  ;;  %v3108_v24 = vpop.eup %3107  ;;  %vm1110_vm12 = vweird.f32 %v3106_v20  ;;  %v1158_v19 = vand.u32 2147483647, %v4192_v2  ;;  %3117 = vrcp.f32 %v4194_v17 }
  0xa9   : > { %v3110_v0 = vpop.eup %3109  ;;  %vm4215_vm13 = vcmp.eq.f32.partialorder %v1098_v53, 8.507059e+37  ;;  %v1101_v31 = vor.u32 1.1754944e-38, %v1100_v48  ;;  %vm1169_vm14 = vweird.f32 %v4186_v13  ;;  %vm4220_vm15 = vcmp.eq.f32.partialorder %v1173_v18, 8.507059e+37  ;;  %vm4227_vm6 = vmor %vm1109_vm10, %vm1110_vm12  ;;  %v1871_v48 = vld [vmem:[%s4063_s19 + $0x88] sm:$0xff] }
  0xaa   : > { %v1106_v28 = vsub.f32 1.0, %v1105_v14  ;;  %v1090_v21 = vmul.f32 %v3110_v0, %v4174_v1  ;;  %v3112_v32 = vpop.eup %3111  ;;  %v1176_v3 = vor.u32 1.1754944e-38, %v1175_v15  ;;  %vm1154_vm0 = vweird.f32 %v4192_v2 }
  0xab   : > { %v3114_v38 = vpop.eup %3113  ;;  %vm1095_vm1 = vweird.f32 %v3110_v0  ;;  %v4231_v34 = vor.u32 1.1754944e-38, %v1160_v25  ;;  %v4233_v43 = vadd.f32 1.0, %v3108_v24  ;;  %vm4236_vm2 = vcmp.eq.f32.partialorder %v1158_v19, 8.507059e+37 }
  0xac   : > { %v1107_v33 = vmul.f32 %v3106_v20, %v1106_v28  ;;  %v1091_v40 = vsub.f32 1.0, %v1090_v21  ;;  %v1165_v45 = vmul.f32 %v3114_v38, %v4186_v13  ;;  %v1143_v29 = vand.u32 2147483647, %v4194_v17  ;;  %vm4250_vm3 = vmor %vm1094_vm11, %vm1095_vm1 }
  0xad   : > { %3119 = vpow2.f32 %v2898_v16  ;;  %v3116_v51 = vpop.eup %3115  ;;  %v1145_v42 = vand.u32 2147483648, %v4194_v17  ;;  %v4243_v47 = vadd.f32 1.0, %v3112_v32  ;;  %vm1170_vm5 = vweird.f32 %v3114_v38 }
  0xae   : > { %v1108_v44 = vadd.f32 %v3106_v20, %v1107_v33  ;;  %v1092_v52 = vmul.f32 %v3110_v0, %v1091_v40  ;;  %3121 = vrcp.f32 %v4233_v43  ;;  %v3118_v54 = vpop.eup %3117  ;;  %v1166_v58 = vsub.f32 1.0, %v1165_v45  ;;  %vm4267_vm11 = vmor %vm1169_vm14, %vm1170_vm5  ;;  %v2035_v45 = vpop.permute.xlu1 %2034 }
  0xaf   : > { %v1150_v41 = vmul.f32 %v3116_v51, %v4192_v2  ;;  %v1135_v61 = vmul.f32 %v3118_v54, %v4194_v17  ;;  %vm1139_vm7 = vweird.f32 %v4194_v17  ;;  %vm1155_vm8 = vweird.f32 %v3116_v51 }
  0xb0   : > { %v1112_v55 = vsel %vm4227_vm6, %v3106_v20, %v1108_v44  ;;  %v1093_v60 = vadd.f32 %v3110_v0, %v1092_v52  ;;  %v1167_v63 = vmul.f32 %v3114_v38, %v1166_v58  ;;  %vm4259_vm10 = vcmp.eq.f32.partialorder %v1143_v29, 8.507059e+37  ;;  %vm4278_vm12 = vmor %vm1154_vm0, %vm1155_vm8  ;;  %v1859_v44 = vld [vmem:[%s4063_s19 + $0x28] sm:$0xff]  ;;  %v2025_v52 = vpop.permute.xlu0 %2024 }
  0xb1   : > { %v1117_v59 = vsel %vm4188_vm9, %v1116_v23, %v1112_v55  ;;  %v1151_v35 = vsub.f32 1.0, %v1150_v41  ;;  %v1136_v57 = vsub.f32 1.0, %v1135_v61  ;;  %vm1140_vm9 = vweird.f32 %v3118_v54 }
  0xb2   : > { %2194 = vperm.xlu1 %2957, %v1117_v59   ;;  %v1097_v4 = vsel %vm4250_vm3, %v3110_v0, %v1093_v60  ;;  %3123 = vrcp.f32 %v4243_v47  ;;  %v1168_v7 = vadd.f32 %v3114_v38, %v1167_v63  ;;  %v1146_v36 = vor.u32 1.1754944e-38, %v1145_v42  ;;  %v2080_v0 = vpop.permute.xlu2 %2079  ;;  %v221_v42 = vld [vmem:[%s3333_s15 + $0x178] sm:$0xff]  ;;  %v219_v60 = vld [vmem:[%s3333_s15 + $0x168] sm:$0xff] }
  0xb3   : > { %v3120_v5 = vpop.eup %3119  ;;  %v1102_v6 = vsel %vm4215_vm13, %v1101_v31, %v1097_v4  ;;  %v1152_v8 = vmul.f32 %v3116_v51, %v1151_v35  ;;  %v1137_v11 = vmul.f32 %v3118_v54, %v1136_v57  ;;  %vm1214_vm14 = vweird.f32 %v4233_v43  ;;  %vm4291_vm13 = vmor %vm1139_vm7, %vm1140_vm9  ;;  %v1876_v31 = vld [vmem:[%s4063_s19 + $0xb0] sm:$0xff] }
  0xb4   : > { %v4274_v9 = vpop.eup %3121  ;;  %2189 = vperm.xlu0 %2956, %v1102_v6   ;;  %v1218_v13 = vand.u32 2147483647, %v4233_v43  ;;  %v1220_v16 = vand.u32 2147483648, %v4233_v43  ;;  %v1172_v50 = vsel %vm4267_vm11, %v3114_v38, %v1168_v7  ;;  %vm1199_vm0 = vweird.f32 %v4243_v47  ;;  %v1877_v38 = vld [vmem:[%s4063_s19 + $0xb8] sm:$0xff] }
  0xb5   : > { %v1153_v20 = vadd.f32 %v3116_v51, %v1152_v8  ;;  %v1210_v53 = vmul.f32 %v4274_v9, %v4233_v43  ;;  %v1177_v14 = vsel %vm4220_vm15, %v1176_v3, %v1172_v50  ;;  %v1138_v23 = vadd.f32 %v3118_v54, %v1137_v11 }
  0xb6   : > { %vm1215_vm6 = vweird.f32 %v4274_v9  ;;  %v1205_v18 = vand.u32 2147483648, %v4243_v47  ;;  %2214 = vperm.xlu2 %2958, %v1177_v14   ;;  %v4305_v24 = vadd.f32 1.0, %v3120_v5  ;;  %v2458_v25 = vmul.f32 %v2065_v26, %v1870_v12 }
  0xb7   : > { %v1157_v17 = vsel %vm4278_vm12, %v3116_v51, %v1153_v20  ;;  %v1211_v15 = vsub.f32 1.0, %v1210_v53  ;;  %v1142_v21 = vsel %vm4291_vm13, %v3118_v54, %v1138_v23  ;;  %v2459_v30 = vmul.f32 %v2065_v26, %v1871_v48  ;;  %vm4331_vm1 = vmor %vm1214_vm14, %vm1215_vm6  ;;  %v1854_v26 = vld [vmem:[%s4063_s19] sm:$0xff]  ;;  %v1855_v51 = vld [vmem:[%s4063_s19 + $0x8] sm:$0xff] }
  0xb8   : > { %v4307_v28 = vpop.eup %3123  ;;  %v1162_v19 = vsel %vm4236_vm2, %v4231_v34, %v1157_v17  ;;  %3125 = vpow2.f32 %v4196_v49  ;;  %v1147_v32 = vsel %vm4259_vm10, %v1146_v36, %v1142_v21  ;;  %vm4319_vm15 = vcmp.eq.f32.partialorder %v1218_v13, 8.507059e+37  ;;  %2627 = vst [vmem:[%s4118_s22 + $0x80] sm:$0xff] %v2458_v25  ;;  %v1858_v34 = vld [vmem:[%s4063_s19 + $0x20] sm:$0xff]  ;;  %v224_v53 = vld [vmem:[%s3333_s15 + $0x190] sm:$0xff] }
  0xb9   : > { %v1212_v33 = vmul.f32 %v4274_v9, %v1211_v15  ;;  %v1195_v3 = vmul.f32 %v4307_v28, %v4243_v47  ;;  %v1221_v39 = vor.u32 1.1754944e-38, %v1220_v16  ;;  %vm1200_vm2 = vweird.f32 %v4307_v28  ;;  %2628 = vst.msk [vmem:[%s4118_s22 + $0x88] sm:$0xff] %vm2611_vm4, %v2459_v30  ;;  %v1882_v13 = vld [vmem:[%s4063_s19 + $0xe0] sm:$0xff] }
  0xba   : > { %2209 = vperm.xlu1 %2957, %v1162_v19   ;;  %v1203_v40 = vand.u32 2147483647, %v4243_v47  ;;  %3127 = vrcp.f32 %v4305_v24  ;;  %v2464_v29 = vmul.f32 %v2080_v0, %v1876_v31  ;;  %v1206_v54 = vor.u32 1.1754944e-38, %v1205_v18  ;;  %vm4361_vm3 = vmor %vm1199_vm0, %vm1200_vm2  ;;  %v2095_v16 = vpop.permute.xlu2 %2094 }
  0xbb   : > { %v1213_v43 = vadd.f32 %v4274_v9, %v1212_v33  ;;  %v1196_v46 = vsub.f32 1.0, %v1195_v3  ;;  %3129 = vpow2.f32 %v4202_v22  ;;  %v2465_v55 = vmul.f32 %v2080_v0, %v1877_v38 }
  0xbc   : > { %2204 = vperm.xlu0 %2956, %v1147_v32   ;;  %3131 = vpow2.f32 %v4210_v27  ;;  %2633 = vst [vmem:[%s4118_s22 + $0xb0] sm:$0xff] %v2464_v29  ;;  %v2446_v22 = vmul.f32 %v2035_v45, %v1858_v34  ;;  %v2447_v59 = vmul.f32 %v2035_v45, %v1859_v44  ;;  %v2442_v35 = vmul.f32 %v2025_v52, %v1854_v26  ;;  %v2040_v34 = vpop.permute.xlu1 %2039  ;;  %v2030_v27 = vpop.permute.xlu0 %2029 }
  0xbd   : > { %v1217_v58 = vsel %vm4331_vm1, %v4274_v9, %v1213_v43  ;;  %v1197_v41 = vmul.f32 %v4307_v28, %v1196_v46  ;;  %2634 = vst.msk [vmem:[%s4118_s22 + $0xb8] sm:$0xff] %vm2611_vm4, %v2465_v55  ;;  %v2443_v62 = vmul.f32 %v2025_v52, %v1855_v51  ;;  %v2906_v4 = vmul.f32 -1.442695, %v221_v42  ;;  %v1868_v51 = vld [vmem:[%s4063_s19 + $0x70] sm:$0xff] }
  0xbe   : > { %v3126_v61 = vpop.eup %3125  ;;  %v1222_v63 = vsel %vm4319_vm15, %v1221_v39, %v1217_v58  ;;  %vm4368_vm5 = vcmp.eq.f32.partialorder %v1203_v40, 8.507059e+37  ;;  %2615 = vst [vmem:[%s4118_s22 + $0x20] sm:$0xff] %v2446_v22  ;;  %v2905_v47 = vmul.f32 -1.442695, %v220_v56  ;;  %v1188_v7 = vand.u32 2147483647, %v4305_v24 }
  0xbf   : > { %2229 = vperm.xlu2 %2958, %v1222_v63   ;;  %v1198_v1 = vadd.f32 %v4307_v28, %v1197_v41  ;;  %v4372_v5 = vadd.f32 1.0, %v3126_v61  ;;  %v1190_v8 = vand.u32 2147483648, %v4305_v24  ;;  %2616 = vst.msk [vmem:[%s4118_s22 + $0x28] sm:$0xff] %vm2611_vm4, %v2447_v59  ;;  %3133 = vpow2.f32 %v2906_v4  ;;  %v1883_v39 = vld [vmem:[%s4063_s19 + $0xe8] sm:$0xff]  ;;  %v1860_v40 = vld [vmem:[%s4063_s19 + $0x30] sm:$0xff] }
  0xc0   : > { %v3128_v6 = vpop.eup %3127  ;;  %v2904_v36 = vmul.f32 -1.442695, %v219_v60  ;;  %vm1184_vm7 = vweird.f32 %v4305_v24  ;;  %2610 = vst [vmem:[%s4118_s22] sm:$0xff] %v2442_v35  ;;  %vm4398_vm10 = vcmp.eq.f32.partialorder %v1188_v7, 8.507059e+37  ;;  %v2470_v15 = vmul.f32 %v2095_v16, %v1882_v13  ;;  %v1856_v13 = vld [vmem:[%s4063_s19 + $0x10] sm:$0xff]  ;;  %v226_v35 = vld [vmem:[%s3333_s15 + $0x1a0] sm:$0xff] }
  0xc1   : > { %v3130_v9 = vpop.eup %3129  ;;  %v1202_v10 = vsel %vm4361_vm3, %v4307_v28, %v1198_v1  ;;  %v1180_v11 = vmul.f32 %v3128_v6, %v4305_v24  ;;  %3135 = vrcp.f32 %v4372_v5  ;;  %vm1185_vm8 = vweird.f32 %v3128_v6  ;;  %2612 = vst.msk [vmem:[%s4118_s22 + $0x8] sm:$0xff] %vm2611_vm4, %v2443_v62 }
  0xc2   : > { %v3132_v12 = vpop.eup %3131  ;;  %v1207_v50 = vsel %vm4368_vm5, %v1206_v54, %v1202_v10  ;;  %v1263_v20 = vand.u32 2147483647, %v4372_v5  ;;  %v1265_v2 = vand.u32 2147483648, %v4372_v5  ;;  %v4394_v14 = vadd.f32 1.0, %v3130_v9  ;;  %vm4409_vm9 = vmor %vm1184_vm7, %vm1185_vm8  ;;  %2639 = vst [vmem:[%s4118_s22 + $0xe0] sm:$0xff] %v2470_v15 }
  0xc3   : > { %2224 = vperm.xlu1 %2957, %v1207_v50   ;;  %v1181_v48 = vsub.f32 1.0, %v1180_v11  ;;  %v4396_v23 = vadd.f32 1.0, %v3132_v12  ;;  %3137 = vpow2.f32 %v2905_v47  ;;  %v1191_v17 = vor.u32 1.1754944e-38, %v1190_v8  ;;  %v1861_v11 = vld [vmem:[%s4063_s19 + $0x38] sm:$0xff] }
  0xc4   : > { %3139 = vpow2.f32 %v2904_v36  ;;  %vm1259_vm11 = vweird.f32 %v4372_v5  ;;  %v4404_v0 = vmul.f32 -1.442695, %v224_v53  ;;  %vm4413_vm12 = vcmp.eq.f32.partialorder %v1263_v20, 8.507059e+37 }
  0xc5   : > { %v1182_v25 = vmul.f32 %v3128_v6, %v1181_v48  ;;  %3141 = vrcp.f32 %v4394_v14  ;;  %v3134_v28 = vpop.eup %3133  ;;  %v1248_v30 = vand.u32 2147483647, %v4394_v14  ;;  %v1250_v31 = vand.u32 2147483648, %v4394_v14 }
  0xc6   : > { %3143 = vrcp.f32 %v4396_v23  ;;  %v1266_v24 = vor.u32 1.1754944e-38, %v1265_v2  ;;  %vm1244_vm14 = vweird.f32 %v4394_v14  ;;  %v4422_v37 = vadd.f32 1.0, %v3134_v28 }
  0xc7   : > { %v3136_v32 = vpop.eup %3135  ;;  %v1183_v33 = vadd.f32 %v3128_v6, %v1182_v25  ;;  %vm1229_vm13 = vweird.f32 %v4396_v23  ;;  %v1233_v38 = vand.u32 2147483647, %v4396_v23  ;;  %v1235_v49 = vand.u32 2147483648, %v4396_v23 }
  0xc8   : > { %v1255_v3 = vmul.f32 %v3136_v32, %v4372_v5  ;;  %vm1260_vm0 = vweird.f32 %v3136_v32  ;;  %v4432_v43 = vor.u32 1.1754944e-38, %v1250_v31  ;;  %3145 = vrcp.f32 %v4422_v37 }
  0xc9   : > { %v3138_v44 = vpop.eup %3137  ;;  %v1187_v45 = vsel %vm4409_vm9, %v3128_v6, %v1183_v33  ;;  %vm4437_vm6 = vcmp.eq.f32.partialorder %v1248_v30, 8.507059e+37  ;;  %v1308_v52 = vand.u32 2147483647, %v4422_v37  ;;  %v1310_v42 = vand.u32 2147483648, %v4422_v37  ;;  %vm4457_vm1 = vmor %vm1259_vm11, %vm1260_vm0  ;;  %v223_v33 = vld [vmem:[%s3333_s15 + $0x188] sm:$0xff] }
  0xca   : > { %v3140_v46 = vpop.eup %3139  ;;  %v1192_v29 = vsel %vm4398_vm10, %v1191_v17, %v1187_v45  ;;  %v1256_v26 = vsub.f32 1.0, %v1255_v3  ;;  %v4443_v55 = vadd.f32 1.0, %v3138_v44  ;;  %v2471_v58 = vmul.f32 %v2095_v16, %v1883_v39  ;;  %v1857_v16 = vld [vmem:[%s4063_s19 + $0x18] sm:$0xff]  ;;  %v2110_v44 = vpop.permute.xlu2 %2109 }
  0xcb   : > { %v3142_v54 = vpop.eup %3141  ;;  %2219 = vperm.xlu0 %2956, %v1192_v29   ;;  %v4445_v56 = vadd.f32 1.0, %v3140_v46  ;;  %v2448_v41 = vmul.f32 %v2040_v34, %v1860_v40  ;;  %vm4450_vm15 = vcmp.eq.f32.partialorder %v1233_v38, 8.507059e+37  ;;  %v1236_v63 = vor.u32 1.1754944e-38, %v1235_v49  ;;  %v2060_v45 = vpop.permute.xlu1 %2059 }
  0xcc   : > { %v4447_v22 = vpop.eup %3143  ;;  %v1257_v59 = vmul.f32 %v3136_v32, %v1256_v26  ;;  %v1240_v60 = vmul.f32 %v3142_v54, %v4394_v14  ;;  %vm1245_vm2 = vweird.f32 %v3142_v54  ;;  %vm1304_vm3 = vweird.f32 %v4422_v37  ;;  %2640 = vst.msk [vmem:[%s4118_s22 + $0xe8] sm:$0xff] %vm2611_vm4, %v2471_v58  ;;  %v1889_v26 = vld [vmem:[%s4063_s19 + $0x118] sm:$0xff] }
  0xcd   : > { %v1225_v62 = vmul.f32 %v4447_v22, %v4396_v23  ;;  %3147 = vrcp.f32 %v4443_v55  ;;  %vm1230_vm5 = vweird.f32 %v4447_v22  ;;  %vm4468_vm7 = vcmp.eq.f32.partialorder %v1308_v52, 8.507059e+37  ;;  %2617 = vst [vmem:[%s4118_s22 + $0x30] sm:$0xff] %v2448_v41  ;;  %vm4493_vm10 = vmor %vm1244_vm14, %vm1245_vm2  ;;  %v2055_v52 = vpop.permute.xlu0 %2054  ;;  %v1869_v41 = vld [vmem:[%s4063_s19 + $0x78] sm:$0xff] }
  0xce   : > { %v1258_v4 = vadd.f32 %v3136_v32, %v1257_v59  ;;  %v1241_v1 = vsub.f32 1.0, %v1240_v60  ;;  %v1293_v5 = vand.u32 2147483647, %v4443_v55  ;;  %v4474_v47 = vpop.eup %3145  ;;  %v4476_v7 = vor.u32 1.1754944e-38, %v1310_v42  ;;  %v227_v42 = vld [vmem:[%s3333_s15 + $0x1a8] sm:$0xff] }
  0xcf   : > { %v1226_v6 = vsub.f32 1.0, %v1225_v62  ;;  %v1295_v8 = vand.u32 2147483648, %v4443_v55  ;;  %3149 = vrcp.f32 %v4445_v56  ;;  %v1300_v10 = vmul.f32 %v4474_v47, %v4422_v37 }
  0xd0   : > { %v1262_v36 = vsel %vm4457_vm1, %v3136_v32, %v1258_v4  ;;  %v1242_v9 = vmul.f32 %v3142_v54, %v1241_v1  ;;  %vm1289_vm8 = vweird.f32 %v4443_v55  ;;  %vm1305_vm11 = vweird.f32 %v4474_v47 }
  0xd1   : > { %v1267_v12 = vsel %vm4413_vm12, %v1266_v24, %v1262_v36  ;;  %v1227_v20 = vmul.f32 %v4447_v22, %v1226_v6  ;;  %vm1274_vm9 = vweird.f32 %v4445_v56  ;;  %vm4504_vm12 = vmor %vm1229_vm13, %vm1230_vm5  ;;  %v1301_v48 = vsub.f32 1.0, %v1300_v10  ;;  %v222_v24 = vld [vmem:[%s3333_s15 + $0x180] sm:$0xff] }
  0xd2   : > { %2244 = vperm.xlu2 %2958, %v1267_v12   ;;  %v1243_v2 = vadd.f32 %v3142_v54, %v1242_v9  ;;  %vm4508_vm14 = vcmp.eq.f32.partialorder %v1293_v5, 8.507059e+37  ;;  %v4512_v18 = vor.u32 1.1754944e-38, %v1295_v8  ;;  %v1280_v17 = vand.u32 2147483648, %v4445_v56  ;;  %vm4538_vm13 = vmor %vm1304_vm3, %vm1305_vm11  ;;  %v225_v5 = vld [vmem:[%s3333_s15 + $0x198] sm:$0xff]  ;;  %v2125_v53 = vpop.permute.xlu2 %2124 }
  0xd3   : > { %v4515_v15 = vpop.eup %3147  ;;  %v1228_v25 = vadd.f32 %v4447_v22, %v1227_v20  ;;  %v2449_v23 = vmul.f32 %v2040_v34, %v1861_v11  ;;  %v2444_v28 = vmul.f32 %v2030_v27, %v1856_v13  ;;  %v2445_v19 = vmul.f32 %v2030_v27, %v1857_v16  ;;  %v1888_v34 = vld [vmem:[%s4063_s19 + $0x110] sm:$0xff]  ;;  %v1867_v27 = vld [vmem:[%s4063_s19 + $0x68] sm:$0xff]  ;;  %v230_v16 = vld [vmem:[%s3333_s15 + $0x1c0] sm:$0xff] }
  0xd4   : > { %v1247_v21 = vsel %vm4493_vm10, %v3142_v54, %v1243_v2  ;;  %v1302_v30 = vmul.f32 %v4474_v47, %v1301_v48  ;;  %v1285_v31 = vmul.f32 %v4515_v15, %v4443_v55  ;;  %v1278_v32 = vand.u32 2147483647, %v4445_v56  ;;  %v1894_v20 = vld [vmem:[%s4063_s19 + $0x140] sm:$0xff]  ;;  %v1895_v2 = vld [vmem:[%s4063_s19 + $0x148] sm:$0xff] }
  0xd5   : > { %v4526_v3 = vpop.eup %3149  ;;  %v1252_v38 = vsel %vm4437_vm6, %v4432_v43, %v1247_v21  ;;  %v1232_v49 = vsel %vm4504_vm12, %v4447_v22, %v1228_v25  ;;  %vm1290_vm0 = vweird.f32 %v4515_v15  ;;  %v4543_v40 = vor.u32 1.1754944e-38, %v1280_v17  ;;  %2618 = vst.msk [vmem:[%s4118_s22 + $0x38] sm:$0xff] %vm2611_vm4, %v2449_v23  ;;  %v1874_v48 = vld [vmem:[%s4063_s19 + $0xa0] sm:$0xff]  ;;  %v2075_v17 = vpop.permute.xlu1 %2074  ;;  %v1872_v23 = vld [vmem:[%s4063_s19 + $0x90] sm:$0xff] }
  0xd6   : > { %2239 = vperm.xlu1 %2957, %v1252_v38   ;;  %v1237_v37 = vsel %vm4450_vm15, %v1236_v63, %v1232_v49  ;;  %v1303_v43 = vadd.f32 %v4474_v47, %v1302_v30  ;;  %v1286_v46 = vsub.f32 1.0, %v1285_v31  ;;  %v1270_v29 = vmul.f32 %v4526_v3, %v4445_v56  ;;  %2613 = vst [vmem:[%s4118_s22 + $0x10] sm:$0xff] %v2444_v28  ;;  %v1866_v63 = vld [vmem:[%s4063_s19 + $0x60] sm:$0xff]  ;;  %vm4576_vm15 = vmor %vm1289_vm8, %vm1290_vm0  ;;  %v2070_v28 = vpop.permute.xlu0 %2069 }
  0xd7   : > { %2234 = vperm.xlu0 %2956, %v1237_v37   ;;  %vm1275_vm6 = vweird.f32 %v4526_v3  ;;  %2614 = vst.msk [vmem:[%s4118_s22 + $0x18] sm:$0xff] %vm2611_vm4, %v2445_v19  ;;  %3151 = vpow2.f32 %v4404_v0  ;;  %v2908_v54 = vmul.f32 -1.442695, %v223_v33  ;;  %v2907_v58 = vmul.f32 -1.442695, %v222_v24 }
  0xd8   : > { %v1307_v22 = vsel %vm4538_vm13, %v4474_v47, %v1303_v43  ;;  %v1287_v59 = vmul.f32 %v4515_v15, %v1286_v46  ;;  %v1271_v60 = vsub.f32 1.0, %v1270_v29  ;;  %v2476_v61 = vmul.f32 %v2110_v44, %v1888_v34  ;;  %vm4588_vm1 = vmor %vm1274_vm9, %vm1275_vm6 }
  0xd9   : > { %v1312_v0 = vsel %vm4468_vm7, %v4476_v7, %v1307_v22  ;;  %3153 = vpow2.f32 %v2908_v54  ;;  %v2477_v4 = vmul.f32 %v2110_v44, %v1889_v26  ;;  %v2456_v1 = vmul.f32 %v2060_v45, %v1868_v51 }
  0xda   : > { %2259 = vperm.xlu2 %2958, %v1312_v0   ;;  %v1288_v47 = vadd.f32 %v4515_v15, %v1287_v59  ;;  %v1272_v57 = vmul.f32 %v4526_v3, %v1271_v60  ;;  %3155 = vpow2.f32 %v2907_v58  ;;  %2645 = vst [vmem:[%s4118_s22 + $0x110] sm:$0xff] %v2476_v61  ;;  %v2457_v6 = vmul.f32 %v2060_v45, %v1869_v41 }
  0xdb   : > { %2646 = vst.msk [vmem:[%s4118_s22 + $0x118] sm:$0xff] %vm2611_vm4, %v2477_v4  ;;  %v2454_v7 = vmul.f32 %v2055_v52, %v1866_v63  ;;  %v2455_v8 = vmul.f32 %v2055_v52, %v1867_v27  ;;  %v2912_v36 = vmul.f32 -1.442695, %v227_v42  ;;  %v2911_v9 = vmul.f32 -1.442695, %v226_v35 }
  0xdc   : > { %v1292_v10 = vsel %vm4576_vm15, %v4515_v15, %v1288_v47  ;;  %v1273_v11 = vadd.f32 %v4526_v3, %v1272_v57  ;;  %vm4598_vm2 = vcmp.eq.f32.partialorder %v1278_v32, 8.507059e+37  ;;  %2625 = vst [vmem:[%s4118_s22 + $0x70] sm:$0xff] %v2456_v1  ;;  %v2910_v13 = vmul.f32 -1.442695, %v225_v5  ;;  %v1873_v32 = vld [vmem:[%s4063_s19 + $0x98] sm:$0xff] }
  0xdd   : > { %v3152_v12 = vpop.eup %3151  ;;  %v1297_v50 = vsel %vm4508_vm14, %v4512_v18, %v1292_v10  ;;  %2626 = vst.msk [vmem:[%s4118_s22 + $0x78] sm:$0xff] %vm2611_vm4, %v2457_v6  ;;  %3157 = vpow2.f32 %v2912_v36  ;;  %v2482_v14 = vmul.f32 %v2125_v53, %v1894_v20  ;;  %v1875_v18 = vld [vmem:[%s4063_s19 + $0xa8] sm:$0xff]  ;;  %v2483_v30 = vmul.f32 %v2125_v53, %v1895_v2 }
  0xde   : > { %2254 = vperm.xlu1 %2957, %v1297_v50   ;;  %v1277_v15 = vsel %vm4588_vm1, %v4526_v3, %v1273_v11  ;;  %v4615_v25 = vadd.f32 1.0, %v3152_v12  ;;  %2623 = vst [vmem:[%s4118_s22 + $0x60] sm:$0xff] %v2454_v7  ;;  %3159 = vpow2.f32 %v2911_v9  ;;  %v2462_v31 = vmul.f32 %v2075_v17, %v1874_v48  ;;  %v229_v3 = vld [vmem:[%s3333_s15 + $0x1b8] sm:$0xff]  ;;  %v2085_v27 = vpop.permute.xlu0 %2084  ;;  %v231_v48 = vld [vmem:[%s3333_s15 + $0x1c8] sm:$0xff] }
  0xdf   : > { %v3154_v19 = vpop.eup %3153  ;;  %v1282_v21 = vsel %vm4598_vm2, %v4543_v40, %v1277_v15  ;;  %2624 = vst.msk [vmem:[%s4118_s22 + $0x68] sm:$0xff] %vm2611_vm4, %v2455_v8  ;;  %3161 = vpow2.f32 %v2910_v13  ;;  %v2915_v24 = vmul.f32 -1.442695, %v230_v16  ;;  %v2463_v39 = vmul.f32 %v2075_v17, %v1875_v18 }
  0xe0   : > { %v3156_v33 = vpop.eup %3155  ;;  %2249 = vperm.xlu0 %2956, %v1282_v21   ;;  %3163 = vrcp.f32 %v4615_v25  ;;  %2651 = vst [vmem:[%s4118_s22 + $0x140] sm:$0xff] %v2482_v14  ;;  %v4629_v38 = vadd.f32 1.0, %v3154_v19  ;;  %v2460_v40 = vmul.f32 %v2070_v28, %v1872_v23  ;;  %v1353_v34 = vand.u32 2147483647, %v4615_v25 }
  0xe1   : > { %v4631_v49 = vadd.f32 1.0, %v3156_v33  ;;  %2652 = vst.msk [vmem:[%s4118_s22 + $0x148] sm:$0xff] %vm2611_vm4, %v2483_v30  ;;  %v1355_v44 = vand.u32 2147483648, %v4615_v25  ;;  %v2461_v45 = vmul.f32 %v2070_v28, %v1873_v32  ;;  %v2914_v46 = vmul.f32 -1.442695, %v229_v3 }
  0xe2   : > { %2631 = vst [vmem:[%s4118_s22 + $0xa0] sm:$0xff] %v2462_v31  ;;  %3165 = vrcp.f32 %v4629_v38  ;;  %v1340_v43 = vand.u32 2147483648, %v4629_v38  ;;  %vm1349_vm3 = vweird.f32 %v4615_v25  ;;  %v1338_v26 = vand.u32 2147483647, %v4629_v38 }
  0xe3   : > { %v3158_v37 = vpop.eup %3157  ;;  %2632 = vst.msk [vmem:[%s4118_s22 + $0xa8] sm:$0xff] %vm2611_vm4, %v2463_v39  ;;  %3167 = vrcp.f32 %v4631_v49  ;;  %v1325_v51 = vand.u32 2147483648, %v4631_v49  ;;  %v1323_v42 = vand.u32 2147483647, %v4631_v49  ;;  %vm4654_vm5 = vcmp.eq.f32.partialorder %v1353_v34, 8.507059e+37 }
  0xe4   : > { %v3160_v29 = vpop.eup %3159  ;;  %2629 = vst [vmem:[%s4118_s22 + $0x90] sm:$0xff] %v2460_v40  ;;  %v4648_v54 = vadd.f32 1.0, %v3158_v37  ;;  %3169 = vpow2.f32 %v2915_v24  ;;  %v1356_v59 = vor.u32 1.1754944e-38, %v1355_v44  ;;  %vm1334_vm7 = vweird.f32 %v4629_v38 }
  0xe5   : > { %v3162_v52 = vpop.eup %3161  ;;  %v4650_v58 = vadd.f32 1.0, %v3160_v29  ;;  %2630 = vst.msk [vmem:[%s4118_s22 + $0x98] sm:$0xff] %vm2611_vm4, %v2461_v45  ;;  %v1341_v63 = vor.u32 1.1754944e-38, %v1340_v43  ;;  %vm1319_vm8 = vweird.f32 %v4631_v49  ;;  %vm4664_vm10 = vcmp.eq.f32.partialorder %v1338_v26, 8.507059e+37  ;;  %v228_v43 = vld [vmem:[%s3333_s15 + $0x1b0] sm:$0xff]  ;;  %v234_v26 = vld [vmem:[%s3333_s15 + $0x1e0] sm:$0xff] }
  0xe6   : > { %v3164_v41 = vpop.eup %3163  ;;  %v4659_v60 = vadd.f32 1.0, %v3162_v52  ;;  %3171 = vrcp.f32 %v4648_v54  ;;  %v4668_v35 = vor.u32 1.1754944e-38, %v1325_v51  ;;  %v1398_v0 = vand.u32 2147483647, %v4648_v54 }
  0xe7   : > { %v1345_v61 = vmul.f32 %v3164_v41, %v4615_v25  ;;  %v1400_v62 = vand.u32 2147483648, %v4648_v54  ;;  %3173 = vrcp.f32 %v4650_v58  ;;  %vm1350_vm11 = vweird.f32 %v3164_v41 }
  0xe8   : > { %v3166_v4 = vpop.eup %3165  ;;  %vm4673_vm9 = vcmp.eq.f32.partialorder %v1323_v42, 8.507059e+37  ;;  %v1385_v47 = vand.u32 2147483648, %v4650_v58  ;;  %3175 = vrcp.f32 %v4659_v60  ;;  %vm1394_vm12 = vweird.f32 %v4648_v54  ;;  %vm4686_vm0 = vmor %vm1349_vm3, %vm1350_vm11  ;;  %v1900_v42 = vld [vmem:[%s4063_s19 + $0x170] sm:$0xff] }
  0xe9   : > { %v1346_v1 = vsub.f32 1.0, %v1345_v61  ;;  %v3168_v57 = vpop.eup %3167  ;;  %v1330_v6 = vmul.f32 %v3166_v4, %v4629_v38  ;;  %v1383_v55 = vand.u32 2147483647, %v4650_v58  ;;  %3177 = vpow2.f32 %v2914_v46 }
  0xea   : > { %v3170_v7 = vpop.eup %3169  ;;  %vm1335_vm14 = vweird.f32 %v3166_v4  ;;  %v1315_v36 = vmul.f32 %v3168_v57, %v4631_v49  ;;  %vm1379_vm13 = vweird.f32 %v4650_v58  ;;  %vm1320_vm6 = vweird.f32 %v3168_v57 }
  0xeb   : > { %v1347_v8 = vmul.f32 %v3164_v41, %v1346_v1  ;;  %v1331_v10 = vsub.f32 1.0, %v1330_v6  ;;  %vm4690_vm15 = vcmp.eq.f32.partialorder %v1398_v0, 8.507059e+37  ;;  %v1401_v56 = vor.u32 1.1754944e-38, %v1400_v62  ;;  %vm4714_vm3 = vmor %vm1334_vm7, %vm1335_vm14 }
  0xec   : > { %v3172_v13 = vpop.eup %3171  ;;  %v1316_v12 = vsub.f32 1.0, %v1315_v36  ;;  %v4694_v50 = vor.u32 1.1754944e-38, %v1385_v47  ;;  %vm1364_vm1 = vweird.f32 %v4659_v60  ;;  %vm4700_vm2 = vcmp.eq.f32.partialorder %v1383_v55, 8.507059e+37  ;;  %v1901_v47 = vld [vmem:[%s4063_s19 + $0x178] sm:$0xff]  ;;  %v1878_v36 = vld [vmem:[%s4063_s19 + $0xc0] sm:$0xff] }
  0xed   : > { %v1348_v16 = vadd.f32 %v3164_v41, %v1347_v8  ;;  %v4697_v20 = vpop.eup %3173  ;;  %v1332_v2 = vmul.f32 %v3166_v4, %v1331_v10  ;;  %v1390_v53 = vmul.f32 %v3172_v13, %v4648_v54  ;;  %v1370_v17 = vand.u32 2147483648, %v4659_v60  ;;  %v2140_v54 = vpop.permute.xlu2 %2139  ;;  %v1881_v8 = vld [vmem:[%s4063_s19 + $0xd8] sm:$0xff] }
  0xee   : > { %v4705_v15 = vadd.f32 1.0, %v3170_v7  ;;  %v4707_v25 = vpop.eup %3175  ;;  %v1317_v23 = vmul.f32 %v3168_v57, %v1316_v12  ;;  %vm1395_vm11 = vweird.f32 %v3172_v13  ;;  %v1375_v28 = vmul.f32 %v4697_v20, %v4650_v58  ;;  %v232_v12 = vld [vmem:[%s3333_s15 + $0x1d0] sm:$0xff] }
  0xef   : > { %v1352_v14 = vsel %vm4686_vm0, %v3164_v41, %v1348_v16  ;;  %v3178_v19 = vpop.eup %3177  ;;  %v1333_v30 = vadd.f32 %v3166_v4, %v1332_v2  ;;  %vm4725_vm0 = vmor %vm1319_vm8, %vm1320_vm6  ;;  %v1391_v32 = vsub.f32 1.0, %v1390_v53  ;;  %v1360_v33 = vmul.f32 %v4707_v25, %v4659_v60  ;;  %v2090_v41 = vpop.permute.xlu1 %2089  ;;  %v233_v16 = vld [vmem:[%s3333_s15 + $0x1d8] sm:$0xff] }
  0xf0   : > { %v1357_v21 = vsel %vm4654_vm5, %v1356_v59, %v1352_v14  ;;  %v1318_v24 = vadd.f32 %v3168_v57, %v1317_v23  ;;  %v1376_v3 = vsub.f32 1.0, %v1375_v28  ;;  %vm1380_vm7 = vweird.f32 %v4697_v20  ;;  %vm4743_vm8 = vmor %vm1394_vm12, %vm1395_vm11  ;;  %v1906_v28 = vld [vmem:[%s4063_s19 + $0x1a0] sm:$0xff] }
  0xf1   : > { %2274 = vperm.xlu2 %2958, %v1357_v21   ;;  %vm1365_vm5 = vweird.f32 %v4707_v25  ;;  %v1337_v38 = vsel %vm4714_vm3, %v3166_v4, %v1333_v30  ;;  %v1392_v49 = vmul.f32 %v3172_v13, %v1391_v32  ;;  %v1361_v39 = vsub.f32 1.0, %v1360_v33  ;;  %v236_v30 = vld [vmem:[%s3333_s15 + $0x1f0] sm:$0xff] }
  0xf2   : > { %3179 = vrcp.f32 %v4705_v15  ;;  %v1342_v40 = vsel %vm4664_vm10, %v1341_v63, %v1337_v38  ;;  %v1322_v34 = vsel %vm4725_vm0, %v3168_v57, %v1318_v24  ;;  %v1377_v45 = vmul.f32 %v4697_v20, %v1376_v3  ;;  %vm4757_vm10 = vmor %vm1379_vm13, %vm1380_vm7  ;;  %v1880_v57 = vld [vmem:[%s4063_s19 + $0xd0] sm:$0xff]  ;;  %v1907_v24 = vld [vmem:[%s4063_s19 + $0x1a8] sm:$0xff] }
  0xf3   : > { %v1368_v37 = vand.u32 2147483647, %v4659_v60  ;;  %2269 = vperm.xlu1 %2957, %v1342_v40   ;;  %v1327_v46 = vsel %vm4673_vm9, %v4668_v35, %v1322_v34  ;;  %v1393_v29 = vadd.f32 %v3172_v13, %v1392_v49  ;;  %v1362_v51 = vmul.f32 %v4707_v25, %v1361_v39  ;;  %vm4769_vm9 = vmor %vm1364_vm1, %vm1365_vm5  ;;  %v1886_v38 = vld [vmem:[%s4063_s19 + $0x100] sm:$0xff]  ;;  %v1887_v49 = vld [vmem:[%s4063_s19 + $0x108] sm:$0xff]  ;;  %v2100_v39 = vpop.permute.xlu0 %2099 }
  0xf4   : > { %v1443_v52 = vand.u32 2147483647, %v4705_v15  ;;  %2264 = vperm.xlu0 %2956, %v1327_v46   ;;  %v1378_v22 = vadd.f32 %v4697_v20, %v1377_v45  ;;  %v1371_v59 = vor.u32 1.1754944e-38, %v1370_v17  ;;  %v1445_v61 = vand.u32 2147483648, %v4705_v15 }
  0xf5   : > { %v4774_v63 = vadd.f32 1.0, %v3178_v19  ;;  %v1397_v35 = vsel %vm4743_vm8, %v3172_v13, %v1393_v29  ;;  %v1363_v0 = vadd.f32 %v4707_v25, %v1362_v51  ;;  %v2913_v62 = vmul.f32 -1.442695, %v228_v43  ;;  %v1879_v13 = vld [vmem:[%s4063_s19 + $0xc8] sm:$0xff]  ;;  %v2155_v19 = vpop.permute.xlu2 %2154  ;;  %v1885_v29 = vld [vmem:[%s4063_s19 + $0xf8] sm:$0xff] }
  0xf6   : > { %v2488_v60 = vmul.f32 %v2140_v54, %v1900_v42  ;;  %v1402_v4 = vsel %vm4690_vm15, %v1401_v56, %v1397_v35  ;;  %v1382_v1 = vsel %vm4757_vm10, %v4697_v20, %v1378_v22  ;;  %vm4784_vm12 = vcmp.eq.f32.partialorder %v1368_v37, 8.507059e+37  ;;  %v1884_v37 = vld [vmem:[%s4063_s19 + $0xf0] sm:$0xff]  ;;  %v235_v43 = vld [vmem:[%s3333_s15 + $0x1e8] sm:$0xff] }
  0xf7   : > { %3181 = vrcp.f32 %v4774_v63  ;;  %v1367_v55 = vsel %vm4769_vm9, %v4707_v25, %v1363_v0  ;;  %vm1439_vm14 = vweird.f32 %v4705_v15  ;;  %vm4797_vm13 = vcmp.eq.f32.partialorder %v1443_v52, 8.507059e+37  ;;  %v2105_v21 = vpop.permute.xlu1 %2104 }
  0xf8   : > { %v4791_v6 = vpop.eup %3179  ;;  %2657 = vst [vmem:[%s4118_s22 + $0x170] sm:$0xff] %v2488_v60  ;;  %v1387_v9 = vsel %vm4700_vm2, %v4694_v50, %v1382_v1  ;;  %v1446_v11 = vor.u32 1.1754944e-38, %v1445_v61  ;;  %v1428_v56 = vand.u32 2147483647, %v4774_v63  ;;  %v1372_v20 = vsel %vm4784_vm12, %v1371_v59, %v1367_v55 }
  0xf9   : > { %2289 = vperm.xlu2 %2958, %v1402_v4   ;;  %v1435_v10 = vmul.f32 %v4791_v6, %v4705_v15  ;;  %3183 = vpow2.f32 %v2913_v62  ;;  %v2489_v2 = vmul.f32 %v2140_v54, %v1901_v47  ;;  %v2468_v53 = vmul.f32 %v2090_v41, %v1880_v57  ;;  %v239_v62 = vld [vmem:[%s3333_s15 + $0x208] sm:$0xff]  ;;  %v238_v57 = vld [vmem:[%s3333_s15 + $0x200] sm:$0xff] }
  0xfa   : > { %vm1440_vm6 = vweird.f32 %v4791_v6  ;;  %v2469_v17 = vmul.f32 %v2090_v41, %v1881_v8  ;;  %v2466_v25 = vmul.f32 %v2085_v27, %v1878_v36  ;;  %v2467_v14 = vmul.f32 %v2085_v27, %v1879_v13 }
  0xfb   : > { %v1436_v50 = vsub.f32 1.0, %v1435_v10  ;;  %2284 = vperm.xlu1 %2957, %v1387_v9   ;;  %2658 = vst.msk [vmem:[%s4118_s22 + $0x178] sm:$0xff] %vm2611_vm4, %v2489_v2  ;;  %v2918_v18 = vmul.f32 -1.442695, %v233_v16  ;;  %v2917_v23 = vmul.f32 -1.442695, %v232_v12  ;;  %vm1424_vm15 = vweird.f32 %v4774_v63  ;;  %vm4833_vm1 = vmor %vm1439_vm14, %vm1440_vm6 }
  0xfc   : > { %2279 = vperm.xlu0 %2956, %v1372_v20   ;;  %2637 = vst [vmem:[%s4118_s22 + $0xd0] sm:$0xff] %v2468_v53  ;;  %v2916_v33 = vmul.f32 -1.442695, %v231_v48  ;;  %v2494_v3 = vmul.f32 %v2155_v19, %v1906_v28  ;;  %v1430_v44 = vand.u32 2147483648, %v4774_v63  ;;  %v2495_v45 = vmul.f32 %v2155_v19, %v1907_v24 }
  0xfd   : > { %v4821_v31 = vpop.eup %3181  ;;  %v1437_v32 = vmul.f32 %v4791_v6, %v1436_v50  ;;  %2638 = vst.msk [vmem:[%s4118_s22 + $0xd8] sm:$0xff] %vm2611_vm4, %v2469_v17  ;;  %3185 = vpow2.f32 %v2918_v18  ;;  %v2474_v15 = vmul.f32 %v2105_v21, %v1886_v38  ;;  %v2475_v42 = vmul.f32 %v2105_v21, %v1887_v49  ;;  %v2170_v13 = vpop.permute.xlu2 %2169  ;;  %v1913_v21 = vld [vmem:[%s4063_s19 + $0x1d8] sm:$0xff] }
  0xfe   : > { %v1420_v34 = vmul.f32 %v4821_v31, %v4774_v63  ;;  %vm1425_vm2 = vweird.f32 %v4821_v31  ;;  %2635 = vst [vmem:[%s4118_s22 + $0xc0] sm:$0xff] %v2466_v25  ;;  %3187 = vpow2.f32 %v2917_v23  ;;  %v2472_v54 = vmul.f32 %v2100_v39, %v1884_v37 }
  0xff   : > { %v1438_v46 = vadd.f32 %v4791_v6, %v1437_v32  ;;  %v3184_v51 = vpop.eup %3183  ;;  %2636 = vst.msk [vmem:[%s4118_s22 + $0xc8] sm:$0xff] %vm2611_vm4, %v2467_v14  ;;  %3189 = vpow2.f32 %v2916_v33  ;;  %v2921_v58 = vmul.f32 -1.442695, %v236_v30  ;;  %v2920_v59 = vmul.f32 -1.442695, %v235_v43  ;;  %vm4867_vm3 = vmor %vm1424_vm15, %vm1425_vm2  ;;  %v1892_v30 = vld [vmem:[%s4063_s19 + $0x130] sm:$0xff] }
 0x100   : > { %v1421_v52 = vsub.f32 1.0, %v1420_v34  ;;  %v4854_v22 = vadd.f32 1.0, %v3184_v51  ;;  %2663 = vst [vmem:[%s4118_s22 + $0x1a0] sm:$0xff] %v2494_v3  ;;  %v2473_v35 = vmul.f32 %v2100_v39, %v1885_v29  ;;  %v2919_v0 = vmul.f32 -1.442695, %v234_v26 }
 0x101   : > { %v1442_v41 = vsel %vm4833_vm1, %v4791_v6, %v1438_v46  ;;  %2664 = vst.msk [vmem:[%s4118_s22 + $0x1a8] sm:$0xff] %vm2611_vm4, %v2495_v45  ;;  %v1431_v4 = vor.u32 1.1754944e-38, %v1430_v44  ;;  %vm4876_vm11 = vcmp.eq.f32.partialorder %v1428_v56, 8.507059e+37  ;;  %v237_v6 = vld [vmem:[%s3333_s15 + $0x1f8] sm:$0xff]  ;;  %v4888_v36 = vmul.f32 -1.442695, %v239_v62 }
 0x102   : > { %v1447_v61 = vsel %vm4797_vm13, %v1446_v11, %v1442_v41  ;;  %v1422_v27 = vmul.f32 %v4821_v31, %v1421_v52  ;;  %3191 = vrcp.f32 %v4854_v22  ;;  %2643 = vst [vmem:[%s4118_s22 + $0x100] sm:$0xff] %v2474_v15  ;;  %v1413_v7 = vand.u32 2147483647, %v4854_v22  ;;  %v1912_v56 = vld [vmem:[%s4063_s19 + $0x1d0] sm:$0xff] }
 0x103   : > { %2304 = vperm.xlu2 %2958, %v1447_v61   ;;  %v3186_v1 = vpop.eup %3185  ;;  %2644 = vst.msk [vmem:[%s4118_s22 + $0x108] sm:$0xff] %vm2611_vm4, %v2475_v42  ;;  %3193 = vpow2.f32 %v2921_v58  ;;  %v1415_v10 = vand.u32 2147483648, %v4854_v22  ;;  %vm1409_vm0 = vweird.f32 %v4854_v22  ;;  %v4903_v12 = vmul.f32 -1.442695, %v238_v57  ;;  %v2115_v61 = vpop.permute.xlu0 %2114 }
 0x104   : > { %v1423_v5 = vadd.f32 %v4821_v31, %v1422_v27  ;;  %v3188_v55 = vpop.eup %3187  ;;  %v4885_v8 = vadd.f32 1.0, %v3186_v1  ;;  %2641 = vst [vmem:[%s4118_s22 + $0xf0] sm:$0xff] %v2472_v54  ;;  %3195 = vpow2.f32 %v2920_v59  ;;  %v4908_v53 = vmul.f32 -1.442695, %v237_v6 }
 0x105   : > { %v3190_v63 = vpop.eup %3189  ;;  %v4894_v11 = vadd.f32 1.0, %v3188_v55  ;;  %2642 = vst.msk [vmem:[%s4118_s22 + $0xf8] sm:$0xff] %vm2611_vm4, %v2473_v35  ;;  %3197 = vpow2.f32 %v2919_v0  ;;  %vm4910_vm7 = vcmp.eq.f32.partialorder %v1413_v7, 8.507059e+37  ;;  %v2500_v14 = vmul.f32 %v2170_v13, %v1912_v56  ;;  %v2185_v38 = vpop.permute.xlu2 %2184 }
 0x106   : > { %v1427_v9 = vsel %vm4867_vm3, %v4821_v31, %v1423_v5  ;;  %3199 = vrcp.f32 %v4885_v8  ;;  %v1488_v20 = vand.u32 2147483647, %v4885_v8  ;;  %v1490_v2 = vand.u32 2147483648, %v4885_v8  ;;  %v4922_v31 = vpop.permute.xlu1 %2119 }
 0x107   : > { %v1432_v16 = vsel %vm4876_vm11, %v1431_v4, %v1427_v9  ;;  %3201 = vrcp.f32 %v4894_v11  ;;  %v1473_v17 = vand.u32 2147483647, %v4894_v11  ;;  %v4915_v25 = vadd.f32 1.0, %v3190_v63  ;;  %2669 = vst [vmem:[%s4118_s22 + $0x1d0] sm:$0xff] %v2500_v14 }
 0x108   : > { %2299 = vperm.xlu1 %2957, %v1432_v16   ;;  %v3192_v48 = vpop.eup %3191  ;;  %v1416_v28 = vor.u32 1.1754944e-38, %v1415_v10  ;;  %vm1484_vm5 = vweird.f32 %v4885_v8  ;;  %v1475_v19 = vand.u32 2147483648, %v4894_v11  ;;  %v4924_v33 = vor.u32 1.1754944e-38, %v1490_v2  ;;  %v1893_v2 = vld [vmem:[%s4063_s19 + $0x138] sm:$0xff] }
 0x109   : > { %v3194_v18 = vpop.eup %3193  ;;  %v1405_v23 = vmul.f32 %v3192_v48, %v4854_v22  ;;  %vm1410_vm8 = vweird.f32 %v3192_v48  ;;  %vm1469_vm10 = vweird.f32 %v4894_v11  ;;  %3203 = vrcp.f32 %v4915_v25 }
 0x10a   : > { %v3196_v32 = vpop.eup %3195  ;;  %vm4929_vm9 = vcmp.eq.f32.partialorder %v1488_v20, 8.507059e+37  ;;  %v1458_v49 = vand.u32 2147483647, %v4915_v25  ;;  %v1460_v39 = vand.u32 2147483648, %v4915_v25  ;;  %v4935_v40 = vadd.f32 1.0, %v3194_v18  ;;  %vm4949_vm13 = vmor %vm1409_vm0, %vm1410_vm8 }
 0x10b   : > { %v3198_v24 = vpop.eup %3197  ;;  %v1406_v3 = vsub.f32 1.0, %v1405_v23  ;;  %vm4937_vm12 = vcmp.eq.f32.partialorder %v1473_v17, 8.507059e+37  ;;  %v4941_v45 = vadd.f32 1.0, %v3196_v32  ;;  %v2501_v37 = vmul.f32 %v2170_v13, %v1913_v21 }
 0x10c   : > { %v3200_v34 = vpop.eup %3199  ;;  %v2480_v43 = vmul.f32 %v4922_v31, %v1892_v30  ;;  %v1476_v26 = vor.u32 1.1754944e-38, %v1475_v19  ;;  %vm1454_vm14 = vweird.f32 %v4915_v25  ;;  %3205 = vrcp.f32 %v4935_v40 }
 0x10d   : > { %v3202_v46 = vpop.eup %3201  ;;  %v1407_v15 = vmul.f32 %v3192_v48, %v1406_v3  ;;  %v1480_v29 = vmul.f32 %v3200_v34, %v4885_v8  ;;  %vm1485_vm6 = vweird.f32 %v3200_v34  ;;  %v4955_v42 = vadd.f32 1.0, %v3198_v24  ;;  %2670 = vst.msk [vmem:[%s4118_s22 + $0x1d8] sm:$0xff] %vm2611_vm4, %v2501_v37  ;;  %v1918_v3 = vld [vmem:[%s4063_s19 + $0x200] sm:$0xff] }
 0x10e   : > { %v1465_v52 = vmul.f32 %v3202_v46, %v4894_v11  ;;  %vm4959_vm15 = vcmp.eq.f32.partialorder %v1458_v49, 8.507059e+37  ;;  %v4963_v22 = vor.u32 1.1754944e-38, %v1460_v39  ;;  %v1533_v59 = vand.u32 2147483647, %v4935_v40  ;;  %2649 = vst [vmem:[%s4118_s22 + $0x130] sm:$0xff] %v2480_v43  ;;  %vm4981_vm2 = vmor %vm1484_vm5, %vm1485_vm6  ;;  %v2135_v49 = vpop.permute.xlu1 %2134  ;;  %v1919_v43 = vld [vmem:[%s4063_s19 + $0x208] sm:$0xff] }
 0x10f   : > { %v1408_v54 = vadd.f32 %v3192_v48, %v1407_v15  ;;  %v1481_v41 = vsub.f32 1.0, %v1480_v29  ;;  %v4967_v27 = vpop.eup %3203  ;;  %vm1470_vm1 = vweird.f32 %v3202_v46  ;;  %v1535_v0 = vand.u32 2147483648, %v4935_v40  ;;  %v1899_v15 = vld [vmem:[%s4063_s19 + $0x168] sm:$0xff] }
 0x110   : > { %v1466_v35 = vsub.f32 1.0, %v1465_v52  ;;  %3207 = vrcp.f32 %v4941_v45  ;;  %v1450_v4 = vmul.f32 %v4967_v27, %v4915_v25  ;;  %v1518_v1 = vand.u32 2147483647, %v4941_v45  ;;  %vm4989_vm0 = vmor %vm1469_vm10, %vm1470_vm1 }
 0x111   : > { %v1412_v62 = vsel %vm4949_vm13, %v3192_v48, %v1408_v54  ;;  %v1482_v60 = vmul.f32 %v3200_v34, %v1481_v41  ;;  %vm1529_vm3 = vweird.f32 %v4935_v40  ;;  %vm1514_vm11 = vweird.f32 %v4941_v45  ;;  %v1890_v48 = vld [vmem:[%s4063_s19 + $0x120] sm:$0xff] }
 0x112   : > { %v1417_v5 = vsel %vm4910_vm7, %v1416_v28, %v1412_v62  ;;  %v1467_v57 = vmul.f32 %v3202_v46, %v1466_v35  ;;  %v1451_v7 = vsub.f32 1.0, %v1450_v4  ;;  %vm1455_vm7 = vweird.f32 %v4967_v27  ;;  %v4998_v63 = vpop.eup %3205  ;;  %v1891_v28 = vld [vmem:[%s4063_s19 + $0x128] sm:$0xff]  ;;  %v241_v62 = vld [vmem:[%s3333_s15 + $0x218] sm:$0xff] }
 0x113   : > { %2294 = vperm.xlu0 %2956, %v1417_v5   ;;  %v1483_v6 = vadd.f32 %v3200_v34, %v1482_v60  ;;  %vm4994_vm5 = vcmp.eq.f32.partialorder %v1533_v59, 8.507059e+37  ;;  %v5000_v10 = vor.u32 1.1754944e-38, %v1535_v0  ;;  %v1520_v11 = vand.u32 2147483648, %v4941_v45  ;;  %vm5027_vm13 = vmor %vm1454_vm14, %vm1455_vm7  ;;  %v1897_v59 = vld [vmem:[%s4063_s19 + $0x158] sm:$0xff]  ;;  %v240_v60 = vld [vmem:[%s3333_s15 + $0x210] sm:$0xff] }
 0x114   : > { %v1468_v9 = vadd.f32 %v3202_v46, %v1467_v57  ;;  %3209 = vrcp.f32 %v4955_v42  ;;  %v1452_v13 = vmul.f32 %v4967_v27, %v1451_v7  ;;  %v1525_v16 = vmul.f32 %v4998_v63, %v4935_v40 }
 0x115   : > { %v1487_v56 = vsel %vm4981_vm2, %v3200_v34, %v1483_v6  ;;  %vm5009_vm8 = vcmp.eq.f32.partialorder %v1518_v1, 8.507059e+37  ;;  %vm1499_vm10 = vweird.f32 %v4955_v42  ;;  %vm1530_vm6 = vweird.f32 %v4998_v63 }
 0x116   : > { %v5016_v50 = vpop.eup %3207  ;;  %v1492_v17 = vsel %vm4929_vm9, %v4924_v33, %v1487_v56  ;;  %v1472_v14 = vsel %vm4989_vm0, %v3202_v46, %v1468_v9  ;;  %v1503_v23 = vand.u32 2147483647, %v4955_v42  ;;  %v1453_v21 = vadd.f32 %v4967_v27, %v1452_v13  ;;  %v1898_v46 = vld [vmem:[%s4063_s19 + $0x160] sm:$0xff]  ;;  %v1924_v56 = vld [vmem:[%s4063_s19 + $0x230] sm:$0xff]  ;;  %v1925_v13 = vld [vmem:[%s4063_s19 + $0x238] sm:$0xff]  ;;  %v2150_v20 = vpop.permute.xlu1 %2149 }
 0x117   : > { %2319 = vperm.xlu2 %2958, %v1492_v17   ;;  %v1477_v19 = vsel %vm4937_vm12, %v1476_v26, %v1472_v14  ;;  %v1526_v30 = vsub.f32 1.0, %v1525_v16  ;;  %v1510_v25 = vmul.f32 %v5016_v50, %v4941_v45  ;;  %vm1515_vm9 = vweird.f32 %v5016_v50  ;;  %vm5058_vm12 = vmor %vm1529_vm3, %vm1530_vm6  ;;  %v2200_v16 = vpop.permute.xlu2 %2199  ;;  %v1905_v17 = vld [vmem:[%s4063_s19 + $0x198] sm:$0xff] }
 0x118   : > { %2314 = vperm.xlu1 %2957, %v1477_v19   ;;  %v1521_v32 = vor.u32 1.1754944e-38, %v1520_v11  ;;  %v2481_v33 = vmul.f32 %v4922_v31, %v1893_v2  ;;  %v2478_v24 = vmul.f32 %v2115_v61, %v1890_v48  ;;  %v1457_v39 = vsel %vm5027_vm13, %v4967_v27, %v1453_v21  ;;  %v2130_v31 = vpop.permute.xlu0 %2129  ;;  %v1904_v2 = vld [vmem:[%s4063_s19 + $0x190] sm:$0xff]  ;;  %v245_v14 = vld [vmem:[%s3333_s15 + $0x238] sm:$0xff]  ;;  %v1902_v21 = vld [vmem:[%s4063_s19 + $0x180] sm:$0xff] }
 0x119   : > { %v1527_v34 = vmul.f32 %v4998_v63, %v1526_v30  ;;  %v1511_v44 = vsub.f32 1.0, %v1510_v25  ;;  %v2479_v37 = vmul.f32 %v2115_v61, %v1891_v28  ;;  %v1462_v26 = vsel %vm4959_vm15, %v4963_v22, %v1457_v39  ;;  %v1896_v22 = vld [vmem:[%s4063_s19 + $0x150] sm:$0xff]  ;;  %v242_v61 = vld [vmem:[%s3333_s15 + $0x220] sm:$0xff]  ;;  %vm5079_vm15 = vmor %vm1514_vm11, %vm1515_vm9 }
 0x11a   : > { %v5049_v29 = vpop.eup %3209  ;;  %v1505_v52 = vand.u32 2147483648, %v4955_v42  ;;  %2650 = vst.msk [vmem:[%s4118_s22 + $0x138] sm:$0xff] %vm2611_vm4, %v2481_v33  ;;  %3211 = vpow2.f32 %v4888_v36  ;;  %v2506_v54 = vmul.f32 %v2185_v38, %v1918_v3  ;;  %v2507_v27 = vmul.f32 %v2185_v38, %v1919_v43  ;;  %v1903_v30 = vld [vmem:[%s4063_s19 + $0x188] sm:$0xff] }
 0x11b   : > { %2309 = vperm.xlu0 %2956, %v1462_v26   ;;  %v1528_v41 = vadd.f32 %v4998_v63, %v1527_v34  ;;  %v1512_v58 = vmul.f32 %v5016_v50, %v1511_v44  ;;  %v1495_v40 = vmul.f32 %v5049_v29, %v4955_v42  ;;  %vm1500_vm14 = vweird.f32 %v5049_v29  ;;  %2647 = vst [vmem:[%s4118_s22 + $0x120] sm:$0xff] %v2478_v24 }
 0x11c   : > { %2648 = vst.msk [vmem:[%s4118_s22 + $0x128] sm:$0xff] %vm2611_vm4, %v2479_v37  ;;  %3213 = vpow2.f32 %v4903_v12  ;;  %v2486_v35 = vmul.f32 %v2135_v49, %v1898_v46  ;;  %v2487_v0 = vmul.f32 %v2135_v49, %v1899_v15  ;;  %v2484_v5 = vmul.f32 %v2130_v31, %v1896_v22  ;;  %vm5107_vm1 = vmor %vm1499_vm10, %vm1500_vm14 }
 0x11d   : > { %v1532_v4 = vsel %vm5058_vm12, %v4998_v63, %v1528_v41  ;;  %v1513_v45 = vadd.f32 %v5016_v50, %v1512_v58  ;;  %v1496_v1 = vsub.f32 1.0, %v1495_v40  ;;  %3215 = vpow2.f32 %v4908_v53  ;;  %2675 = vst [vmem:[%s4118_s22 + $0x200] sm:$0xff] %v2506_v54 }
 0x11e   : > { %v1537_v12 = vsel %vm4994_vm5, %v5000_v10, %v1532_v4  ;;  %2676 = vst.msk [vmem:[%s4118_s22 + $0x208] sm:$0xff] %vm2611_vm4, %v2507_v27  ;;  %v2485_v47 = vmul.f32 %v2130_v31, %v1897_v59  ;;  %v2927_v57 = vmul.f32 -1.442695, %v242_v61  ;;  %v2926_v7 = vmul.f32 -1.442695, %v241_v62  ;;  %v244_v61 = vld [vmem:[%s3333_s15 + $0x230] sm:$0xff] }
 0x11f   : > { %2334 = vperm.xlu2 %2958, %v1537_v12   ;;  %v1517_v6 = vsel %vm5079_vm15, %v5016_v50, %v1513_v45  ;;  %v1497_v53 = vmul.f32 %v5049_v29, %v1496_v1  ;;  %2655 = vst [vmem:[%s4118_s22 + $0x160] sm:$0xff] %v2486_v35  ;;  %v2925_v8 = vmul.f32 -1.442695, %v240_v60  ;;  %vm5116_vm2 = vcmp.eq.f32.partialorder %v1503_v23, 8.507059e+37  ;;  %v248_v4 = vld [vmem:[%s3333_s15 + $0x250] sm:$0xff] }
 0x120   : > { %v3212_v63 = vpop.eup %3211  ;;  %v1522_v9 = vsel %vm5009_vm8, %v1521_v32, %v1517_v6  ;;  %v1506_v11 = vor.u32 1.1754944e-38, %v1505_v52  ;;  %2656 = vst.msk [vmem:[%s4118_s22 + $0x168] sm:$0xff] %vm2611_vm4, %v2487_v0  ;;  %3217 = vpow2.f32 %v2927_v57  ;;  %v2512_v50 = vmul.f32 %v2200_v16, %v1924_v56  ;;  %v2145_v25 = vpop.permute.xlu0 %2144 }
 0x121   : > { %2329 = vperm.xlu1 %2957, %v1522_v9   ;;  %v1498_v42 = vadd.f32 %v5049_v29, %v1497_v53  ;;  %v5126_v48 = vadd.f32 1.0, %v3212_v63  ;;  %2653 = vst [vmem:[%s4118_s22 + $0x150] sm:$0xff] %v2484_v5  ;;  %3219 = vpow2.f32 %v2926_v7  ;;  %v2513_v23 = vmul.f32 %v2200_v16, %v1925_v13  ;;  %v246_v63 = vld [vmem:[%s3333_s15 + $0x240] sm:$0xff] }
 0x122   : > { %v3214_v18 = vpop.eup %3213  ;;  %2654 = vst.msk [vmem:[%s4118_s22 + $0x158] sm:$0xff] %vm2611_vm4, %v2485_v47  ;;  %3221 = vpow2.f32 %v2925_v8  ;;  %v2492_v28 = vmul.f32 %v2150_v20, %v1904_v2  ;;  %v2493_v19 = vmul.f32 %v2150_v20, %v1905_v17  ;;  %v2930_v49 = vmul.f32 -1.442695, %v245_v14 }
 0x123   : > { %v3216_v32 = vpop.eup %3215  ;;  %v1502_v33 = vsel %vm5107_vm1, %v5049_v29, %v1498_v42  ;;  %3223 = vrcp.f32 %v5126_v48  ;;  %2681 = vst [vmem:[%s4118_s22 + $0x230] sm:$0xff] %v2512_v50  ;;  %v5142_v3 = vadd.f32 1.0, %v3214_v18  ;;  %v1578_v39 = vand.u32 2147483647, %v5126_v48 }
 0x124   : > { %v1507_v24 = vsel %vm5116_vm2, %v1506_v11, %v1502_v33  ;;  %v5144_v38 = vadd.f32 1.0, %v3216_v32  ;;  %2682 = vst.msk [vmem:[%s4118_s22 + $0x238] sm:$0xff] %vm2611_vm4, %v2513_v23  ;;  %v1580_v34 = vand.u32 2147483648, %v5126_v48  ;;  %v2490_v44 = vmul.f32 %v2145_v25, %v1902_v21 }
 0x125   : > { %2324 = vperm.xlu0 %2956, %v1507_v24   ;;  %2661 = vst [vmem:[%s4118_s22 + $0x190] sm:$0xff] %v2492_v28  ;;  %v2491_v37 = vmul.f32 %v2145_v25, %v1903_v30  ;;  %3225 = vrcp.f32 %v5142_v3  ;;  %vm1574_vm3 = vweird.f32 %v5126_v48  ;;  %v1563_v15 = vand.u32 2147483647, %v5142_v3 }
 0x126   : > { %v3218_v43 = vpop.eup %3217  ;;  %2662 = vst.msk [vmem:[%s4118_s22 + $0x198] sm:$0xff] %vm2611_vm4, %v2493_v19  ;;  %v1565_v31 = vand.u32 2147483648, %v5142_v3  ;;  %3227 = vrcp.f32 %v5144_v38  ;;  %v1548_v26 = vand.u32 2147483647, %v5144_v38  ;;  %vm5166_vm11 = vcmp.eq.f32.partialorder %v1578_v39, 8.507059e+37 }
 0x127   : > { %v3220_v46 = vpop.eup %3219  ;;  %2659 = vst [vmem:[%s4118_s22 + $0x180] sm:$0xff] %v2490_v44  ;;  %v5160_v51 = vadd.f32 1.0, %v3218_v43  ;;  %3229 = vpow2.f32 %v2930_v49  ;;  %v1581_v58 = vor.u32 1.1754944e-38, %v1580_v34  ;;  %vm1559_vm0 = vweird.f32 %v5142_v3  ;;  %v243_v34 = vld [vmem:[%s3333_s15 + $0x228] sm:$0xff]  ;;  %v2215_v44 = vpop.permute.xlu2 %2214 }
 0x128   : > { %v3222_v29 = vpop.eup %3221  ;;  %v5162_v52 = vadd.f32 1.0, %v3220_v46  ;;  %2660 = vst.msk [vmem:[%s4118_s22 + $0x188] sm:$0xff] %vm2611_vm4, %v2491_v37  ;;  %v1550_v40 = vand.u32 2147483648, %v5144_v38  ;;  %v5173_v59 = vor.u32 1.1754944e-38, %v1565_v31  ;;  %vm1544_vm7 = vweird.f32 %v5144_v38  ;;  %v2165_v37 = vpop.permute.xlu1 %2164 }
 0x129   : > { %v3224_v54 = vpop.eup %3223  ;;  %3231 = vrcp.f32 %v5160_v51  ;;  %vm5178_vm5 = vcmp.eq.f32.partialorder %v1563_v15, 8.507059e+37  ;;  %v1623_v27 = vand.u32 2147483647, %v5160_v51  ;;  %v1625_v35 = vand.u32 2147483648, %v5160_v51  ;;  %v2160_v41 = vpop.permute.xlu0 %2159 }
 0x12a   : > { %v1570_v22 = vmul.f32 %v3224_v54, %v5126_v48  ;;  %3233 = vrcp.f32 %v5162_v52  ;;  %v5185_v0 = vadd.f32 1.0, %v3222_v29  ;;  %vm1575_vm8 = vweird.f32 %v3224_v54 }
 0x12b   : > { %v3226_v62 = vpop.eup %3225  ;;  %vm5187_vm10 = vcmp.eq.f32.partialorder %v1548_v26, 8.507059e+37  ;;  %v1608_v45 = vand.u32 2147483647, %v5162_v52  ;;  %v1610_v1 = vand.u32 2147483648, %v5162_v52  ;;  %v1551_v47 = vor.u32 1.1754944e-38, %v1550_v40  ;;  %vm5201_vm12 = vmor %vm1574_vm3, %vm1575_vm8  ;;  %v1930_v26 = vld [vmem:[%s4063_s19 + $0x260] sm:$0xff] }
 0x12c   : > { %v1571_v60 = vsub.f32 1.0, %v1570_v22  ;;  %v3228_v12 = vpop.eup %3227  ;;  %v1555_v5 = vmul.f32 %v3226_v62, %v5142_v3  ;;  %vm1619_vm13 = vweird.f32 %v5160_v51  ;;  %v5195_v57 = vmul.f32 -1.442695, %v244_v61 }
 0x12d   : > { %v3230_v6 = vpop.eup %3229  ;;  %vm1560_vm6 = vweird.f32 %v3226_v62  ;;  %v1540_v55 = vmul.f32 %v3228_v12, %v5144_v38  ;;  %vm1604_vm9 = vweird.f32 %v5162_v52  ;;  %vm1545_vm14 = vweird.f32 %v3228_v12 }
 0x12e   : > { %v1572_v53 = vmul.f32 %v3224_v54, %v1571_v60  ;;  %v1556_v8 = vsub.f32 1.0, %v1555_v5  ;;  %vm5205_vm15 = vcmp.eq.f32.partialorder %v1623_v27, 8.507059e+37  ;;  %v5209_v9 = vor.u32 1.1754944e-38, %v1625_v35  ;;  %vm5233_vm2 = vmor %vm1559_vm0, %vm1560_vm6  ;;  %v1911_v60 = vld [vmem:[%s4063_s19 + $0x1c8] sm:$0xff] }
 0x12f   : > { %3235 = vrcp.f32 %v5185_v0  ;;  %v5212_v10 = vpop.eup %3231  ;;  %v1541_v56 = vsub.f32 1.0, %v1540_v55  ;;  %vm5214_vm1 = vcmp.eq.f32.partialorder %v1608_v45, 8.507059e+37  ;;  %v5218_v16 = vor.u32 1.1754944e-38, %v1610_v1  ;;  %vm5245_vm8 = vmor %vm1544_vm7, %vm1545_vm14 }
 0x130   : > { %v1573_v11 = vadd.f32 %v3224_v54, %v1572_v53  ;;  %v1593_v2 = vand.u32 2147483647, %v5185_v0  ;;  %v5221_v20 = vpop.eup %3233  ;;  %v1557_v42 = vmul.f32 %v3226_v62, %v1556_v8  ;;  %v1615_v48 = vmul.f32 %v5212_v10, %v5160_v51  ;;  %v247_v53 = vld [vmem:[%s3333_s15 + $0x248] sm:$0xff] }
 0x131   : > { %v1595_v50 = vand.u32 2147483648, %v5185_v0  ;;  %v5226_v17 = vadd.f32 1.0, %v3230_v6  ;;  %v1542_v23 = vmul.f32 %v3228_v12, %v1541_v56  ;;  %v1600_v28 = vmul.f32 %v5221_v20, %v5162_v52  ;;  %v1909_v6 = vld [vmem:[%s4063_s19 + $0x1b8] sm:$0xff] }
 0x132   : > { %v1577_v14 = vsel %vm5201_vm12, %v3224_v54, %v1573_v11  ;;  %vm1589_vm3 = vweird.f32 %v5185_v0  ;;  %v1558_v21 = vadd.f32 %v3226_v62, %v1557_v42  ;;  %v1616_v25 = vsub.f32 1.0, %v1615_v48  ;;  %v1931_v54 = vld [vmem:[%s4063_s19 + $0x268] sm:$0xff]  ;;  %v1937_v42 = vld [vmem:[%s4063_s19 + $0x298] sm:$0xff]  ;;  %v2230_v48 = vpop.permute.xlu2 %2229 }
 0x133   : > { %v1582_v19 = vsel %vm5166_vm11, %v1581_v58, %v1577_v14  ;;  %vm1620_vm0 = vweird.f32 %v5212_v10  ;;  %v1543_v32 = vadd.f32 %v3228_v12, %v1542_v23  ;;  %v1601_v33 = vsub.f32 1.0, %v1600_v28  ;;  %v2180_v14 = vpop.permute.xlu1 %2179 }
 0x134   : > { %2349 = vperm.xlu2 %2958, %v1582_v19   ;;  %vm1605_vm6 = vweird.f32 %v5221_v20  ;;  %3237 = vrcp.f32 %v5226_v17  ;;  %v1562_v3 = vsel %vm5233_vm2, %v3226_v62, %v1558_v21  ;;  %v1617_v38 = vmul.f32 %v5212_v10, %v1616_v25  ;;  %vm5273_vm7 = vmor %vm1619_vm13, %vm1620_vm0  ;;  %v1910_v62 = vld [vmem:[%s4063_s19 + $0x1c0] sm:$0xff]  ;;  %v1917_v21 = vld [vmem:[%s4063_s19 + $0x1f8] sm:$0xff] }
 0x135   : > { %v5252_v24 = vpop.eup %3235  ;;  %vm5257_vm11 = vcmp.eq.f32.partialorder %v1593_v2, 8.507059e+37  ;;  %v5261_v39 = vor.u32 1.1754944e-38, %v1595_v50  ;;  %v1567_v43 = vsel %vm5178_vm5, %v5173_v59, %v1562_v3  ;;  %v1547_v46 = vsel %vm5245_vm8, %v3228_v12, %v1543_v32  ;;  %vm5289_vm5 = vmor %vm1604_vm9, %vm1605_vm6  ;;  %v1916_v50 = vld [vmem:[%s4063_s19 + $0x1f0] sm:$0xff]  ;;  %v251_v3 = vld [vmem:[%s3333_s15 + $0x268] sm:$0xff] }
 0x136   : > { %v1602_v31 = vmul.f32 %v5221_v20, %v1601_v33  ;;  %v1585_v29 = vmul.f32 %v5252_v24, %v5185_v0  ;;  %2344 = vperm.xlu1 %2957, %v1567_v43   ;;  %v1552_v58 = vsel %vm5187_vm10, %v1551_v47, %v1547_v46  ;;  %v1618_v51 = vadd.f32 %v5212_v10, %v1617_v38  ;;  %v1914_v33 = vld [vmem:[%s4063_s19 + $0x1e0] sm:$0xff] }
 0x137   : > { %vm1664_vm13 = vweird.f32 %v5226_v17  ;;  %v1668_v22 = vand.u32 2147483647, %v5226_v17  ;;  %2339 = vperm.xlu0 %2956, %v1552_v58   ;;  %vm1590_vm10 = vweird.f32 %v5252_v24  ;;  %3239 = vpow2.f32 %v5195_v57  ;;  %v1908_v57 = vld [vmem:[%s4063_s19 + $0x1b0] sm:$0xff] }
 0x138   : > { %v1603_v59 = vadd.f32 %v5221_v20, %v1602_v31  ;;  %v1586_v61 = vsub.f32 1.0, %v1585_v29  ;;  %v1622_v52 = vsel %vm5273_vm7, %v5212_v10, %v1618_v51  ;;  %v2928_v36 = vmul.f32 -1.442695, %v243_v34  ;;  %vm5324_vm9 = vmor %vm1589_vm3, %vm1590_vm10 }
 0x139   : > { %v2518_v27 = vmul.f32 %v2215_v44, %v1930_v26  ;;  %v2519_v35 = vmul.f32 %v2215_v44, %v1931_v54  ;;  %v1627_v1 = vsel %vm5205_vm15, %v5209_v9, %v1622_v52  ;;  %v1670_v47 = vand.u32 2147483648, %v5226_v17  ;;  %v1915_v44 = vld [vmem:[%s4063_s19 + $0x1e8] sm:$0xff] }
 0x13a   : > { %v5304_v45 = vpop.eup %3237  ;;  %v1607_v12 = vsel %vm5289_vm5, %v5221_v20, %v1603_v59  ;;  %v1587_v5 = vmul.f32 %v5252_v24, %v1586_v61  ;;  %3241 = vpow2.f32 %v2928_v36  ;;  %v2498_v0 = vmul.f32 %v2165_v37, %v1910_v62  ;;  %v1936_v20 = vld [vmem:[%s4063_s19 + $0x290] sm:$0xff]  ;;  %v249_v36 = vld [vmem:[%s3333_s15 + $0x258] sm:$0xff] }
 0x13b   : > { %v1612_v55 = vsel %vm5214_vm1, %v5218_v16, %v1607_v12  ;;  %v1660_v8 = vmul.f32 %v5304_v45, %v5226_v17  ;;  %vm1665_vm12 = vweird.f32 %v5304_v45  ;;  %2687 = vst [vmem:[%s4118_s22 + $0x260] sm:$0xff] %v2518_v27  ;;  %v2499_v10 = vmul.f32 %v2165_v37, %v1911_v60  ;;  %v250_v37 = vld [vmem:[%s3333_s15 + $0x260] sm:$0xff] }
 0x13c   : > { %2364 = vperm.xlu2 %2958, %v1627_v1   ;;  %v1588_v9 = vadd.f32 %v5252_v24, %v1587_v5  ;;  %2688 = vst.msk [vmem:[%s4118_s22 + $0x268] sm:$0xff] %vm2611_vm4, %v2519_v35  ;;  %v2933_v11 = vmul.f32 -1.442695, %v248_v4  ;;  %v2496_v13 = vmul.f32 %v2160_v41, %v1908_v57  ;;  %v2497_v16 = vmul.f32 %v2160_v41, %v1909_v6  ;;  %vm5358_vm14 = vmor %vm1664_vm13, %vm1665_vm12  ;;  %v254_v60 = vld [vmem:[%s3333_s15 + $0x280] sm:$0xff]  ;;  %v1923_v6 = vld [vmem:[%s4063_s19 + $0x228] sm:$0xff] }
 0x13d   : > { %v1661_v56 = vsub.f32 1.0, %v1660_v8  ;;  %v2932_v2 = vmul.f32 -1.442695, %v247_v53  ;;  %v3240_v18 = vpop.eup %3239  ;;  %2667 = vst [vmem:[%s4118_s22 + $0x1c0] sm:$0xff] %v2498_v0  ;;  %v2931_v28 = vmul.f32 -1.442695, %v246_v63  ;;  %v2524_v19 = vmul.f32 %v2230_v48, %v1936_v20 }
 0x13e   : > { %v1592_v23 = vsel %vm5324_vm9, %v5252_v24, %v1588_v9  ;;  %3243 = vpow2.f32 %v2933_v11  ;;  %2359 = vperm.xlu1 %2957, %v1612_v55   ;;  %v5348_v32 = vadd.f32 1.0, %v3240_v18  ;;  %2668 = vst.msk [vmem:[%s4118_s22 + $0x1c8] sm:$0xff] %vm2611_vm4, %v2499_v10  ;;  %v2175_v24 = vpop.permute.xlu0 %2174  ;;  %v1671_v49 = vor.u32 1.1754944e-38, %v1670_v47  ;;  %v1942_v35 = vld [vmem:[%s4063_s19 + $0x2c0] sm:$0xff] }
 0x13f   : > { %v1597_v30 = vsel %vm5257_vm11, %v5261_v39, %v1592_v23  ;;  %v1662_v25 = vmul.f32 %v5304_v45, %v1661_v56  ;;  %3245 = vpow2.f32 %v2932_v2  ;;  %2665 = vst [vmem:[%s4118_s22 + $0x1b0] sm:$0xff] %v2496_v13  ;;  %v2525_v39 = vmul.f32 %v2230_v48, %v1937_v42 }
 0x140   : > { %2354 = vperm.xlu0 %2956, %v1597_v30   ;;  %3247 = vpow2.f32 %v2931_v28  ;;  %v2504_v34 = vmul.f32 %v2180_v14, %v1916_v50  ;;  %v3242_v43 = vpop.eup %3241  ;;  %vm1669_vm15 = vcmp.eq.f32.partialorder %v1668_v22, 8.507059e+37  ;;  %2666 = vst.msk [vmem:[%s4118_s22 + $0x1b8] sm:$0xff] %vm2611_vm4, %v2497_v16  ;;  %v2505_v15 = vmul.f32 %v2180_v14, %v1917_v21 }
 0x141   : > { %v1663_v46 = vadd.f32 %v5304_v45, %v1662_v25  ;;  %3249 = vrcp.f32 %v5348_v32  ;;  %v1653_v31 = vand.u32 2147483647, %v5348_v32  ;;  %v1655_v29 = vand.u32 2147483648, %v5348_v32  ;;  %2693 = vst [vmem:[%s4118_s22 + $0x290] sm:$0xff] %v2524_v19 }
 0x142   : > { %v5373_v26 = vadd.f32 1.0, %v3242_v43  ;;  %v2502_v54 = vmul.f32 %v2175_v24, %v1914_v33  ;;  %2694 = vst.msk [vmem:[%s4118_s22 + $0x298] sm:$0xff] %vm2611_vm4, %v2525_v39  ;;  %v2503_v41 = vmul.f32 %v2175_v24, %v1915_v44  ;;  %v2936_v58 = vmul.f32 -1.442695, %v251_v3  ;;  %v2245_v39 = vpop.permute.xlu2 %2244 }
 0x143   : > { %v1667_v17 = vsel %vm5358_vm14, %v5304_v45, %v1663_v46  ;;  %v2935_v51 = vmul.f32 -1.442695, %v250_v37  ;;  %2673 = vst [vmem:[%s4118_s22 + $0x1f0] sm:$0xff] %v2504_v34  ;;  %vm1649_vm1 = vweird.f32 %v5348_v32  ;;  %vm5390_vm2 = vcmp.eq.f32.partialorder %v1653_v31, 8.507059e+37  ;;  %v2195_v34 = vpop.permute.xlu1 %2194 }
 0x144   : > { %v3244_v40 = vpop.eup %3243  ;;  %v1672_v22 = vsel %vm1669_vm15, %v1671_v49, %v1667_v17  ;;  %3251 = vrcp.f32 %v5373_v26  ;;  %v1638_v61 = vand.u32 2147483647, %v5373_v26  ;;  %2674 = vst.msk [vmem:[%s4118_s22 + $0x1f8] sm:$0xff] %vm2611_vm4, %v2505_v15  ;;  %v1656_v45 = vor.u32 1.1754944e-38, %v1655_v29 }
 0x145   : > { %v3246_v59 = vpop.eup %3245  ;;  %2379 = vperm.xlu2 %2958, %v1672_v22   ;;  %v5384_v52 = vadd.f32 1.0, %v3244_v40  ;;  %3253 = vpow2.f32 %v2936_v58  ;;  %2671 = vst [vmem:[%s4118_s22 + $0x1e0] sm:$0xff] %v2502_v54  ;;  %vm1634_vm3 = vweird.f32 %v5373_v26  ;;  %v1640_v1 = vand.u32 2147483648, %v5373_v26 }
 0x146   : > { %v3248_v27 = vpop.eup %3247  ;;  %v5394_v62 = vadd.f32 1.0, %v3246_v59  ;;  %3255 = vpow2.f32 %v2935_v51  ;;  %2672 = vst.msk [vmem:[%s4118_s22 + $0x1e8] sm:$0xff] %vm2611_vm4, %v2503_v41  ;;  %v5406_v57 = vmul.f32 -1.442695, %v249_v36  ;;  %vm5408_vm0 = vcmp.eq.f32.partialorder %v1638_v61, 8.507059e+37  ;;  %v5472_v31 = vpop.permute.xlu0 %2189 }
 0x147   : > { %v3250_v4 = vpop.eup %3249  ;;  %3257 = vrcp.f32 %v5384_v52  ;;  %v1713_v5 = vand.u32 2147483647, %v5384_v52  ;;  %v1715_v47 = vand.u32 2147483648, %v5384_v52  ;;  %v5413_v53 = vmul.f32 -1.442695, %v254_v60  ;;  %v1943_v60 = vld [vmem:[%s4063_s19 + $0x2c8] sm:$0xff] }
 0x148   : > { %v1645_v12 = vmul.f32 %v3250_v4, %v5348_v32  ;;  %vm1650_vm8 = vweird.f32 %v3250_v4  ;;  %3259 = vrcp.f32 %v5394_v62  ;;  %v1698_v8 = vand.u32 2147483647, %v5394_v62 }
 0x149   : > { %v1700_v63 = vand.u32 2147483648, %v5394_v62  ;;  %v5417_v9 = vadd.f32 1.0, %v3248_v27  ;;  %v1641_v11 = vor.u32 1.1754944e-38, %v1640_v1  ;;  %vm1709_vm6 = vweird.f32 %v5384_v52  ;;  %vm5430_vm13 = vmor %vm1649_vm1, %vm1650_vm8 }
 0x14a   : > { %v3252_v55 = vpop.eup %3251  ;;  %v1646_v7 = vsub.f32 1.0, %v1645_v12  ;;  %vm1694_vm11 = vweird.f32 %v5394_v62  ;;  %vm5422_vm5 = vcmp.eq.f32.partialorder %v1713_v5, 8.507059e+37  ;;  %v1716_v2 = vor.u32 1.1754944e-38, %v1715_v47 }
 0x14b   : > { %v3254_v0 = vpop.eup %3253  ;;  %v1630_v10 = vmul.f32 %v3252_v55, %v5373_v26  ;;  %vm1635_vm7 = vweird.f32 %v3252_v55  ;;  %3261 = vrcp.f32 %v5417_v9  ;;  %v1683_v50 = vand.u32 2147483647, %v5417_v9  ;;  %v2210_v19 = vpop.permute.xlu1 %2209 }
 0x14c   : > { %v3256_v56 = vpop.eup %3255  ;;  %v1647_v13 = vmul.f32 %v3250_v4, %v1646_v7  ;;  %v1685_v14 = vand.u32 2147483648, %v5417_v9  ;;  %v5436_v18 = vadd.f32 1.0, %v3254_v0  ;;  %vm5439_vm10 = vcmp.eq.f32.partialorder %v1698_v8, 8.507059e+37  ;;  %vm5456_vm14 = vmor %vm1634_vm3, %vm1635_vm7 }
 0x14d   : > { %v3258_v20 = vpop.eup %3257  ;;  %v1631_v48 = vsub.f32 1.0, %v1630_v10  ;;  %v5443_v21 = vor.u32 1.1754944e-38, %v1700_v63  ;;  %v5445_v30 = vadd.f32 1.0, %v3256_v56  ;;  %vm1679_vm12 = vweird.f32 %v5417_v9  ;;  %v1921_v56 = vld [vmem:[%s4063_s19 + $0x218] sm:$0xff] }
 0x14e   : > { %v1648_v23 = vadd.f32 %v3250_v4, %v1647_v13  ;;  %v1705_v28 = vmul.f32 %v3258_v20, %v5384_v52  ;;  %v5447_v25 = vpop.eup %3259  ;;  %vm1710_vm9 = vweird.f32 %v3258_v20  ;;  %3263 = vrcp.f32 %v5436_v18 }
 0x14f   : > { %v1632_v32 = vmul.f32 %v3252_v55, %v1631_v48  ;;  %v1690_v38 = vmul.f32 %v5447_v25, %v5394_v62  ;;  %v5462_v49 = vor.u32 1.1754944e-38, %v1685_v14  ;;  %vm5466_vm15 = vcmp.eq.f32.partialorder %v1683_v50, 8.507059e+37  ;;  %v252_v50 = vld [vmem:[%s3333_s15 + $0x270] sm:$0xff] }
 0x150   : > { %v1652_v33 = vsel %vm5430_vm13, %v3250_v4, %v1648_v23  ;;  %v1706_v3 = vsub.f32 1.0, %v1705_v28  ;;  %v1758_v46 = vand.u32 2147483647, %v5436_v18  ;;  %v1760_v15 = vand.u32 2147483648, %v5436_v18  ;;  %v1948_v14 = vld [vmem:[%s4063_s19 + $0x2f0] sm:$0xff]  ;;  %v1949_v23 = vld [vmem:[%s4063_s19 + $0x2f8] sm:$0xff]  ;;  %v2260_v28 = vpop.permute.xlu2 %2259 }
 0x151   : > { %v1657_v44 = vsel %vm5390_vm2, %v1656_v45, %v1652_v33  ;;  %v1633_v37 = vadd.f32 %v3252_v55, %v1632_v32  ;;  %v5474_v29 = vpop.eup %3261  ;;  %v1691_v54 = vsub.f32 1.0, %v1690_v38  ;;  %vm1695_vm1 = vweird.f32 %v5447_v25  ;;  %vm5483_vm2 = vmor %vm1709_vm6, %vm1710_vm9  ;;  %v1932_v32 = vld [vmem:[%s4063_s19 + $0x270] sm:$0xff] }
 0x152   : > { %2374 = vperm.xlu1 %2957, %v1657_v44   ;;  %v1707_v26 = vmul.f32 %v3258_v20, %v1706_v3  ;;  %3265 = vrcp.f32 %v5445_v30  ;;  %v1675_v58 = vmul.f32 %v5474_v29, %v5417_v9  ;;  %vm1754_vm3 = vweird.f32 %v5436_v18  ;;  %vm5499_vm6 = vmor %vm1694_vm11, %vm1695_vm1  ;;  %v2205_v3 = vpop.permute.xlu0 %2204 }
 0x153   : > { %v1637_v17 = vsel %vm5456_vm14, %v3252_v55, %v1633_v37  ;;  %vm1739_vm8 = vweird.f32 %v5445_v30  ;;  %v1692_v22 = vmul.f32 %v5447_v25, %v1691_v54  ;;  %vm1680_vm7 = vweird.f32 %v5474_v29  ;;  %v1926_v54 = vld [vmem:[%s4063_s19 + $0x240] sm:$0xff]  ;;  %v2225_v8 = vpop.permute.xlu1 %2224 }
 0x154   : > { %v1642_v51 = vsel %vm5408_vm0, %v1641_v11, %v1637_v17  ;;  %v1708_v40 = vadd.f32 %v3258_v20, %v1707_v26  ;;  %v5495_v59 = vpop.eup %3263  ;;  %v1676_v52 = vsub.f32 1.0, %v1675_v58  ;;  %vm5503_vm13 = vcmp.eq.f32.partialorder %v1758_v46, 8.507059e+37  ;;  %vm5534_vm11 = vmor %vm1679_vm12, %vm1680_vm7  ;;  %v1920_v11 = vld [vmem:[%s4063_s19 + $0x210] sm:$0xff] }
 0x155   : > { %2369 = vperm.xlu0 %2956, %v1642_v51   ;;  %v5507_v27 = vor.u32 1.1754944e-38, %v1760_v15  ;;  %3267 = vpow2.f32 %v5406_v57  ;;  %v1693_v4 = vadd.f32 %v5447_v25, %v1692_v22  ;;  %v1750_v45 = vmul.f32 %v5495_v59, %v5436_v18  ;;  %v1922_v57 = vld [vmem:[%s4063_s19 + $0x220] sm:$0xff]  ;;  %v1929_v15 = vld [vmem:[%s4063_s19 + $0x258] sm:$0xff] }
 0x156   : > { %v1712_v62 = vsel %vm5483_vm2, %v3258_v20, %v1708_v40  ;;  %v1743_v1 = vand.u32 2147483647, %v5445_v30  ;;  %v1677_v5 = vmul.f32 %v5474_v29, %v1676_v52  ;;  %vm1755_vm0 = vweird.f32 %v5495_v59  ;;  %v257_v51 = vld [vmem:[%s3333_s15 + $0x298] sm:$0xff]  ;;  %v256_v40 = vld [vmem:[%s3333_s15 + $0x290] sm:$0xff] }
 0x157   : > { %v1717_v12 = vsel %vm5422_vm5, %v1716_v2, %v1712_v62  ;;  %v1745_v47 = vand.u32 2147483648, %v5445_v30  ;;  %v1697_v7 = vsel %vm5499_vm6, %v5447_v25, %v1693_v4  ;;  %v1751_v63 = vsub.f32 1.0, %v1750_v45  ;;  %v253_v2 = vld [vmem:[%s3333_s15 + $0x278] sm:$0xff] }
 0x158   : > { %v5525_v55 = vpop.eup %3265  ;;  %2394 = vperm.xlu2 %2958, %v1717_v12   ;;  %v2530_v0 = vmul.f32 %v2245_v39, %v1942_v35  ;;  %v2531_v10 = vmul.f32 %v2245_v39, %v1943_v60  ;;  %v1702_v13 = vsel %vm5439_vm10, %v5443_v21, %v1697_v7  ;;  %v1678_v16 = vadd.f32 %v5474_v29, %v1677_v5  ;;  %vm5561_vm10 = vmor %vm1754_vm3, %vm1755_vm0  ;;  %v255_v35 = vld [vmem:[%s3333_s15 + $0x288] sm:$0xff]  ;;  %v1934_v7 = vld [vmem:[%s4063_s19 + $0x280] sm:$0xff] }
 0x159   : > { %v1735_v9 = vmul.f32 %v5525_v55, %v5445_v30  ;;  %vm1740_vm5 = vweird.f32 %v5525_v55  ;;  %v1752_v20 = vmul.f32 %v5495_v59, %v1751_v63  ;;  %v2510_v42 = vmul.f32 %v2195_v34, %v1922_v57  ;;  %v1927_v30 = vld [vmem:[%s4063_s19 + $0x248] sm:$0xff]  ;;  %v1954_v57 = vld [vmem:[%s4063_s19 + $0x320] sm:$0xff] }
 0x15a   : > { %2389 = vperm.xlu1 %2957, %v1702_v13   ;;  %2699 = vst [vmem:[%s4118_s22 + $0x2c0] sm:$0xff] %v2530_v0  ;;  %v2511_v48 = vmul.f32 %v2195_v34, %v1923_v6  ;;  %3269 = vpow2.f32 %v5413_v53  ;;  %v1682_v25 = vsel %vm5534_vm11, %v5474_v29, %v1678_v16  ;;  %v2508_v33 = vmul.f32 %v5472_v31, %v1920_v11  ;;  %vm5588_vm9 = vmor %vm1739_vm8, %vm1740_vm5  ;;  %v1955_v6 = vld [vmem:[%s4063_s19 + $0x328] sm:$0xff] }
 0x15b   : > { %v3268_v21 = vpop.eup %3267  ;;  %v1736_v53 = vsub.f32 1.0, %v1735_v9  ;;  %2700 = vst.msk [vmem:[%s4118_s22 + $0x2c8] sm:$0xff] %vm2611_vm4, %v2531_v10  ;;  %v2509_v24 = vmul.f32 %v5472_v31, %v1921_v56  ;;  %v1687_v38 = vsel %vm5466_vm15, %v5462_v49, %v1682_v25  ;;  %v1753_v18 = vadd.f32 %v5495_v59, %v1752_v20  ;;  %v1928_v49 = vld [vmem:[%s4063_s19 + $0x250] sm:$0xff]  ;;  %v2220_v56 = vpop.permute.xlu0 %2219  ;;  %v1935_v25 = vld [vmem:[%s4063_s19 + $0x288] sm:$0xff] }
 0x15c   : > { %v5573_v39 = vadd.f32 1.0, %v3268_v21  ;;  %2679 = vst [vmem:[%s4118_s22 + $0x220] sm:$0xff] %v2510_v42  ;;  %v2938_v34 = vmul.f32 -1.442695, %v253_v2  ;;  %v2937_v37 = vmul.f32 -1.442695, %v252_v50  ;;  %v2536_v46 = vmul.f32 %v2260_v28, %v1948_v14  ;;  %v5682_v29 = vpop.permute.xlu1 %2239 }
 0x15d   : > { %2384 = vperm.xlu0 %2956, %v1687_v38   ;;  %v1737_v44 = vmul.f32 %v5525_v55, %v1736_v53  ;;  %2680 = vst.msk [vmem:[%s4118_s22 + $0x228] sm:$0xff] %vm2611_vm4, %v2511_v48  ;;  %v2537_v43 = vmul.f32 %v2260_v28, %v1949_v23  ;;  %v1757_v31 = vsel %vm5561_vm10, %v5495_v59, %v1753_v18  ;;  %v1746_v26 = vor.u32 1.1754944e-38, %v1745_v47  ;;  %v1933_v53 = vld [vmem:[%s4063_s19 + $0x278] sm:$0xff] }
 0x15e   : > { %3271 = vrcp.f32 %v5573_v39  ;;  %2677 = vst [vmem:[%s4118_s22 + $0x210] sm:$0xff] %v2508_v33  ;;  %v1762_v17 = vsel %vm5503_vm13, %v5507_v27, %v1757_v31  ;;  %vm5599_vm12 = vcmp.eq.f32.partialorder %v1743_v1, 8.507059e+37  ;;  %v2516_v59 = vmul.f32 %v2210_v19, %v1928_v49 }
 0x15f   : > { %v1738_v41 = vadd.f32 %v5525_v55, %v1737_v44  ;;  %2678 = vst.msk [vmem:[%s4118_s22 + $0x218] sm:$0xff] %vm2611_vm4, %v2509_v24  ;;  %3273 = vpow2.f32 %v2938_v34  ;;  %v2517_v61 = vmul.f32 %v2210_v19, %v1929_v15  ;;  %v2514_v27 = vmul.f32 %v2205_v3, %v1926_v54 }
 0x160   : > { %v3270_v22 = vpop.eup %3269  ;;  %2409 = vperm.xlu2 %2958, %v1762_v17   ;;  %3275 = vpow2.f32 %v2937_v37  ;;  %2705 = vst [vmem:[%s4118_s22 + $0x2f0] sm:$0xff] %v2536_v46  ;;  %v2515_v62 = vmul.f32 %v2205_v3, %v1927_v30  ;;  %v2942_v4 = vmul.f32 -1.442695, %v257_v51  ;;  %v2941_v45 = vmul.f32 -1.442695, %v256_v40 }
 0x161   : > { %v1742_v52 = vsel %vm5588_vm9, %v5525_v55, %v1738_v41  ;;  %v5612_v36 = vadd.f32 1.0, %v3270_v22  ;;  %2706 = vst.msk [vmem:[%s4118_s22 + $0x2f8] sm:$0xff] %vm2611_vm4, %v2537_v43  ;;  %v1728_v1 = vand.u32 2147483647, %v5573_v39  ;;  %v1730_v12 = vand.u32 2147483648, %v5573_v39  ;;  %v2275_v55 = vpop.permute.xlu2 %2274 }
 0x162   : > { %v1747_v60 = vsel %vm5599_vm12, %v1746_v26, %v1742_v52  ;;  %2685 = vst [vmem:[%s4118_s22 + $0x250] sm:$0xff] %v2516_v59  ;;  %vm1724_vm14 = vweird.f32 %v5573_v39  ;;  %v2940_v47 = vmul.f32 -1.442695, %v255_v35  ;;  %v2542_v9 = vmul.f32 %v2275_v55, %v1954_v57 }
 0x163   : > { %2404 = vperm.xlu1 %2957, %v1747_v60   ;;  %3277 = vrcp.f32 %v5612_v36  ;;  %2686 = vst.msk [vmem:[%s4118_s22 + $0x258] sm:$0xff] %vm2611_vm4, %v2517_v61  ;;  %v1803_v10 = vand.u32 2147483647, %v5612_v36  ;;  %v1805_v11 = vand.u32 2147483648, %v5612_v36  ;;  %v2543_v2 = vmul.f32 %v2275_v55, %v1955_v6  ;;  %v5690_v41 = vpop.permute.xlu0 %2234 }
 0x164   : > { %v5625_v5 = vpop.eup %3271  ;;  %2683 = vst [vmem:[%s4118_s22 + $0x240] sm:$0xff] %v2514_v27  ;;  %3279 = vpow2.f32 %v2942_v4  ;;  %v2522_v48 = vmul.f32 %v2225_v8, %v1934_v7  ;;  %vm5643_vm1 = vcmp.eq.f32.partialorder %v1728_v1, 8.507059e+37  ;;  %v1731_v14 = vor.u32 1.1754944e-38, %v1730_v12 }
 0x165   : > { %v3274_v63 = vpop.eup %3273  ;;  %v1720_v0 = vmul.f32 %v5625_v5, %v5573_v39  ;;  %vm1725_vm15 = vweird.f32 %v5625_v5  ;;  %2684 = vst.msk [vmem:[%s4118_s22 + $0x248] sm:$0xff] %vm2611_vm4, %v2515_v62  ;;  %3281 = vpow2.f32 %v2941_v45  ;;  %vm1799_vm2 = vweird.f32 %v5612_v36 }
 0x166   : > { %v3276_v13 = vpop.eup %3275  ;;  %v5639_v16 = vadd.f32 1.0, %v3274_v63  ;;  %3283 = vpow2.f32 %v2940_v47  ;;  %2711 = vst [vmem:[%s4118_s22 + $0x320] sm:$0xff] %v2542_v9  ;;  %vm5653_vm3 = vcmp.eq.f32.partialorder %v1803_v10, 8.507059e+37  ;;  %v1806_v21 = vor.u32 1.1754944e-38, %v1805_v11  ;;  %vm5667_vm8 = vmor %vm1724_vm14, %vm1725_vm15  ;;  %v1961_v63 = vld [vmem:[%s4063_s19 + $0x358] sm:$0xff] }
 0x167   : > { %v1721_v20 = vsub.f32 1.0, %v1720_v0  ;;  %v5641_v42 = vadd.f32 1.0, %v3276_v13  ;;  %2712 = vst.msk [vmem:[%s4118_s22 + $0x328] sm:$0xff] %vm2611_vm4, %v2543_v2  ;;  %v2523_v43 = vmul.f32 %v2225_v8, %v1935_v25  ;;  %v2520_v49 = vmul.f32 %v2220_v56, %v1932_v32  ;;  %v1960_v8 = vld [vmem:[%s4063_s19 + $0x350] sm:$0xff]  ;;  %v2255_v2 = vpop.permute.xlu1 %2254  ;;  %v1938_v25 = vld [vmem:[%s4063_s19 + $0x2a0] sm:$0xff] }
 0x168   : > { %3285 = vrcp.f32 %v5639_v16  ;;  %vm1784_vm7 = vweird.f32 %v5639_v16  ;;  %v1788_v38 = vand.u32 2147483647, %v5639_v16  ;;  %v1790_v18 = vand.u32 2147483648, %v5639_v16  ;;  %2691 = vst [vmem:[%s4118_s22 + $0x280] sm:$0xff] %v2522_v48  ;;  %v1940_v13 = vld [vmem:[%s4063_s19 + $0x2b0] sm:$0xff] }
 0x169   : > { %v5650_v23 = vpop.eup %3277  ;;  %v1722_v28 = vmul.f32 %v5625_v5, %v1721_v20  ;;  %3287 = vrcp.f32 %v5641_v42  ;;  %v1773_v39 = vand.u32 2147483647, %v5641_v42  ;;  %v2521_v15 = vmul.f32 %v2220_v56, %v1933_v53  ;;  %v2290_v31 = vpop.permute.xlu2 %2289  ;;  %2692 = vst.msk [vmem:[%s4118_s22 + $0x288] sm:$0xff] %vm2611_vm4, %v2523_v43 }
 0x16a   : > { %v3280_v33 = vpop.eup %3279  ;;  %v1795_v3 = vmul.f32 %v5650_v23, %v5612_v36  ;;  %vm1800_vm6 = vweird.f32 %v5650_v23  ;;  %vm1769_vm13 = vweird.f32 %v5641_v42  ;;  %v1775_v17 = vand.u32 2147483648, %v5641_v42  ;;  %2689 = vst [vmem:[%s4118_s22 + $0x270] sm:$0xff] %v2520_v49 }
 0x16b   : > { %v1723_v34 = vadd.f32 %v5625_v5, %v1722_v28  ;;  %v5680_v44 = vadd.f32 1.0, %v3280_v33  ;;  %v3282_v37 = vpop.eup %3281  ;;  %vm5695_vm0 = vcmp.eq.f32.partialorder %v1788_v38, 8.507059e+37  ;;  %v1791_v22 = vor.u32 1.1754944e-38, %v1790_v18  ;;  %vm5707_vm11 = vmor %vm1799_vm2, %vm1800_vm6  ;;  %2690 = vst.msk [vmem:[%s4118_s22 + $0x278] sm:$0xff] %vm2611_vm4, %v2521_v15 }
 0x16c   : > { %v1796_v46 = vsub.f32 1.0, %v1795_v3  ;;  %v3284_v26 = vpop.eup %3283  ;;  %v5713_v35 = vadd.f32 1.0, %v3282_v37  ;;  %vm5721_vm5 = vcmp.eq.f32.partialorder %v1773_v39, 8.507059e+37  ;;  %v1776_v12 = vor.u32 1.1754944e-38, %v1775_v17  ;;  %v1939_v39 = vld [vmem:[%s4063_s19 + $0x2a8] sm:$0xff]  ;;  %v1966_v37 = vld [vmem:[%s4063_s19 + $0x380] sm:$0xff] }
 0x16d   : > { %v1727_v54 = vsel %vm5667_vm8, %v5625_v5, %v1723_v34  ;;  %3289 = vrcp.f32 %v5680_v44  ;;  %v1848_v27 = vand.u32 2147483647, %v5680_v44  ;;  %v5715_v60 = vadd.f32 1.0, %v3284_v26  ;;  %v1946_v17 = vld [vmem:[%s4063_s19 + $0x2e0] sm:$0xff] }
 0x16e   : > { %v3286_v58 = vpop.eup %3285  ;;  %v1732_v30 = vsel %vm5643_vm1, %v1731_v14, %v1727_v54  ;;  %v1797_v51 = vmul.f32 %v5650_v23, %v1796_v46  ;;  %v1850_v45 = vand.u32 2147483648, %v5680_v44  ;;  %3291 = vrcp.f32 %v5713_v35  ;;  %v5768_v14 = vpop.permute.xlu0 %2249  ;;  %v1967_v46 = vld [vmem:[%s4063_s19 + $0x388] sm:$0xff] }
 0x16f   : > { %v5701_v59 = vpop.eup %3287  ;;  %2399 = vperm.xlu0 %2956, %v1732_v30   ;;  %v1780_v52 = vmul.f32 %v3286_v58, %v5639_v16  ;;  %vm1785_vm10 = vweird.f32 %v3286_v58  ;;  %vm1844_vm12 = vweird.f32 %v5680_v44  ;;  %vm5738_vm14 = vcmp.eq.f32.partialorder %v1848_v27, 8.507059e+37  ;;  %v1950_v16 = vld [vmem:[%s4063_s19 + $0x300] sm:$0xff] }
 0x170   : > { %v1798_v62 = vadd.f32 %v5650_v23, %v1797_v51  ;;  %v1765_v4 = vmul.f32 %v5701_v59, %v5641_v42  ;;  %vm1770_vm9 = vweird.f32 %v5701_v59  ;;  %3293 = vrcp.f32 %v5715_v60  ;;  %vm5748_vm15 = vmor %vm1784_vm7, %vm1785_vm10  ;;  %v1947_v51 = vld [vmem:[%s4063_s19 + $0x2e8] sm:$0xff] }
 0x171   : > { %v1781_v1 = vsub.f32 1.0, %v1780_v52  ;;  %v1851_v56 = vor.u32 1.1754944e-38, %v1850_v45  ;;  %vm1829_vm1 = vweird.f32 %v5713_v35  ;;  %v2305_v9 = vpop.permute.xlu2 %2304  ;;  %vm5761_vm2 = vmor %vm1769_vm13, %vm1770_vm9  ;;  %v1833_v48 = vand.u32 2147483647, %v5713_v35  ;;  %v2270_v45 = vpop.permute.xlu1 %2269 }
 0x172   : > { %v1802_v5 = vsel %vm5707_vm11, %v5650_v23, %v1798_v62  ;;  %v1766_v47 = vsub.f32 1.0, %v1765_v4  ;;  %v1835_v50 = vand.u32 2147483648, %v5713_v35  ;;  %v2548_v19 = vmul.f32 %v2290_v31, %v1960_v8  ;;  %v1945_v4 = vld [vmem:[%s4063_s19 + $0x2d8] sm:$0xff] }
 0x173   : > { %v5734_v57 = vpop.eup %3289  ;;  %v1807_v6 = vsel %vm5653_vm3, %v1806_v21, %v1802_v5  ;;  %v1782_v55 = vmul.f32 %v3286_v58, %v1781_v1  ;;  %v2549_v42 = vmul.f32 %v2290_v31, %v1961_v63  ;;  %v1941_v21 = vld [vmem:[%s4063_s19 + $0x2b8] sm:$0xff]  ;;  %vm1814_vm8 = vweird.f32 %v5715_v60 }
 0x174   : > { %2424 = vperm.xlu2 %2958, %v1807_v6   ;;  %v1767_v10 = vmul.f32 %v5701_v59, %v1766_v47  ;;  %v1840_v11 = vmul.f32 %v5734_v57, %v5680_v44  ;;  %vm1845_vm3 = vweird.f32 %v5734_v57  ;;  %v5773_v32 = vpop.eup %3291  ;;  %v1818_v33 = vand.u32 2147483647, %v5715_v60  ;;  %2717 = vst [vmem:[%s4118_s22 + $0x350] sm:$0xff] %v2548_v19  ;;  %v1972_v47 = vld [vmem:[%s4063_s19 + $0x3b0] sm:$0xff]  ;;  %v1973_v8 = vld [vmem:[%s4063_s19 + $0x3b8] sm:$0xff]  ;;  %v1978_v19 = vld [vmem:[%s4063_s19 + $0x3e0] sm:$0xff] }
 0x175   : > { %v1783_v20 = vadd.f32 %v3286_v58, %v1782_v55  ;;  %v2528_v24 = vmul.f32 %v5682_v29, %v1940_v13  ;;  %v1825_v34 = vmul.f32 %v5773_v32, %v5713_v35  ;;  %vm5800_vm7 = vmor %vm1844_vm12, %vm1845_vm3  ;;  %v1820_v31 = vand.u32 2147483648, %v5715_v60  ;;  %2718 = vst.msk [vmem:[%s4118_s22 + $0x358] sm:$0xff] %vm2611_vm4, %v2549_v42  ;;  %v1977_v63 = vld [vmem:[%s4063_s19 + $0x3d8] sm:$0xff] }
 0x176   : > { %v1768_v23 = vadd.f32 %v5701_v59, %v1767_v10  ;;  %v1841_v28 = vsub.f32 1.0, %v1840_v11  ;;  %v5792_v43 = vpop.eup %3293  ;;  %v2529_v26 = vmul.f32 %v5682_v29, %v1941_v21  ;;  %v2526_v54 = vmul.f32 %v5690_v41, %v1938_v25  ;;  %v1952_v11 = vld [vmem:[%s4063_s19 + $0x310] sm:$0xff]  ;;  %v1979_v21 = vld [vmem:[%s4063_s19 + $0x3e8] sm:$0xff] }
 0x177   : > { %v1787_v53 = vsel %vm5748_vm15, %v3286_v58, %v1783_v20  ;;  %v1826_v30 = vsub.f32 1.0, %v1825_v34  ;;  %vm1830_vm6 = vweird.f32 %v5773_v32  ;;  %v1810_v44 = vmul.f32 %v5792_v43, %v5715_v60  ;;  %2697 = vst [vmem:[%s4118_s22 + $0x2b0] sm:$0xff] %v2528_v24  ;;  %v1956_v34 = vld [vmem:[%s4063_s19 + $0x330] sm:$0xff] }
 0x178   : > { %v1792_v3 = vsel %vm5695_vm0, %v1791_v22, %v1787_v53  ;;  %v1772_v38 = vsel %vm5761_vm2, %v5701_v59, %v1768_v23  ;;  %v1842_v18 = vmul.f32 %v5734_v57, %v1841_v28  ;;  %vm1815_vm13 = vweird.f32 %v5792_v43  ;;  %2698 = vst.msk [vmem:[%s4118_s22 + $0x2b8] sm:$0xff] %vm2611_vm4, %v2529_v26  ;;  %v1944_v59 = vld [vmem:[%s4063_s19 + $0x2d0] sm:$0xff]  ;;  %vm5833_vm0 = vmor %vm1829_vm1, %vm1830_vm6  ;;  %v1985_v26 = vld [vmem:[%s4063_s19 + $0x418] sm:$0xff] }
 0x179   : > { %2419 = vperm.xlu1 %2957, %v1792_v3   ;;  %v1777_v49 = vsel %vm5721_vm5, %v1776_v12, %v1772_v38  ;;  %v2527_v29 = vmul.f32 %v5690_v41, %v1939_v39  ;;  %v2554_v40 = vmul.f32 %v2305_v9, %v1966_v37  ;;  %v2555_v22 = vmul.f32 %v2305_v9, %v1967_v46  ;;  %v2320_v36 = vpop.permute.xlu2 %2319  ;;  %vm5853_vm5 = vmor %vm1814_vm8, %vm1815_vm13  ;;  %v1953_v9 = vld [vmem:[%s4063_s19 + $0x318] sm:$0xff]  ;;  %v1959_v38 = vld [vmem:[%s4063_s19 + $0x348] sm:$0xff] }
 0x17a   : > { %2414 = vperm.xlu0 %2956, %v1777_v49   ;;  %v1843_v58 = vadd.f32 %v5734_v57, %v1842_v18  ;;  %v1827_v52 = vmul.f32 %v5773_v32, %v1826_v30  ;;  %v1811_v27 = vsub.f32 1.0, %v1810_v44  ;;  %2695 = vst [vmem:[%s4118_s22 + $0x2a0] sm:$0xff] %v2526_v54  ;;  %v2534_v62 = vmul.f32 %v2255_v2, %v1946_v17  ;;  %v1957_v37 = vld [vmem:[%s4063_s19 + $0x338] sm:$0xff]  ;;  %v1964_v49 = vld [vmem:[%s4063_s19 + $0x370] sm:$0xff]  ;;  %v1962_v30 = vld [vmem:[%s4063_s19 + $0x360] sm:$0xff] }
 0x17b   : > { %v1836_v12 = vor.u32 1.1754944e-38, %v1835_v50  ;;  %2696 = vst.msk [vmem:[%s4118_s22 + $0x2a8] sm:$0xff] %vm2611_vm4, %v2527_v29  ;;  %v2535_v5 = vmul.f32 %v2255_v2, %v1947_v51  ;;  %vm5841_vm11 = vcmp.eq.f32.partialorder %v1833_v48, 8.507059e+37  ;;  %v2532_v7 = vmul.f32 %v5768_v14, %v1944_v59  ;;  %v1965_v54 = vld [vmem:[%s4063_s19 + $0x378] sm:$0xff]  ;;  %v1963_v29 = vld [vmem:[%s4063_s19 + $0x368] sm:$0xff] }
 0x17c   : > { %v1847_v61 = vsel %vm5800_vm7, %v5734_v57, %v1843_v58  ;;  %v2265_v57 = vpop.permute.xlu0 %2264  ;;  %v1828_v6 = vadd.f32 %v5773_v32, %v1827_v52  ;;  %v1812_v35 = vmul.f32 %v5792_v43, %v1811_v27  ;;  %2723 = vst [vmem:[%s4118_s22 + $0x380] sm:$0xff] %v2554_v40  ;;  %v1821_v0 = vor.u32 1.1754944e-38, %v1820_v31  ;;  %v1984_v31 = vld [vmem:[%s4063_s19 + $0x410] sm:$0xff]  ;;  %v1970_v27 = vld [vmem:[%s4063_s19 + $0x3a0] sm:$0xff] }
 0x17d   : > { %v1852_v41 = vsel %vm5738_vm14, %v1851_v56, %v1847_v61  ;;  %2724 = vst.msk [vmem:[%s4118_s22 + $0x388] sm:$0xff] %vm2611_vm4, %v2555_v22  ;;  %v2533_v10 = vmul.f32 %v5768_v14, %v1945_v4  ;;  %vm1819_vm10 = vcmp.eq.f32.partialorder %v1818_v33, 8.507059e+37  ;;  %v2560_v60 = vmul.f32 %v2320_v36, %v1972_v47  ;;  %v1951_v14 = vld [vmem:[%s4063_s19 + $0x308] sm:$0xff]  ;;  %v1958_v33 = vld [vmem:[%s4063_s19 + $0x340] sm:$0xff] }
 0x17e   : > { %2439 = vperm.xlu2 %2958, %v1852_v41   ;;  %v1832_v56 = vsel %vm5833_vm0, %v5773_v32, %v1828_v6  ;;  %v1813_v13 = vadd.f32 %v5792_v43, %v1812_v35  ;;  %2703 = vst [vmem:[%s4118_s22 + $0x2e0] sm:$0xff] %v2534_v62  ;;  %v2561_v20 = vmul.f32 %v2320_v36, %v1973_v8  ;;  %v2285_v32 = vpop.permute.xlu1 %2284  ;;  %v1971_v62 = vld [vmem:[%s4063_s19 + $0x3a8] sm:$0xff]  ;;  %v1990_v4 = vld [vmem:[%s4063_s19 + $0x440] sm:$0xff]  ;;  %v1968_v41 = vld [vmem:[%s4063_s19 + $0x390] sm:$0xff] }
 0x17f   : > { %v1837_v2 = vsel %vm5841_vm11, %v1836_v12, %v1832_v56  ;;  %2704 = vst.msk [vmem:[%s4118_s22 + $0x2e8] sm:$0xff] %vm2611_vm4, %v2535_v5  ;;  %v2540_v50 = vmul.f32 %v2270_v45, %v1952_v11  ;;  %v2541_v28 = vmul.f32 %v2270_v45, %v1953_v9  ;;  %v2538_v42 = vmul.f32 %v2265_v57, %v1950_v16  ;;  %v1991_v36 = vld [vmem:[%s4063_s19 + $0x448] sm:$0xff]  ;;  %v1969_v5 = vld [vmem:[%s4063_s19 + $0x398] sm:$0xff]  ;;  %v1976_v8 = vld [vmem:[%s4063_s19 + $0x3d0] sm:$0xff] }
 0x180   : > { %v1817_v48 = vsel %vm5853_vm5, %v5792_v43, %v1813_v13  ;;  %2701 = vst [vmem:[%s4118_s22 + $0x2d0] sm:$0xff] %v2532_v7  ;;  %v2539_v53 = vmul.f32 %v2265_v57, %v1951_v14  ;;  %v2546_v39 = vmul.f32 %v2285_v32, %v1958_v33  ;;  %v2547_v46 = vmul.f32 %v2285_v32, %v1959_v38  ;;  %v1996_v11 = vld [vmem:[%s4063_s19 + $0x470] sm:$0xff]  ;;  %v1997_v56 = vld [vmem:[%s4063_s19 + $0x478] sm:$0xff]  ;;  %v1975_v9 = vld [vmem:[%s4063_s19 + $0x3c8] sm:$0xff] }
 0x181   : > { %2434 = vperm.xlu1 %2957, %v1837_v2   ;;  %v1822_v23 = vsel %vm1819_vm10, %v1821_v0, %v1817_v48  ;;  %2702 = vst.msk [vmem:[%s4118_s22 + $0x2d8] sm:$0xff] %vm2611_vm4, %v2533_v10  ;;  %v2335_v25 = vpop.permute.xlu2 %2334  ;;  %v1974_v0 = vld [vmem:[%s4063_s19 + $0x3c0] sm:$0xff] }
 0x182   : > { %2429 = vperm.xlu0 %2956, %v1822_v23   ;;  %2729 = vst [vmem:[%s4118_s22 + $0x3b0] sm:$0xff] %v2560_v60  ;;  %v2566_v3 = vmul.f32 %v2335_v25, %v1978_v19  ;;  %v2567_v18 = vmul.f32 %v2335_v25, %v1979_v21  ;;  %v1982_v23 = vld [vmem:[%s4063_s19 + $0x400] sm:$0xff]  ;;  %v1980_v19 = vld [vmem:[%s4063_s19 + $0x3f0] sm:$0xff] }
 0x183   : > { %2730 = vst.msk [vmem:[%s4118_s22 + $0x3b8] sm:$0xff] %vm2611_vm4, %v2561_v20  ;;  %v2002_v38 = vld [vmem:[%s4063_s19 + $0x4a0] sm:$0xff] }
 0x184   : > { %v2280_v24 = vpop.permute.xlu0 %2279  ;;  %2709 = vst [vmem:[%s4118_s22 + $0x310] sm:$0xff] %v2540_v50 }
 0x185   : > { %2710 = vst.msk [vmem:[%s4118_s22 + $0x318] sm:$0xff] %vm2611_vm4, %v2541_v28  ;;  %v2544_v43 = vmul.f32 %v2280_v24, %v1956_v34  ;;  %v2545_v15 = vmul.f32 %v2280_v24, %v1957_v37  ;;  %v1983_v28 = vld [vmem:[%s4063_s19 + $0x408] sm:$0xff]  ;;  %v1989_v34 = vld [vmem:[%s4063_s19 + $0x438] sm:$0xff]  ;;  %v1986_v37 = vld [vmem:[%s4063_s19 + $0x420] sm:$0xff] }
 0x186   : > { %2707 = vst [vmem:[%s4118_s22 + $0x300] sm:$0xff] %v2538_v42  ;;  %v2300_v17 = vpop.permute.xlu1 %2299  ;;  %v1981_v42 = vld [vmem:[%s4063_s19 + $0x3f8] sm:$0xff] }
 0x187   : > { %2708 = vst.msk [vmem:[%s4118_s22 + $0x308] sm:$0xff] %vm2611_vm4, %v2539_v53  ;;  %v2552_v58 = vmul.f32 %v2300_v17, %v1964_v49  ;;  %v2553_v59 = vmul.f32 %v2300_v17, %v1965_v54  ;;  %v1987_v49 = vld [vmem:[%s4063_s19 + $0x428] sm:$0xff] }
 0x188   : > { %2735 = vst [vmem:[%s4118_s22 + $0x3e0] sm:$0xff] %v2566_v3  ;;  %v1988_v3 = vld [vmem:[%s4063_s19 + $0x430] sm:$0xff] }
 0x189   : > { %2736 = vst.msk [vmem:[%s4118_s22 + $0x3e8] sm:$0xff] %vm2611_vm4, %v2567_v18  ;;  %v2003_v18 = vld [vmem:[%s4063_s19 + $0x4a8] sm:$0xff] }
 0x18a   : > { %2715 = vst [vmem:[%s4118_s22 + $0x340] sm:$0xff] %v2546_v39 }
 0x18b   : > { %2716 = vst.msk [vmem:[%s4118_s22 + $0x348] sm:$0xff] %vm2611_vm4, %v2547_v46 }
 0x18c   : > { %v2295_v44 = vpop.permute.xlu0 %2294  ;;  %2713 = vst [vmem:[%s4118_s22 + $0x330] sm:$0xff] %v2544_v43 }
 0x18d   : > { %2714 = vst.msk [vmem:[%s4118_s22 + $0x338] sm:$0xff] %vm2611_vm4, %v2545_v15  ;;  %v2550_v61 = vmul.f32 %v2295_v44, %v1962_v30  ;;  %v2551_v52 = vmul.f32 %v2295_v44, %v1963_v29  ;;  %v2008_v30 = vld [vmem:[%s4063_s19 + $0x4d0] sm:$0xff]  ;;  %v2009_v44 = vld [vmem:[%s4063_s19 + $0x4d8] sm:$0xff] }
 0x18e   : > { %v2350_v51 = vpop.permute.xlu2 %2349  ;;  %2721 = vst [vmem:[%s4118_s22 + $0x370] sm:$0xff] %v2552_v58  ;;  %v2315_v45 = vpop.permute.xlu1 %2314 }
 0x18f   : > { %v2572_v40 = vmul.f32 %v2350_v51, %v1984_v31  ;;  %v2573_v22 = vmul.f32 %v2350_v51, %v1985_v26  ;;  %2722 = vst.msk [vmem:[%s4118_s22 + $0x378] sm:$0xff] %vm2611_vm4, %v2553_v59  ;;  %v2558_v1 = vmul.f32 %v2315_v45, %v1970_v27  ;;  %v2559_v12 = vmul.f32 %v2315_v45, %v1971_v62  ;;  %v1995_v59 = vld [vmem:[%s4063_s19 + $0x468] sm:$0xff]  ;;  %v1992_v62 = vld [vmem:[%s4063_s19 + $0x450] sm:$0xff] }
 0x190   : > { %2719 = vst [vmem:[%s4118_s22 + $0x360] sm:$0xff] %v2550_v61 }
 0x191   : > { %2741 = vst [vmem:[%s4118_s22 + $0x410] sm:$0xff] %v2572_v40 }
 0x192   : > { %2742 = vst.msk [vmem:[%s4118_s22 + $0x418] sm:$0xff] %vm2611_vm4, %v2573_v22  ;;  %v1994_v22 = vld [vmem:[%s4063_s19 + $0x460] sm:$0xff] }
 0x193   : > { %2720 = vst.msk [vmem:[%s4118_s22 + $0x368] sm:$0xff] %vm2611_vm4, %v2551_v52 }
 0x194   : > { %v2310_v47 = vpop.permute.xlu0 %2309  ;;  %2727 = vst [vmem:[%s4118_s22 + $0x3a0] sm:$0xff] %v2558_v1  ;;  %v2000_v1 = vld [vmem:[%s4063_s19 + $0x490] sm:$0xff] }
 0x195   : > { %v2556_v35 = vmul.f32 %v2310_v47, %v1968_v41  ;;  %2728 = vst.msk [vmem:[%s4118_s22 + $0x3a8] sm:$0xff] %vm2611_vm4, %v2559_v12  ;;  %v2557_v7 = vmul.f32 %v2310_v47, %v1969_v5  ;;  %v2001_v12 = vld [vmem:[%s4063_s19 + $0x498] sm:$0xff]  ;;  %v2014_v5 = vld [vmem:[%s4063_s19 + $0x500] sm:$0xff]  ;;  %v2015_v47 = vld [vmem:[%s4063_s19 + $0x508] sm:$0xff] }
 0x196   : > { %v2365_v57 = vpop.permute.xlu2 %2364  ;;  %v2330_v10 = vpop.permute.xlu1 %2329 }
 0x197   : > { %v2578_v6 = vmul.f32 %v2365_v57, %v1990_v4  ;;  %v2579_v55 = vmul.f32 %v2365_v57, %v1991_v36  ;;  %2725 = vst [vmem:[%s4118_s22 + $0x390] sm:$0xff] %v2556_v35  ;;  %v2564_v13 = vmul.f32 %v2330_v10, %v1976_v8  ;;  %v2565_v60 = vmul.f32 %v2330_v10, %v1977_v63  ;;  %v1993_v4 = vld [vmem:[%s4063_s19 + $0x458] sm:$0xff]  ;;  %v1998_v35 = vld [vmem:[%s4063_s19 + $0x480] sm:$0xff] }
 0x198   : > { %2726 = vst.msk [vmem:[%s4118_s22 + $0x398] sm:$0xff] %vm2611_vm4, %v2557_v7  ;;  %v1999_v7 = vld [vmem:[%s4063_s19 + $0x488] sm:$0xff] }
 0x199   : > { %2747 = vst [vmem:[%s4118_s22 + $0x440] sm:$0xff] %v2578_v6 }
 0x19a   : > { %2748 = vst.msk [vmem:[%s4118_s22 + $0x448] sm:$0xff] %vm2611_vm4, %v2579_v55 }
 0x19b   : > { %2733 = vst [vmem:[%s4118_s22 + $0x3d0] sm:$0xff] %v2564_v13  ;;  %v2006_v13 = vld [vmem:[%s4063_s19 + $0x4c0] sm:$0xff] }
 0x19c   : > { %v2325_v2 = vpop.permute.xlu0 %2324  ;;  %2734 = vst.msk [vmem:[%s4118_s22 + $0x3d8] sm:$0xff] %vm2611_vm4, %v2565_v60  ;;  %v2007_v60 = vld [vmem:[%s4063_s19 + $0x4c8] sm:$0xff] }
 0x19d   : > { %v2562_v20 = vmul.f32 %v2325_v2, %v1974_v0  ;;  %v2563_v14 = vmul.f32 %v2325_v2, %v1975_v9  ;;  %v2020_v2 = vld [vmem:[%s4063_s19 + $0x530] sm:$0xff] }
 0x19f   : > { %v2380_v16 = vpop.permute.xlu2 %2379  ;;  %2731 = vst [vmem:[%s4118_s22 + $0x3c0] sm:$0xff] %v2562_v20  ;;  %v2021_v20 = vld [vmem:[%s4063_s19 + $0x538] sm:$0xff] }
 0x1a0   : > { %v2584_v48 = vmul.f32 %v2380_v16, %v1996_v11  ;;  %v2585_v50 = vmul.f32 %v2380_v16, %v1997_v56  ;;  %2732 = vst.msk [vmem:[%s4118_s22 + $0x3c8] sm:$0xff] %vm2611_vm4, %v2563_v14 }
 0x1a2   : > { %2753 = vst [vmem:[%s4118_s22 + $0x470] sm:$0xff] %v2584_v48 }
 0x1a3   : > { %2754 = vst.msk [vmem:[%s4118_s22 + $0x478] sm:$0xff] %vm2611_vm4, %v2585_v50 }
 0x1a8   : > { %v2345_v21 = vpop.permute.xlu1 %2344 }
 0x1a9   : > { %v2570_v25 = vmul.f32 %v2345_v21, %v1982_v23  ;;  %v2571_v32 = vmul.f32 %v2345_v21, %v1983_v28  ;;  %v2340_v53 = vpop.permute.xlu0 %2339  ;;  %v2004_v28 = vld [vmem:[%s4063_s19 + $0x4b0] sm:$0xff] }
 0x1aa   : > { %v2568_v33 = vmul.f32 %v2340_v53, %v1980_v19  ;;  %v2569_v24 = vmul.f32 %v2340_v53, %v1981_v42  ;;  %v2005_v19 = vld [vmem:[%s4063_s19 + $0x4b8] sm:$0xff] }
 0x1ab   : > { %2739 = vst [vmem:[%s4118_s22 + $0x400] sm:$0xff] %v2570_v25  ;;  %v2013_v53 = vld [vmem:[%s4063_s19 + $0x4f8] sm:$0xff] }
 0x1ac   : > { %2740 = vst.msk [vmem:[%s4118_s22 + $0x408] sm:$0xff] %vm2611_vm4, %v2571_v32  ;;  %v2012_v32 = vld [vmem:[%s4063_s19 + $0x4f0] sm:$0xff] }
 0x1ad   : > { %2737 = vst [vmem:[%s4118_s22 + $0x3f0] sm:$0xff] %v2568_v33  ;;  %v2010_v33 = vld [vmem:[%s4063_s19 + $0x4e0] sm:$0xff] }
 0x1ae   : > { %2738 = vst.msk [vmem:[%s4118_s22 + $0x3f8] sm:$0xff] %vm2611_vm4, %v2569_v24  ;;  %v2011_v24 = vld [vmem:[%s4063_s19 + $0x4e8] sm:$0xff] }
 0x1b0   : > { %v2360_v39 = vpop.permute.xlu1 %2359 }
 0x1b1   : > { %v2576_v43 = vmul.f32 %v2360_v39, %v1988_v3  ;;  %v2577_v54 = vmul.f32 %v2360_v39, %v1989_v34 }
 0x1b2   : > { %v2395_v46 = vpop.permute.xlu2 %2394  ;;  %v2355_v15 = vpop.permute.xlu0 %2354 }
 0x1b3   : > { %v2590_v31 = vmul.f32 %v2395_v46, %v2002_v38  ;;  %v2591_v26 = vmul.f32 %v2395_v46, %v2003_v18  ;;  %2745 = vst [vmem:[%s4118_s22 + $0x430] sm:$0xff] %v2576_v43  ;;  %v2574_v17 = vmul.f32 %v2355_v15, %v1986_v37  ;;  %v2575_v58 = vmul.f32 %v2355_v15, %v1987_v49  ;;  %v2018_v46 = vld [vmem:[%s4063_s19 + $0x520] sm:$0xff]  ;;  %v2019_v43 = vld [vmem:[%s4063_s19 + $0x528] sm:$0xff]  ;;  %v2016_v15 = vld [vmem:[%s4063_s19 + $0x510] sm:$0xff] }
 0x1b4   : > { %2746 = vst.msk [vmem:[%s4118_s22 + $0x438] sm:$0xff] %vm2611_vm4, %v2577_v54 }
 0x1b5   : > { %2759 = vst [vmem:[%s4118_s22 + $0x4a0] sm:$0xff] %v2590_v31  ;;  %v2017_v31 = vld [vmem:[%s4063_s19 + $0x518] sm:$0xff] }
 0x1b6   : > { %2760 = vst.msk [vmem:[%s4118_s22 + $0x4a8] sm:$0xff] %vm2611_vm4, %v2591_v26 }
 0x1b7   : > { %2743 = vst [vmem:[%s4118_s22 + $0x420] sm:$0xff] %v2574_v17 }
 0x1b8   : > { %2744 = vst.msk [vmem:[%s4118_s22 + $0x428] sm:$0xff] %vm2611_vm4, %v2575_v58 }
 0x1ba   : > { %v2410_v51 = vpop.permute.xlu2 %2409 }
 0x1bb   : > { %v2596_v29 = vmul.f32 %v2410_v51, %v2008_v30  ;;  %v2597_v40 = vmul.f32 %v2410_v51, %v2009_v44 }
 0x1bd   : > { %2765 = vst [vmem:[%s4118_s22 + $0x4d0] sm:$0xff] %v2596_v29 }
 0x1be   : > { %2766 = vst.msk [vmem:[%s4118_s22 + $0x4d8] sm:$0xff] %vm2611_vm4, %v2597_v40 }
 0x1c4   : > { %v2375_v61 = vpop.permute.xlu1 %2374 }
 0x1c5   : > { %v2582_v52 = vmul.f32 %v2375_v61, %v1994_v22  ;;  %v2583_v27 = vmul.f32 %v2375_v61, %v1995_v59 }
 0x1c7   : > { %2751 = vst [vmem:[%s4118_s22 + $0x460] sm:$0xff] %v2582_v52  ;;  %v2370_v36 = vpop.permute.xlu0 %2369 }
 0x1c8   : > { %2752 = vst.msk [vmem:[%s4118_s22 + $0x468] sm:$0xff] %vm2611_vm4, %v2583_v27  ;;  %v2580_v45 = vmul.f32 %v2370_v36, %v1992_v62  ;;  %v2581_v41 = vmul.f32 %v2370_v36, %v1993_v4 }
 0x1ca   : > { %2749 = vst [vmem:[%s4118_s22 + $0x450] sm:$0xff] %v2580_v45 }
 0x1cb   : > { %2750 = vst.msk [vmem:[%s4118_s22 + $0x458] sm:$0xff] %vm2611_vm4, %v2581_v41 }
 0x1cc   : > { %v2390_v57 = vpop.permute.xlu1 %2389 }
 0x1cd   : > { %v2588_v6 = vmul.f32 %v2390_v57, %v2000_v1  ;;  %v2589_v55 = vmul.f32 %v2390_v57, %v2001_v12 }
 0x1ce   : > { %v2425_v8 = vpop.permute.xlu2 %2424 }
 0x1cf   : > { %v2602_v63 = vmul.f32 %v2425_v8, %v2014_v5  ;;  %v2603_v0 = vmul.f32 %v2425_v8, %v2015_v47  ;;  %2757 = vst [vmem:[%s4118_s22 + $0x490] sm:$0xff] %v2588_v6  ;;  %v2385_v10 = vpop.permute.xlu0 %2384 }
 0x1d0   : > { %2758 = vst.msk [vmem:[%s4118_s22 + $0x498] sm:$0xff] %vm2611_vm4, %v2589_v55  ;;  %v2586_v11 = vmul.f32 %v2385_v10, %v1998_v35  ;;  %v2587_v56 = vmul.f32 %v2385_v10, %v1999_v7 }
 0x1d1   : > { %2771 = vst [vmem:[%s4118_s22 + $0x500] sm:$0xff] %v2602_v63 }
 0x1d2   : > { %2772 = vst.msk [vmem:[%s4118_s22 + $0x508] sm:$0xff] %vm2611_vm4, %v2603_v0 }
 0x1d3   : > { %2755 = vst [vmem:[%s4118_s22 + $0x480] sm:$0xff] %v2586_v11 }
 0x1d4   : > { %2756 = vst.msk [vmem:[%s4118_s22 + $0x488] sm:$0xff] %vm2611_vm4, %v2587_v56 }
 0x1d5   : > { %v2405_v9 = vpop.permute.xlu1 %2404 }
 0x1d6   : > { %v2594_v16 = vmul.f32 %v2405_v9, %v2006_v13  ;;  %v2595_v48 = vmul.f32 %v2405_v9, %v2007_v60 }
 0x1d8   : > { %v2440_v50 = vpop.permute.xlu2 %2439  ;;  %2763 = vst [vmem:[%s4118_s22 + $0x4c0] sm:$0xff] %v2594_v16 }
 0x1d9   : > { %v2608_v14 = vmul.f32 %v2440_v50, %v2020_v2  ;;  %v2609_v23 = vmul.f32 %v2440_v50, %v2021_v20  ;;  %2764 = vst.msk [vmem:[%s4118_s22 + $0x4c8] sm:$0xff] %vm2611_vm4, %v2595_v48 }
 0x1db   : > { %2777 = vst [vmem:[%s4118_s22 + $0x530] sm:$0xff] %v2608_v14 }
 0x1dc   : > { %2778 = vst.msk [vmem:[%s4118_s22 + $0x538] sm:$0xff] %vm2611_vm4, %v2609_v23 }
 0x1e1   : > { %v2400_v42 = vpop.permute.xlu0 %2399 }
 0x1e2   : > { %v2592_v21 = vmul.f32 %v2400_v42, %v2004_v28  ;;  %v2593_v25 = vmul.f32 %v2400_v42, %v2005_v19 }
 0x1e4   : > { %2761 = vst [vmem:[%s4118_s22 + $0x4b0] sm:$0xff] %v2592_v21 }
 0x1e5   : > { %2762 = vst.msk [vmem:[%s4118_s22 + $0x4b8] sm:$0xff] %vm2611_vm4, %v2593_v25 }
 0x1eb   : > { %v2420_v3 = vpop.permute.xlu1 %2419 }
 0x1ec   : > { %v2600_v38 = vmul.f32 %v2420_v3, %v2012_v32  ;;  %v2601_v18 = vmul.f32 %v2420_v3, %v2013_v53  ;;  %v2415_v34 = vpop.permute.xlu0 %2414 }
 0x1ed   : > { %v2598_v39 = vmul.f32 %v2415_v34, %v2010_v33  ;;  %v2599_v37 = vmul.f32 %v2415_v34, %v2011_v24 }
 0x1ee   : > { %2769 = vst [vmem:[%s4118_s22 + $0x4f0] sm:$0xff] %v2600_v38 }
 0x1ef   : > { %2770 = vst.msk [vmem:[%s4118_s22 + $0x4f8] sm:$0xff] %vm2611_vm4, %v2601_v18 }
 0x1f0   : > { %2767 = vst [vmem:[%s4118_s22 + $0x4e0] sm:$0xff] %v2598_v39 }
 0x1f1   : > { %2768 = vst.msk [vmem:[%s4118_s22 + $0x4e8] sm:$0xff] %vm2611_vm4, %v2599_v37 }
 0x1f3   : > { %v2435_v49 = vpop.permute.xlu1 %2434 }
 0x1f4   : > { %v2606_v26 = vmul.f32 %v2435_v49, %v2018_v46  ;;  %v2607_v54 = vmul.f32 %v2435_v49, %v2019_v43  ;;  %v2430_v17 = vpop.permute.xlu0 %2429 }
 0x1f5   : > { %v2604_v58 = vmul.f32 %v2430_v17, %v2016_v15  ;;  %v2605_v30 = vmul.f32 %v2430_v17, %v2017_v31 }
 0x1f6   : > { %2775 = vst [vmem:[%s4118_s22 + $0x520] sm:$0xff] %v2606_v26 }
 0x1f7   : > { %2776 = vst.msk [vmem:[%s4118_s22 + $0x528] sm:$0xff] %vm2611_vm4, %v2607_v54 }
 0x1f8   : > { %2773 = vst [vmem:[%s4118_s22 + $0x510] sm:$0xff] %v2604_v58 }
 0x1f9   : > { %2774 = vst.msk [vmem:[%s4118_s22 + $0x518] sm:$0xff] %vm2611_vm4, %v2605_v30 }
 0x1fa PF: > { %s12_s9 = sadd.s32 1, %s3301_s9  }
 0x1fb   : > { %p9_p4 = scmp.ge.s32.totalorder %s12_s9, 4  }
 0x1fd   :  { %11 = sbr.rel (!%p9_p4) target bundleno = 1 (0x1), region = 61 }

</bundles_post_ra>
